<compile_context>
chip_gen: v6e
topology: v6e:2x2x1
jax: 0.10.0
libtpu: 0.0.40
codegen_flags: <defaults>
</compile_context>

<pallas_src>
import jax
import jax.numpy as jnp
from jax.experimental import pallas as pl
from jax.experimental.pallas import tpu as pltpu

LANE = 128


def _cdiv(a, b):
    return (a + b - 1) // b


def _round_up(n, m):
    return _cdiv(n, m) * m


def _num_tensorcores():
    """2 TensorCores per chip on v7x, 1 on v5e/v6e. Defaults to 1."""
    try:
        kind = jax.devices()[0].device_kind.lower()
    except Exception:
        return 1
    return 2 if ("v7" in kind or "7x" in kind) else 1


def _choose_batch_tiling(B, num_tc, max_tile=1024):
    """Pick (tile_b, B_pad).  Single step on 1-TC chips when it fits; even
    step count on 2-TC chips so both cores get equal tile counts."""
    B8 = _round_up(max(B, 1), 8)
    if num_tc <= 1:
        steps = max(1, _cdiv(B8, max_tile))
    else:
        steps = max(2, _cdiv(B8, max_tile))
        if steps % 2:
            steps += 1
    tile_b = _round_up(_cdiv(B8, steps), 8)
    B_pad = _round_up(B8, tile_b)
    return tile_b, B_pad


# ---------------------------------------------------------------------------
# Kernel
# ---------------------------------------------------------------------------
def mlp_kernel(*refs):
    """refs = (x_ref, w0_ref, b0_ref, w1_ref, b1_ref, ..., out_ref).

    All matmuls (MXU), ReLUs (VPU) and the final exact sigmoid (EUP exp +
    VPU divide) run on one batch tile.  Hidden dims are lane-padded with
    zeros, so padded columns/rows contribute nothing to the real outputs.
    """
    x_ref = refs[0]
    out_ref = refs[-1]
    wb_refs = refs[1:-1]
    n_total = len(wb_refs) // 2

    a = x_ref[...]                                       # (tile_b, in_dim) f32
    for i in range(n_total):
        w = wb_refs[2 * i][...]                          # (d_in_p, d_out_p)
        b = wb_refs[2 * i + 1][...]                      # (1, d_out_p)
        z = jnp.dot(a, w, preferred_element_type=jnp.float32) + b
        if i < n_total - 1:
            a = jnp.maximum(z, 0.0)                      # ReLU
        else:
            a = 1.0 / (1.0 + jnp.exp(-z))                # exact sigmoid
    out_ref[...] = a.astype(out_ref.dtype)


# ---------------------------------------------------------------------------
# One-time parameter preparation (hoisted out of the forward call)
# ---------------------------------------------------------------------------
def pad_params(params):
    """Zero-pad hidden feature dims to multiples of 128, ONCE.

    params: list of (W_t (d_in, d_out), b (1, d_out)).  The first layer's
    input dim and the last layer's output dim stay unpadded (their blocks use
    the full array extent).  Zero padding keeps the real outputs exact.
    """
    n = len(params)
    padded = []
    d_in_p = params[0][0].shape[0]                 # network input dim, unpadded
    for i, (w, b) in enumerate(params):
        d_in, d_out = w.shape
        last = (i == n - 1)
        d_out_p = d_out if last else _round_up(d_out, LANE)
        if (d_in_p, d_out_p) == (d_in, d_out):
            w_p = w.astype(jnp.float32)
            b_p = b.astype(jnp.float32)
        else:
            w_p = jnp.zeros((d_in_p, d_out_p), jnp.float32).at[:d_in, :d_out].set(w)
            b_p = jnp.zeros((1, d_out_p), jnp.float32).at[:, :d_out].set(b)
        padded.append((w_p, b_p))
        d_in_p = d_out_p
    return padded


# ---------------------------------------------------------------------------
# Forward
# ---------------------------------------------------------------------------
def mlp_forward(x, padded_params, *, tile_b=None):
    """x: (B, in_dim) f32; padded_params: output of pad_params()."""
    B, in_dim = x.shape
    assert in_dim == padded_params[0][0].shape[0]
    out_dim = padded_params[-1][0].shape[1]        # last layer is unpadded

    num_tc = _num_tensorcores()
    if tile_b is None:
        tile_b, B_pad = _choose_batch_tiling(B, num_tc)
    else:
        tile_b = _round_up(tile_b, 8)
        B_pad = _round_up(B, tile_b)

    x = x.astype(jnp.float32)
    if B_pad != B:                                 # batch-row padding only
        x = jnp.pad(x, ((0, B_pad - B), (0, 0)))

    grid = (B_pad // tile_b,)

    # --- advisory cost for the XLA scheduler (padded sizes) ---
    dims_p = [in_dim] + [w.shape[1] for w, _ in padded_params]
    flops = sum(2 * B_pad * a * b for a, b in zip(dims_p[:-1], dims_p[1:]))
    param_bytes = 4 * sum(int(w.size) + int(b.size) for w, b in padded_params)
    bytes_accessed = 4 * B_pad * (in_dim + out_dim) + param_bytes
    cost = pl.CostEstimate(flops=flops,
                           transcendentals=B_pad * out_dim,
                           bytes_accessed=bytes_accessed)

    def run(single_buffer_weights):
        in_specs = [pl.BlockSpec((tile_b, in_dim), lambda i: (i, 0))]
        args = [x]
        for w_p, b_p in padded_params:
            if single_buffer_weights:
                # Constant blocks: no double buffering needed -> halve VMEM.
                w_spec = pl.BlockSpec(w_p.shape, lambda i: (0, 0),
                                      pipeline_mode=pl.Buffered(1))
                b_spec = pl.BlockSpec(b_p.shape, lambda i: (0, 0),
                                      pipeline_mode=pl.Buffered(1))
            else:
                w_spec = pl.BlockSpec(w_p.shape, lambda i: (0, 0))
                b_spec = pl.BlockSpec(b_p.shape, lambda i: (0, 0))
            in_specs += [w_spec, b_spec]
            args += [w_p, b_p]
        out_spec = pl.BlockSpec((tile_b, out_dim), lambda i: (i, 0))

        # Explicit scoped-VMEM budget: resident weights (x buffer count),
        # double-buffered x/out tiles, plus activation headroom.
        wbuf = 1 if single_buffer_weights else 2
        widest = max(dims_p)
        need = (param_bytes * wbuf
                + 4 * 2 * tile_b * (in_dim + out_dim)
                + 4 * 4 * tile_b * widest)
        vmem_limit = int(min(64 << 20, max(32 << 20, 2 * need)))
        # TODO(synk): if param_bytes alone approaches v7x's 64 MiB VMEM,
        # switch to an N/K-tiled grid over the hidden dims instead of keeping
        # all weights resident (irrelevant at these sizes).

        out = pl.pallas_call(
            mlp_kernel,
            out_shape=jax.ShapeDtypeStruct((B_pad, out_dim), jnp.float32),
            grid_spec=pl.GridSpec(grid=grid, in_specs=in_specs,
                                  out_specs=out_spec),
            compiler_params=pltpu.CompilerParams(
                dimension_semantics=("parallel",),
                vmem_limit_bytes=vmem_limit),
            cost_estimate=cost,
        )(*args)
        return jax.block_until_ready(out)

    try:
        out_padded = run(True)
    except Exception:
        # Fallback if this Pallas build rejects single-buffered input blocks.
        out_padded = run(False)

    return out_padded[:B] if B_pad != B else out_padded


# ---------------------------------------------------------------------------
# Parameter init (mirrors Model.reset_params) and pure-JAX reference
# ---------------------------------------------------------------------------
def xavier_uniform(key, fan_in, fan_out, dtype=jnp.float32):
    bound = (6.0 / (fan_in + fan_out)) ** 0.5
    return jax.random.uniform(key, (fan_in, fan_out), dtype,
                              minval=-bound, maxval=bound)


def init_params(key, inp_dim, out_dim, n_hidden, n_layers):
    """Xavier-uniform weights, zero biases; weights stored as (in, out) == W.T."""
    layer_sizes = [n_hidden] * n_layers + [out_dim]
    params = []
    d_in = inp_dim
    for d_out in layer_sizes:
        key, sub = jax.random.split(key)
        w_t = xavier_uniform(sub, d_in, d_out)
        b = jnp.zeros((1, d_out), jnp.float32)
        params.append((w_t, b))
        d_in = d_out
    return params


def reference_forward(x, params):
    a = x
    for i, (w, b) in enumerate(params):
        z = a @ w + b
        a = jnp.maximum(z, 0.0) if i < len(params) - 1 else jax.nn.sigmoid(z)
    return a


if __name__ == "__main__":
    key = jax.random.PRNGKey(0)
    batch, inp_dim, out_dim, n_hidden, n_layers = 512, 16, 8, 32, 2

    k_x, k_p = jax.random.split(key)
    x = jax.random.normal(k_x, (batch, inp_dim), jnp.float32)
    params = init_params(k_p, inp_dim, out_dim, n_hidden, n_layers)
    padded = pad_params(params)          # one-time padding, hoisted out of forward

    out = mlp_forward(x, padded)
    out = jax.block_until_ready(out)

    ref = reference_forward(x, params)
    assert out.shape == (batch, out_dim)
    assert jnp.allclose(out, ref, atol=1e-5, rtol=1e-5), "mismatch vs JAX reference"

    print("KERNEL_OK")
</pallas_src>

<mosaic_0001>
module attributes {stable_mosaic.version = 11 : i64} {
  func.func @mlp_kernel(%arg0: i32, %arg1: memref<512x16xf32, #tpu.memory_space<vmem>>, %arg2: memref<16x128xf32, #tpu.memory_space<vmem>>, %arg3: memref<1x128xf32, #tpu.memory_space<vmem>>, %arg4: memref<128x128xf32, #tpu.memory_space<vmem>>, %arg5: memref<1x128xf32, #tpu.memory_space<vmem>>, %arg6: memref<128x8xf32, #tpu.memory_space<vmem>>, %arg7: memref<1x8xf32, #tpu.memory_space<vmem>>, %arg8: memref<512x8xf32, #tpu.memory_space<vmem>>) attributes {dimension_semantics = [#tpu.dimension_semantics<parallel>], iteration_bounds = array<i64: 1>, scalar_prefetch = 0 : i64, scratch_operands = 0 : i64, tpu.core_type = #tpu.core_type<tc>, window_params = [{transform_indices = @transform_0, window_bounds = array<i64: 512, 16>}, {pipeline_mode = #tpu.pipeline_mode<synchronous>, transform_indices = @transform_1, window_bounds = array<i64: 16, 128>}, {pipeline_mode = #tpu.pipeline_mode<synchronous>, transform_indices = @transform_2, window_bounds = array<i64: 1, 128>}, {pipeline_mode = #tpu.pipeline_mode<synchronous>, transform_indices = @transform_3, window_bounds = array<i64: 128, 128>}, {pipeline_mode = #tpu.pipeline_mode<synchronous>, transform_indices = @transform_4, window_bounds = array<i64: 1, 128>}, {pipeline_mode = #tpu.pipeline_mode<synchronous>, transform_indices = @transform_5, window_bounds = array<i64: 128, 8>}, {pipeline_mode = #tpu.pipeline_mode<synchronous>, transform_indices = @transform_6, window_bounds = array<i64: 1, 8>}, {transform_indices = @transform_7, window_bounds = array<i64: 512, 8>}]} {
    %c0 = arith.constant 0 : index
    %c0_0 = arith.constant 0 : index
    %0 = vector.load %arg1[%c0, %c0_0] : memref<512x16xf32, #tpu.memory_space<vmem>>, vector<512x16xf32>
    %c0_1 = arith.constant 0 : index
    %c0_2 = arith.constant 0 : index
    %1 = vector.load %arg2[%c0_1, %c0_2] : memref<16x128xf32, #tpu.memory_space<vmem>>, vector<16x128xf32>
    %c0_3 = arith.constant 0 : index
    %c0_4 = arith.constant 0 : index
    %2 = vector.load %arg3[%c0_3, %c0_4] : memref<1x128xf32, #tpu.memory_space<vmem>>, vector<1x128xf32>
    %cst = arith.constant dense<0.000000e+00> : vector<512x128xf32>
    %3 = tpu.matmul %0, %1, %cst {dimension_numbers = #tpu.dot_dimension_numbers<[1], [0], [0], [1], [0, 0, 1, 1], [], []>} : vector<512x16xf32>, vector<16x128xf32>, vector<512x128xf32> -> vector<512x128xf32>
    %4 = vector.broadcast %2 : vector<1x128xf32> to vector<512x128xf32>
    %5 = arith.addf %3, %4 : vector<512x128xf32>
    %cst_5 = arith.constant 0.000000e+00 : f32
    %6 = vector.broadcast %cst_5 : f32 to vector<512x128xf32>
    %7 = arith.maximumf %5, %6 : vector<512x128xf32>
    %c0_6 = arith.constant 0 : index
    %c0_7 = arith.constant 0 : index
    %8 = vector.load %arg4[%c0_6, %c0_7] : memref<128x128xf32, #tpu.memory_space<vmem>>, vector<128x128xf32>
    %c0_8 = arith.constant 0 : index
    %c0_9 = arith.constant 0 : index
    %9 = vector.load %arg5[%c0_8, %c0_9] : memref<1x128xf32, #tpu.memory_space<vmem>>, vector<1x128xf32>
    %cst_10 = arith.constant dense<0.000000e+00> : vector<512x128xf32>
    %10 = tpu.matmul %7, %8, %cst_10 {dimension_numbers = #tpu.dot_dimension_numbers<[1], [0], [0], [1], [0, 0, 1, 1], [], []>} : vector<512x128xf32>, vector<128x128xf32>, vector<512x128xf32> -> vector<512x128xf32>
    %11 = vector.broadcast %9 : vector<1x128xf32> to vector<512x128xf32>
    %12 = arith.addf %10, %11 : vector<512x128xf32>
    %cst_11 = arith.constant 0.000000e+00 : f32
    %13 = vector.broadcast %cst_11 : f32 to vector<512x128xf32>
    %14 = arith.maximumf %12, %13 : vector<512x128xf32>
    %c0_12 = arith.constant 0 : index
    %c0_13 = arith.constant 0 : index
    %15 = vector.load %arg6[%c0_12, %c0_13] : memref<128x8xf32, #tpu.memory_space<vmem>>, vector<128x8xf32>
    %c0_14 = arith.constant 0 : index
    %c0_15 = arith.constant 0 : index
    %16 = vector.load %arg7[%c0_14, %c0_15] : memref<1x8xf32, #tpu.memory_space<vmem>>, vector<1x8xf32>
    %cst_16 = arith.constant dense<0.000000e+00> : vector<512x8xf32>
    %17 = tpu.matmul %14, %15, %cst_16 {dimension_numbers = #tpu.dot_dimension_numbers<[1], [0], [0], [1], [0, 0, 1, 1], [], []>} : vector<512x128xf32>, vector<128x8xf32>, vector<512x8xf32> -> vector<512x8xf32>
    %18 = vector.broadcast %16 : vector<1x8xf32> to vector<512x8xf32>
    %19 = arith.addf %17, %18 : vector<512x8xf32>
    %cst_17 = arith.constant 0.000000e+00 : f32
    %20 = vector.broadcast %cst_17 : f32 to vector<512x8xf32>
    %21 = arith.subf %20, %19 : vector<512x8xf32>
    %22 = math.exp %21 : vector<512x8xf32>
    %cst_18 = arith.constant 1.000000e+00 : f32
    %23 = vector.broadcast %cst_18 : f32 to vector<512x8xf32>
    %24 = arith.addf %23, %22 : vector<512x8xf32>
    %cst_19 = arith.constant 1.000000e+00 : f32
    %25 = vector.broadcast %cst_19 : f32 to vector<512x8xf32>
    %26 = arith.divf %25, %24 : vector<512x8xf32>
    %c0_20 = arith.constant 0 : index
    %c0_21 = arith.constant 0 : index
    %27 = vector.load %arg8[%c0_20, %c0_21] : memref<512x8xf32, #tpu.memory_space<vmem>>, vector<512x8xf32>
    tpu.vector_store %arg8[%c0_20, %c0_21], %26 {strides = array<i32>} : memref<512x8xf32, #tpu.memory_space<vmem>>, vector<512x8xf32>,
    return
  }
  func.func @transform_0(%arg0: i32) -> (i32, i32) {
    %c0_i32 = arith.constant 0 : i32
    %c0_i32_0 = arith.constant 0 : i32
    return %arg0, %c0_i32 : i32, i32
  }
  func.func @transform_1(%arg0: i32) -> (i32, i32) {
    %c0_i32 = arith.constant 0 : i32
    %c0_i32_0 = arith.constant 0 : i32
    %c0_i32_1 = arith.constant 0 : i32
    return %c0_i32, %c0_i32_0 : i32, i32
  }
  func.func @transform_2(%arg0: i32) -> (i32, i32) {
    %c0_i32 = arith.constant 0 : i32
    %c0_i32_0 = arith.constant 0 : i32
    %c0_i32_1 = arith.constant 0 : i32
    return %c0_i32, %c0_i32_0 : i32, i32
  }
  func.func @transform_3(%arg0: i32) -> (i32, i32) {
    %c0_i32 = arith.constant 0 : i32
    %c0_i32_0 = arith.constant 0 : i32
    %c0_i32_1 = arith.constant 0 : i32
    return %c0_i32, %c0_i32_0 : i32, i32
  }
  func.func @transform_4(%arg0: i32) -> (i32, i32) {
    %c0_i32 = arith.constant 0 : i32
    %c0_i32_0 = arith.constant 0 : i32
    %c0_i32_1 = arith.constant 0 : i32
    return %c0_i32, %c0_i32_0 : i32, i32
  }
  func.func @transform_5(%arg0: i32) -> (i32, i32) {
    %c0_i32 = arith.constant 0 : i32
    %c0_i32_0 = arith.constant 0 : i32
    %c0_i32_1 = arith.constant 0 : i32
    return %c0_i32, %c0_i32_0 : i32, i32
  }
  func.func @transform_6(%arg0: i32) -> (i32, i32) {
    %c0_i32 = arith.constant 0 : i32
    %c0_i32_0 = arith.constant 0 : i32
    %c0_i32_1 = arith.constant 0 : i32
    return %c0_i32, %c0_i32_0 : i32, i32
  }
  func.func @transform_7(%arg0: i32) -> (i32, i32) {
    %c0_i32 = arith.constant 0 : i32
    %c0_i32_0 = arith.constant 0 : i32
    return %arg0, %c0_i32 : i32, i32
  }
}

module attributes {stable_mosaic.version = 11 : i64} {
  func.func @mlp_kernel(%arg0: i32, %arg1: memref<512x16xf32, #tpu.memory_space<vmem>>, %arg2: memref<16x128xf32, #tpu.memory_space<vmem>>, %arg3: memref<1x128xf32, #tpu.memory_space<vmem>>, %arg4: memref<128x128xf32, #tpu.memory_space<vmem>>, %arg5: memref<1x128xf32, #tpu.memory_space<vmem>>, %arg6: memref<128x8xf32, #tpu.memory_space<vmem>>, %arg7: memref<1x8xf32, #tpu.memory_space<vmem>>, %arg8: memref<512x8xf32, #tpu.memory_space<vmem>>) attributes {dimension_semantics = [#tpu.dimension_semantics<parallel>], iteration_bounds = array<i64: 1>, scalar_prefetch = 0 : i64, scratch_operands = 0 : i64, tpu.core_type = #tpu.core_type<tc>, window_params = [{transform_indices = @transform_0, window_bounds = array<i64: 512, 16>}, {pipeline_mode = #tpu.pipeline_mode<synchronous>, transform_indices = @transform_1, window_bounds = array<i64: 16, 128>}, {pipeline_mode = #tpu.pipeline_mode<synchronous>, transform_indices = @transform_2, window_bounds = array<i64: 1, 128>}, {pipeline_mode = #tpu.pipeline_mode<synchronous>, transform_indices = @transform_3, window_bounds = array<i64: 128, 128>}, {pipeline_mode = #tpu.pipeline_mode<synchronous>, transform_indices = @transform_4, window_bounds = array<i64: 1, 128>}, {pipeline_mode = #tpu.pipeline_mode<synchronous>, transform_indices = @transform_5, window_bounds = array<i64: 128, 8>}, {pipeline_mode = #tpu.pipeline_mode<synchronous>, transform_indices = @transform_6, window_bounds = array<i64: 1, 8>}, {transform_indices = @transform_7, window_bounds = array<i64: 512, 8>}]} {
    %c0 = arith.constant 0 : index
    %c0_0 = arith.constant 0 : index
    %0 = vector.load %arg1[%c0, %c0_0] : memref<512x16xf32, #tpu.memory_space<vmem>>, vector<512x16xf32>
    %c0_1 = arith.constant 0 : index
    %c0_2 = arith.constant 0 : index
    %1 = vector.load %arg2[%c0_1, %c0_2] : memref<16x128xf32, #tpu.memory_space<vmem>>, vector<16x128xf32>
    %c0_3 = arith.constant 0 : index
    %c0_4 = arith.constant 0 : index
    %2 = vector.load %arg3[%c0_3, %c0_4] : memref<1x128xf32, #tpu.memory_space<vmem>>, vector<1x128xf32>
    %cst = arith.constant dense<0.000000e+00> : vector<512x128xf32>
    %3 = tpu.matmul %0, %1, %cst {dimension_numbers = #tpu.dot_dimension_numbers<[1], [0], [0], [1], [0, 0, 1, 1], [], []>} : vector<512x16xf32>, vector<16x128xf32>, vector<512x128xf32> -> vector<512x128xf32>
    %4 = vector.broadcast %2 : vector<1x128xf32> to vector<512x128xf32>
    %5 = arith.addf %3, %4 : vector<512x128xf32>
    %cst_5 = arith.constant 0.000000e+00 : f32
    %6 = vector.broadcast %cst_5 : f32 to vector<512x128xf32>
    %7 = arith.maximumf %5, %6 : vector<512x128xf32>
    %c0_6 = arith.constant 0 : index
    %c0_7 = arith.constant 0 : index
    %8 = vector.load %arg4[%c0_6, %c0_7] : memref<128x128xf32, #tpu.memory_space<vmem>>, vector<128x128xf32>
    %c0_8 = arith.constant 0 : index
    %c0_9 = arith.constant 0 : index
    %9 = vector.load %arg5[%c0_8, %c0_9] : memref<1x128xf32, #tpu.memory_space<vmem>>, vector<1x128xf32>
    %cst_10 = arith.constant dense<0.000000e+00> : vector<512x128xf32>
    %10 = tpu.matmul %7, %8, %cst_10 {dimension_numbers = #tpu.dot_dimension_numbers<[1], [0], [0], [1], [0, 0, 1, 1], [], []>} : vector<512x128xf32>, vector<128x128xf32>, vector<512x128xf32> -> vector<512x128xf32>
    %11 = vector.broadcast %9 : vector<1x128xf32> to vector<512x128xf32>
    %12 = arith.addf %10, %11 : vector<512x128xf32>
    %cst_11 = arith.constant 0.000000e+00 : f32
    %13 = vector.broadcast %cst_11 : f32 to vector<512x128xf32>
    %14 = arith.maximumf %12, %13 : vector<512x128xf32>
    %c0_12 = arith.constant 0 : index
    %c0_13 = arith.constant 0 : index
    %15 = vector.load %arg6[%c0_12, %c0_13] : memref<128x8xf32, #tpu.memory_space<vmem>>, vector<128x8xf32>
    %c0_14 = arith.constant 0 : index
    %c0_15 = arith.constant 0 : index
    %16 = vector.load %arg7[%c0_14, %c0_15] : memref<1x8xf32, #tpu.memory_space<vmem>>, vector<1x8xf32>
    %cst_16 = arith.constant dense<0.000000e+00> : vector<512x8xf32>
    %17 = tpu.matmul %14, %15, %cst_16 {dimension_numbers = #tpu.dot_dimension_numbers<[1], [0], [0], [1], [0, 0, 1, 1], [], []>} : vector<512x128xf32>, vector<128x8xf32>, vector<512x8xf32> -> vector<512x8xf32>
    %18 = vector.broadcast %16 : vector<1x8xf32> to vector<512x8xf32>
    %19 = arith.addf %17, %18 : vector<512x8xf32>
    %cst_17 = arith.constant 0.000000e+00 : f32
    %20 = vector.broadcast %cst_17 : f32 to vector<512x8xf32>
    %21 = arith.subf %20, %19 : vector<512x8xf32>
    %22 = math.exp %21 : vector<512x8xf32>
    %cst_18 = arith.constant 1.000000e+00 : f32
    %23 = vector.broadcast %cst_18 : f32 to vector<512x8xf32>
    %24 = arith.addf %23, %22 : vector<512x8xf32>
    %cst_19 = arith.constant 1.000000e+00 : f32
    %25 = vector.broadcast %cst_19 : f32 to vector<512x8xf32>
    %26 = arith.divf %25, %24 : vector<512x8xf32>
    %c0_20 = arith.constant 0 : index
    %c0_21 = arith.constant 0 : index
    %27 = vector.load %arg8[%c0_20, %c0_21] : memref<512x8xf32, #tpu.memory_space<vmem>>, vector<512x8xf32>
    tpu.vector_store %arg8[%c0_20, %c0_21], %26 {strides = array<i32>} : memref<512x8xf32, #tpu.memory_space<vmem>>, vector<512x8xf32>,
    return
  }
  func.func @transform_0(%arg0: i32) -> (i32, i32) {
    %c0_i32 = arith.constant 0 : i32
    %c0_i32_0 = arith.constant 0 : i32
    return %arg0, %c0_i32 : i32, i32
  }
  func.func @transform_1(%arg0: i32) -> (i32, i32) {
    %c0_i32 = arith.constant 0 : i32
    %c0_i32_0 = arith.constant 0 : i32
    %c0_i32_1 = arith.constant 0 : i32
    return %c0_i32, %c0_i32_0 : i32, i32
  }
  func.func @transform_2(%arg0: i32) -> (i32, i32) {
    %c0_i32 = arith.constant 0 : i32
    %c0_i32_0 = arith.constant 0 : i32
    %c0_i32_1 = arith.constant 0 : i32
    return %c0_i32, %c0_i32_0 : i32, i32
  }
  func.func @transform_3(%arg0: i32) -> (i32, i32) {
    %c0_i32 = arith.constant 0 : i32
    %c0_i32_0 = arith.constant 0 : i32
    %c0_i32_1 = arith.constant 0 : i32
    return %c0_i32, %c0_i32_0 : i32, i32
  }
  func.func @transform_4(%arg0: i32) -> (i32, i32) {
    %c0_i32 = arith.constant 0 : i32
    %c0_i32_0 = arith.constant 0 : i32
    %c0_i32_1 = arith.constant 0 : i32
    return %c0_i32, %c0_i32_0 : i32, i32
  }
  func.func @transform_5(%arg0: i32) -> (i32, i32) {
    %c0_i32 = arith.constant 0 : i32
    %c0_i32_0 = arith.constant 0 : i32
    %c0_i32_1 = arith.constant 0 : i32
    return %c0_i32, %c0_i32_0 : i32, i32
  }
  func.func @transform_6(%arg0: i32) -> (i32, i32) {
    %c0_i32 = arith.constant 0 : i32
    %c0_i32_0 = arith.constant 0 : i32
    %c0_i32_1 = arith.constant 0 : i32
    return %c0_i32, %c0_i32_0 : i32, i32
  }
  func.func @transform_7(%arg0: i32) -> (i32, i32) {
    %c0_i32 = arith.constant 0 : i32
    %c0_i32_0 = arith.constant 0 : i32
    return %arg0, %c0_i32 : i32, i32
  }
}

</mosaic_0001>

<bundles_post_ra>
// kernel: tpu_custom_call.1
= control target key start
LH: loop header
LB: loop body
LE: loop exit
PB: predicated region body
PF: predicated region fallthrough
CT: control target
= control target key end

     0   :  { %vm99_vm0 = vcmask 130048   ;;  %vm2005_vm1 = vcmask 64512   ;;  %s3896_s1 = inlined_call_operand.vmem [shape: f32[16,128], index: 1, kind: input, shape index: {}]   ;;  %s3897_s0 = inlined_call_operand.vmem [shape: f32[512,16], index: 0, kind: input, shape index: {}]   ;;  %s3898_s3 = inlined_call_operand.vmem [shape: f32[128,128], index: 3, kind: input, shape index: {}]   ;;  %s3899_s2 = inlined_call_operand.vmem [shape: f32[1,128], index: 2, kind: input, shape index: {}]   ;;  %s3900_s5 = inlined_call_operand.vmem [shape: f32[128,8], index: 5, kind: input, shape index: {}]   ;;  %s3901_s4 = inlined_call_operand.vmem [shape: f32[1,128], index: 4, kind: input, shape index: {}]   ;;  %s3902_s6 = inlined_call_operand.vmem [shape: f32[1,8], index: 6, kind: input, shape index: {}]   ;;  %s3903_s7 = inlined_call_operand.vmem [shape: f32[512,8], index: 7, kind: output, shape index: {}]  }
   0x1   :  { %v91_v0 = vld [vmem:[%s3896_s1 + $0x8] sm:$0xff]  ;;  %v90_v1 = vld [vmem:[%s3896_s1] sm:$0xff]  ;;  %v28_v4 = vld [vmem:[%s3897_s0 + $0x10] sm:$0xff] }
   0x2   :  { %v26_v2 = vld [vmem:[%s3897_s0] sm:$0xff]  ;;  %2367 = vmatprep.subr.mxu0 %v91_v0  ;;  %v27_v3 = vld [vmem:[%s3897_s0 + $0x8] sm:$0xff]  ;;  %2723 = vmatprep.subr.mxu1 %v91_v0  ;;  %v29_v5 = vld [vmem:[%s3897_s0 + $0x18] sm:$0xff] }
   0x3   :  { %2371 = vmatprep.mubr.msk.f32.mxu0 %vm99_vm0, %v26_v2  ;;  %2368 = vmatpush3.msra.mxu0 %v91_v0  ;;  %v30_v6 = vld [vmem:[%s3897_s0 + $0x20] sm:$0xff]  ;;  %v31_v7 = vld [vmem:[%s3897_s0 + $0x28] sm:$0xff]  ;;  %v32_v8 = vld [vmem:[%s3897_s0 + $0x30] sm:$0xff] }
   0x4   :  { %2369 = vmatprep.subr.mxu0 %v90_v1  ;;  %2725 = vmatpush3.msra.mxu1 %v91_v0  ;;  %v58_v9 = vld [vmem:[%s3897_s0 + $0x100] sm:$0xff]  ;;  %v59_v10 = vld [vmem:[%s3897_s0 + $0x108] sm:$0xff]  ;;  %v60_v11 = vld [vmem:[%s3897_s0 + $0x110] sm:$0xff] }
   0x5   :  { %2370 = vmatpush3.msra.mxu0 %v90_v1  ;;  %2724 = vmatprep.subr.mxu1 %v90_v1  ;;  %v33_v12 = vld [vmem:[%s3897_s0 + $0x38] sm:$0xff]  ;;  %v34_v14 = vld [vmem:[%s3897_s0 + $0x40] sm:$0xff]  ;;  %v35_v16 = vld [vmem:[%s3897_s0 + $0x48] sm:$0xff] }
   0x6   :  { %2372 = vmatmul.mubr.msk.f32.vlgmr.msra.gmra.mxu0 %vm99_vm0, %v27_v3  ;;  %2726 = vmatpush3.msra.mxu1 %v90_v1  ;;  %v61_v13 = vld [vmem:[%s3897_s0 + $0x118] sm:$0xff]  ;;  %v62_v15 = vld [vmem:[%s3897_s0 + $0x120] sm:$0xff]  ;;  %v63_v17 = vld [vmem:[%s3897_s0 + $0x128] sm:$0xff] }
   0x7   :  { %2374 = vmatprep.mubr.msk.f32.mxu0 %vm99_vm0, %v28_v4  ;;  %2419 = vmatprep.mubr.msk.f32.mxu1 %vm99_vm0, %v58_v9  ;;  %v36_v18 = vld [vmem:[%s3897_s0 + $0x50] sm:$0xff]  ;;  %v37_v20 = vld [vmem:[%s3897_s0 + $0x58] sm:$0xff]  ;;  %v38_v23 = vld [vmem:[%s3897_s0 + $0x60] sm:$0xff] }
   0x8   :  { %2420 = vmatmul.mubr.msk.f32.vlgmr.msra.gmra.mxu1 %vm99_vm0, %v59_v10  ;;  %v64_v19 = vld [vmem:[%s3897_s0 + $0x130] sm:$0xff]  ;;  %v65_v21 = vld [vmem:[%s3897_s0 + $0x138] sm:$0xff]  ;;  %v66_v24 = vld [vmem:[%s3897_s0 + $0x140] sm:$0xff] }
   0x9   :  { %2422 = vmatprep.mubr.msk.f32.mxu1 %vm99_vm0, %v60_v11  ;;  %v756_v22 = vld [vmem:[%s3898_s3 + $0x78] sm:$0xff]  ;;  %v755_v25 = vld [vmem:[%s3898_s3 + $0x70] sm:$0xff]  ;;  %v39_v26 = vld [vmem:[%s3897_s0 + $0x68] sm:$0xff] }
   0xa   :  { %2375 = vmatmul.mubr.msk.f32.gmra.mxu0 %vm99_vm0, %v29_v5  ;;  %2467 = vmatprep.subr.mxu1 %v756_v22  ;;  %v67_v27 = vld [vmem:[%s3897_s0 + $0x148] sm:$0xff]  ;;  %v40_v28 = vld [vmem:[%s3897_s0 + $0x70] sm:$0xff]  ;;  %v41_v31 = vld [vmem:[%s3897_s0 + $0x78] sm:$0xff] }
   0xb   :  { %2377 = vmatprep.mubr.msk.f32.mxu0 %vm99_vm0, %v30_v6  ;;  %2468 = vmatpush3.msra.mxu1 %v756_v22  ;;  %v68_v29 = vld [vmem:[%s3897_s0 + $0x150] sm:$0xff]  ;;  %v754_v30 = vld [vmem:[%s3898_s3 + $0x68] sm:$0xff]  ;;  %v69_v32 = vld [vmem:[%s3897_s0 + $0x158] sm:$0xff] }
   0xc   :  { %2423 = vmatmul.mubr.msk.f32.gmra.mxu1 %vm99_vm0, %v61_v13  ;;  %2469 = vmatprep.subr.mxu1 %v755_v25  ;;  %v42_v33 = vld [vmem:[%s3897_s0 + $0x80] sm:$0xff]  ;;  %v43_v36 = vld [vmem:[%s3897_s0 + $0x88] sm:$0xff]  ;;  %v44_v38 = vld [vmem:[%s3897_s0 + $0x90] sm:$0xff] }
   0xd   :  { %2425 = vmatprep.mubr.msk.f32.mxu1 %vm99_vm0, %v62_v15  ;;  %2470 = vmatpush3.msra.mxu1 %v755_v25  ;;  %v70_v34 = vld [vmem:[%s3897_s0 + $0x160] sm:$0xff]  ;;  %v71_v37 = vld [vmem:[%s3897_s0 + $0x168] sm:$0xff]  ;;  %v72_v39 = vld [vmem:[%s3897_s0 + $0x170] sm:$0xff] }
   0xe   :  { %2378 = vmatmul.mubr.msk.f32.gmra.mxu0 %vm99_vm0, %v31_v7  ;;  %2471 = vmatprep.subr.mxu1 %v754_v30  ;;  %v753_v35 = vld [vmem:[%s3898_s3 + $0x60] sm:$0xff]  ;;  %v752_v40 = vld [vmem:[%s3898_s3 + $0x58] sm:$0xff]  ;;  %v751_v45 = vld [vmem:[%s3898_s3 + $0x50] sm:$0xff] }
   0xf   :  { %2380 = vmatprep.mubr.msk.f32.mxu0 %vm99_vm0, %v32_v8  ;;  %2472 = vmatpush3.msra.mxu1 %v754_v30  ;;  %v45_v41 = vld [vmem:[%s3897_s0 + $0x98] sm:$0xff]  ;;  %v46_v43 = vld [vmem:[%s3897_s0 + $0xa0] sm:$0xff]  ;;  %v47_v46 = vld [vmem:[%s3897_s0 + $0xa8] sm:$0xff] }
  0x10   :  { %2426 = vmatmul.mubr.msk.f32.gmra.mxu1 %vm99_vm0, %v63_v17  ;;  %2473 = vmatprep.subr.mxu1 %v753_v35  ;;  %v73_v42 = vld [vmem:[%s3897_s0 + $0x178] sm:$0xff]  ;;  %v74_v44 = vld [vmem:[%s3897_s0 + $0x180] sm:$0xff]  ;;  %v75_v47 = vld [vmem:[%s3897_s0 + $0x188] sm:$0xff] }
  0x11   :  { %2428 = vmatprep.mubr.msk.f32.mxu1 %vm99_vm0, %v64_v19  ;;  %2474 = vmatpush3.msra.mxu1 %v753_v35  ;;  %v48_v48 = vld [vmem:[%s3897_s0 + $0xb0] sm:$0xff]  ;;  %v750_v50 = vld [vmem:[%s3898_s3 + $0x48] sm:$0xff]  ;;  %v49_v51 = vld [vmem:[%s3897_s0 + $0xb8] sm:$0xff] }
  0x12   :  { %2381 = vmatmul.mubr.msk.f32.gmra.mxu0 %vm99_vm0, %v33_v12  ;;  %2475 = vmatprep.subr.mxu1 %v752_v40  ;;  %v76_v49 = vld [vmem:[%s3897_s0 + $0x190] sm:$0xff]  ;;  %v77_v52 = vld [vmem:[%s3897_s0 + $0x198] sm:$0xff]  ;;  %v50_v53 = vld [vmem:[%s3897_s0 + $0xc0] sm:$0xff] }
  0x13   :  { %2383 = vmatprep.mubr.msk.f32.mxu0 %vm99_vm0, %v34_v14  ;;  %2476 = vmatpush3.msra.mxu1 %v752_v40  ;;  %v78_v54 = vld [vmem:[%s3897_s0 + $0x1a0] sm:$0xff]  ;;  %v51_v56 = vld [vmem:[%s3897_s0 + $0xc8] sm:$0xff]  ;;  %v52_v58 = vld [vmem:[%s3897_s0 + $0xd0] sm:$0xff] }
  0x14   :  { %2429 = vmatmul.mubr.msk.f32.gmra.mxu1 %vm99_vm0, %v65_v21  ;;  %2477 = vmatprep.subr.mxu1 %v751_v45  ;;  %v749_v55 = vld [vmem:[%s3898_s3 + $0x40] sm:$0xff]  ;;  %v79_v57 = vld [vmem:[%s3897_s0 + $0x1a8] sm:$0xff]  ;;  %v80_v59 = vld [vmem:[%s3897_s0 + $0x1b0] sm:$0xff] }
  0x15   :  { %2431 = vmatprep.mubr.msk.f32.mxu1 %vm99_vm0, %v66_v24  ;;  %2478 = vmatpush3.msra.mxu1 %v751_v45  ;;  %v748_v60 = vld [vmem:[%s3898_s3 + $0x38] sm:$0xff]  ;;  %v54_v63 = vld [vmem:[%s3897_s0 + $0xe0] sm:$0xff]  ;;  %v747_v1 = vld [vmem:[%s3898_s3 + $0x30] sm:$0xff] }
  0x16   :  { %2384 = vmatmul.mubr.msk.f32.gmra.mxu0 %vm99_vm0, %v35_v16  ;;  %2479 = vmatprep.subr.mxu1 %v750_v50  ;;  %v53_v61 = vld [vmem:[%s3897_s0 + $0xd8] sm:$0xff]  ;;  %v82_v0 = vld [vmem:[%s3897_s0 + $0x1c0] sm:$0xff]  ;;  %v55_v2 = vld [vmem:[%s3897_s0 + $0xe8] sm:$0xff] }
  0x17   :  { %2386 = vmatprep.mubr.msk.f32.mxu0 %vm99_vm0, %v36_v18  ;;  %2480 = vmatpush3.msra.mxu1 %v750_v50  ;;  %v81_v62 = vld [vmem:[%s3897_s0 + $0x1b8] sm:$0xff]  ;;  %v83_v3 = vld [vmem:[%s3897_s0 + $0x1c8] sm:$0xff]  ;;  %v56_v4 = vld [vmem:[%s3897_s0 + $0xf0] sm:$0xff] }
  0x18   :  { %2432 = vmatmul.mubr.msk.f32.gmra.mxu1 %vm99_vm0, %v67_v27  ;;  %2481 = vmatprep.subr.mxu1 %v749_v55  ;;  %v84_v5 = vld [vmem:[%s3897_s0 + $0x1d0] sm:$0xff]  ;;  %v746_v6 = vld [vmem:[%s3898_s3 + $0x28] sm:$0xff]  ;;  %v57_v7 = vld [vmem:[%s3897_s0 + $0xf8] sm:$0xff] }
  0x19   :  { %2434 = vmatprep.mubr.msk.f32.mxu1 %vm99_vm0, %v68_v29  ;;  %2482 = vmatpush3.msra.mxu1 %v749_v55  ;;  %v85_v8 = vld [vmem:[%s3897_s0 + $0x1d8] sm:$0xff]  ;;  %v86_v9 = vld [vmem:[%s3897_s0 + $0x1e0] sm:$0xff]  ;;  %v87_v12 = vld [vmem:[%s3897_s0 + $0x1e8] sm:$0xff] }
  0x1a   :  { %2387 = vmatmul.mubr.msk.f32.gmra.mxu0 %vm99_vm0, %v37_v20  ;;  %2483 = vmatprep.subr.mxu1 %v748_v60  ;;  %v745_v10 = vld [vmem:[%s3898_s3 + $0x20] sm:$0xff]  ;;  %v744_v11 = vld [vmem:[%s3898_s3 + $0x18] sm:$0xff]  ;;  %v88_v13 = vld [vmem:[%s3897_s0 + $0x1f0] sm:$0xff] }
  0x1b   :  { %2389 = vmatprep.mubr.msk.f32.mxu0 %vm99_vm0, %v38_v23  ;;  %2484 = vmatpush3.msra.mxu1 %v748_v60  ;;  %v743_v14 = vld [vmem:[%s3898_s3 + $0x10] sm:$0xff]  ;;  %v89_v15 = vld [vmem:[%s3897_s0 + $0x1f8] sm:$0xff]  ;;  %v742_v16 = vld [vmem:[%s3898_s3 + $0x8] sm:$0xff] }
  0x1c   :  { %2435 = vmatmul.mubr.msk.f32.gmra.mxu1 %vm99_vm0, %v69_v32  ;;  %2485 = vmatprep.subr.mxu1 %v747_v1  ;;  %v741_v17 = vld [vmem:[%s3898_s3] sm:$0xff]  ;;  %v1228_v25 = vld [vmem:[%s3900_s5 + $0x78] sm:$0xff]  ;;  %v1223_v45 = vld [vmem:[%s3900_s5 + $0x50] sm:$0xff] }
  0x1d   :  { %2437 = vmatprep.mubr.msk.f32.mxu1 %vm99_vm0, %v70_v34  ;;  %2486 = vmatpush3.msra.mxu1 %v747_v1  ;;  %v3337_v18 = vld [vmem:[%s3899_s2] ss:$0 sm:$0xff]  ;;  %v1219_v1 = vld [vmem:[%s3900_s5 + $0x30] sm:$0xff] }
  0x1e   :  { %2390 = vmatmul.mubr.msk.f32.gmra.mxu0 %vm99_vm0, %v39_v26  ;;  %2487 = vmatprep.subr.mxu1 %v746_v6  ;;  %v1227_v26 = vld [vmem:[%s3900_s5 + $0x70] sm:$0xff]  ;;  %v1225_v35 = vld [vmem:[%s3900_s5 + $0x60] sm:$0xff] }
  0x1f   :  { %2392 = vmatprep.mubr.msk.f32.mxu0 %vm99_vm0, %v40_v28  ;;  %2488 = vmatpush3.msra.mxu1 %v746_v6  ;;  %v1221_v55 = vld [vmem:[%s3900_s5 + $0x40] sm:$0xff] }
  0x20   :  { %2438 = vmatmul.mubr.msk.f32.gmra.mxu1 %vm99_vm0, %v71_v37  ;;  %2489 = vmatprep.subr.mxu1 %v745_v10 }
  0x21   :  { %2440 = vmatprep.mubr.msk.f32.mxu1 %vm99_vm0, %v72_v39  ;;  %2490 = vmatpush3.msra.mxu1 %v745_v10  ;;  %v1217_v10 = vld [vmem:[%s3900_s5 + $0x20] sm:$0xff] }
  0x22   :  { %2393 = vmatmul.mubr.msk.f32.gmra.mxu0 %vm99_vm0, %v41_v31  ;;  %2491 = vmatprep.subr.mxu1 %v744_v11  ;;  %v1226_v31 = vld [vmem:[%s3900_s5 + $0x68] sm:$0xff] }
  0x23   :  { %2395 = vmatprep.mubr.msk.f32.mxu0 %vm99_vm0, %v42_v33  ;;  %2492 = vmatpush3.msra.mxu1 %v744_v11 }
  0x24   :  { %2441 = vmatmul.mubr.msk.f32.gmra.mxu1 %vm99_vm0, %v73_v42  ;;  %2493 = vmatprep.subr.mxu1 %v743_v14 }
  0x25   :  { %2443 = vmatprep.mubr.msk.f32.mxu1 %vm99_vm0, %v74_v44  ;;  %2494 = vmatpush3.msra.mxu1 %v743_v14 }
  0x26   :  { %2396 = vmatmul.mubr.msk.f32.gmra.mxu0 %vm99_vm0, %v43_v36  ;;  %2495 = vmatprep.subr.mxu1 %v742_v16 }
  0x27   :  { %2398 = vmatprep.mubr.msk.f32.mxu0 %vm99_vm0, %v44_v38  ;;  %2496 = vmatpush3.msra.mxu1 %v742_v16  ;;  %v1216_v16 = vld [vmem:[%s3900_s5 + $0x18] sm:$0xff] }
  0x28   :  { %2444 = vmatmul.mubr.msk.f32.gmra.mxu1 %vm99_vm0, %v75_v47  ;;  %2497 = vmatprep.subr.mxu1 %v741_v17 }
  0x29   :  { %2446 = vmatprep.mubr.msk.f32.mxu1 %vm99_vm0, %v76_v49  ;;  %2498 = vmatpush3.msra.mxu1 %v741_v17 }
  0x2a   :  { %2399 = vmatmul.mubr.msk.f32.gmra.mxu0 %vm99_vm0, %v45_v41  ;;  %2595 = vmatprep.subr.mxu0 %v1228_v25  ;;  %v1224_v41 = vld [vmem:[%s3900_s5 + $0x58] sm:$0xff] }
  0x2b   :  { %2401 = vmatprep.mubr.msk.f32.mxu0 %vm99_vm0, %v46_v43  ;;  %2596 = vmatpush3.msra.mxu0 %v1228_v25 }
  0x2c   :  { %2447 = vmatmul.mubr.msk.f32.gmra.mxu1 %vm99_vm0, %v77_v52  ;;  %2597 = vmatprep.subr.mxu0 %v1227_v26 }
  0x2d   :  { %2449 = vmatprep.mubr.msk.f32.mxu1 %vm99_vm0, %v78_v54  ;;  %2598 = vmatpush3.msra.mxu0 %v1227_v26  ;;  %v1214_v26 = vld [vmem:[%s3900_s5 + $0x8] sm:$0xff] }
  0x2e   :  { %2402 = vmatmul.mubr.msk.f32.gmra.mxu0 %vm99_vm0, %v47_v46  ;;  %2599 = vmatprep.subr.mxu0 %v1226_v31 }
  0x2f   :  { %2404 = vmatprep.mubr.msk.f32.mxu0 %vm99_vm0, %v48_v48  ;;  %2600 = vmatpush3.msra.mxu0 %v1226_v31 }
  0x30   :  { %2450 = vmatmul.mubr.msk.f32.gmra.mxu1 %vm99_vm0, %v79_v57  ;;  %2601 = vmatprep.subr.mxu0 %v1225_v35 }
  0x31   :  { %2452 = vmatprep.mubr.msk.f32.mxu1 %vm99_vm0, %v80_v59  ;;  %2602 = vmatpush3.msra.mxu0 %v1225_v35 }
  0x32   :  { %2405 = vmatmul.mubr.msk.f32.gmra.mxu0 %vm99_vm0, %v49_v51  ;;  %2603 = vmatprep.subr.mxu0 %v1224_v41  ;;  %v1222_v51 = vld [vmem:[%s3900_s5 + $0x48] sm:$0xff] }
  0x33   :  { %2407 = vmatprep.mubr.msk.f32.mxu0 %vm99_vm0, %v50_v53  ;;  %2604 = vmatpush3.msra.mxu0 %v1224_v41 }
  0x34   :  { %2453 = vmatmul.mubr.msk.f32.gmra.mxu1 %vm99_vm0, %v81_v62  ;;  %2605 = vmatprep.subr.mxu0 %v1223_v45 }
  0x35   :  { %2455 = vmatprep.mubr.msk.f32.mxu1 %vm99_vm0, %v82_v0  ;;  %2606 = vmatpush3.msra.mxu0 %v1223_v45 }
  0x36   :  { %2408 = vmatmul.mubr.msk.f32.gmra.mxu0 %vm99_vm0, %v51_v56  ;;  %2607 = vmatprep.subr.mxu0 %v1222_v51 }
  0x37   :  { %2410 = vmatprep.mubr.msk.f32.mxu0 %vm99_vm0, %v52_v58  ;;  %2608 = vmatpush3.msra.mxu0 %v1222_v51 }
  0x38   :  { %2456 = vmatmul.mubr.msk.f32.gmra.mxu1 %vm99_vm0, %v83_v3  ;;  %2609 = vmatprep.subr.mxu0 %v1221_v55 }
  0x39   :  { %2458 = vmatprep.mubr.msk.f32.mxu1 %vm99_vm0, %v84_v5  ;;  %2610 = vmatpush3.msra.mxu0 %v1221_v55 }
  0x3a   :  { %2411 = vmatmul.mubr.msk.f32.gmra.mxu0 %vm99_vm0, %v53_v61  ;;  %v1220_v61 = vld [vmem:[%s3900_s5 + $0x38] sm:$0xff] }
  0x3b   :  { %2413 = vmatprep.mubr.msk.f32.mxu0 %vm99_vm0, %v54_v63  ;;  %2611 = vmatprep.subr.mxu0 %v1220_v61 }
  0x3c   :  { %2459 = vmatmul.mubr.msk.f32.gmra.mxu1 %vm99_vm0, %v85_v8  ;;  %2612 = vmatpush3.msra.mxu0 %v1220_v61 }
  0x3d   :  { %2461 = vmatprep.mubr.msk.f32.mxu1 %vm99_vm0, %v86_v9  ;;  %2613 = vmatprep.subr.mxu0 %v1219_v1 }
  0x3e   :  { %2414 = vmatmul.mubr.msk.f32.gmra.mxu0 %vm99_vm0, %v55_v2 }
  0x3f   :  { %2416 = vmatprep.mubr.msk.f32.mxu0 %vm99_vm0, %v56_v4  ;;  %2614 = vmatpush3.msra.mxu0 %v1219_v1 }
  0x40   :  { %2462 = vmatmul.mubr.msk.f32.gmra.mxu1 %vm99_vm0, %v87_v12 }
  0x41   :  { %2464 = vmatprep.mubr.msk.f32.mxu1 %vm99_vm0, %v88_v13 }
  0x42   :  { %2417 = vmatmul.mubr.msk.f32.gmra.mxu0 %vm99_vm0, %v57_v7  ;;  %v1218_v7 = vld [vmem:[%s3900_s5 + $0x28] sm:$0xff] }
  0x43   :  { %2615 = vmatprep.subr.mxu0 %v1218_v7 }
  0x44   :  { %2465 = vmatmul.mubr.msk.f32.gmra.mxu1 %vm99_vm0, %v89_v15  ;;  %2616 = vmatpush3.msra.mxu0 %v1218_v7 }
  0x45   :  { %2617 = vmatprep.subr.mxu0 %v1217_v10 }
  0x46   :  { %2618 = vmatpush3.msra.mxu0 %v1217_v10 }
  0x47   :  { %2619 = vmatprep.subr.mxu0 %v1216_v16 }
  0x48   :  { %2620 = vmatpush3.msra.mxu0 %v1216_v16 }
  0xc6   :  { %v2373_v19 = vpop.f32.mrf.mxu0 }
  0xc7   :  { %v364_v20 = vadd.f32 %v2373_v19, %v3337_v18 }
  0xc8   :  { %v358_v21 = vpop.f32.mrf.mxu0  ;;  %v3352_v33 = vpop.f32.mrf.mxu1 }
  0xc9   :  { %v359_v22 = vadd.f32 %v3337_v18, %v358_v21  ;;  %v678_v27 = vmax.f32 %v364_v20, 0.0  ;;  %v1215_v20 = vld [vmem:[%s3900_s5 + $0x10] sm:$0xff] }
  0xca   :  { %v2376_v23 = vpop.f32.mrf.mxu0  ;;  %v3358_v39 = vpop.f32.mrf.mxu1  ;;  %2621 = vmatprep.subr.mxu0 %v1215_v20 }
  0xcb   :  { %v677_v24 = vmax.f32 %v359_v22, 0.0  ;;  %v374_v28 = vadd.f32 %v2376_v23, %v3337_v18  ;;  %2622 = vmatpush3.msra.mxu0 %v1215_v20 }
  0xcc   :  { %v368_v29 = vpop.f32.mrf.mxu0  ;;  %v3364_v43 = vpop.f32.mrf.mxu1  ;;  %2623 = vmatprep.subr.mxu0 %v1214_v26 }
  0xcd   :  { %v369_v30 = vadd.f32 %v3337_v18, %v368_v29  ;;  %2499 = vmatprep.mubr.f32.mxu1 %v677_v24  ;;  %v680_v36 = vmax.f32 %v374_v28, 0.0  ;;  %2624 = vmatpush3.msra.mxu0 %v1214_v26 }
  0xce   :  { %v2379_v32 = vpop.f32.mrf.mxu0  ;;  %2500 = vmatmul.mubr.f32.vlgmr.msra.gmra.mxu1 %v678_v27  ;;  %v3370_v49 = vpop.f32.mrf.mxu1 }
  0xcf   :  { %v679_v34 = vmax.f32 %v369_v30, 0.0  ;;  %v384_v37 = vadd.f32 %v2379_v32, %v3337_v18 }
  0xd0   :  { %v378_v38 = vpop.f32.mrf.mxu0  ;;  %v3376_v53 = vpop.f32.mrf.mxu1 }
  0xd1   :  { %v379_v40 = vadd.f32 %v3337_v18, %v378_v38  ;;  %2502 = vmatprep.mubr.f32.mxu1 %v679_v34  ;;  %v682_v46 = vmax.f32 %v384_v37, 0.0 }
  0xd2   :  { %v2382_v42 = vpop.f32.mrf.mxu0  ;;  %2503 = vmatmul.mubr.f32.gmra.mxu1 %v680_v36  ;;  %v3382_v59 = vpop.f32.mrf.mxu1 }
  0xd3   :  { %v681_v44 = vmax.f32 %v379_v40, 0.0  ;;  %v394_v47 = vadd.f32 %v2382_v42, %v3337_v18 }
  0xd4   :  { %v388_v48 = vpop.f32.mrf.mxu0  ;;  %v3388_v63 = vpop.f32.mrf.mxu1 }
  0xd5   :  { %v389_v50 = vadd.f32 %v3337_v18, %v388_v48  ;;  %2505 = vmatprep.mubr.f32.mxu1 %v681_v44  ;;  %v684_v56 = vmax.f32 %v394_v47, 0.0 }
  0xd6   :  { %v2385_v52 = vpop.f32.mrf.mxu0  ;;  %2506 = vmatmul.mubr.f32.gmra.mxu1 %v682_v46  ;;  %v3394_v5 = vpop.f32.mrf.mxu1 }
  0xd7   :  { %v683_v54 = vmax.f32 %v389_v50, 0.0  ;;  %v404_v57 = vadd.f32 %v2385_v52, %v3337_v18 }
  0xd8   :  { %v398_v58 = vpop.f32.mrf.mxu0  ;;  %v3404_v14 = vpop.f32.mrf.mxu1 }
  0xd9   :  { %v399_v60 = vadd.f32 %v3337_v18, %v398_v58  ;;  %2508 = vmatprep.mubr.f32.mxu1 %v683_v54  ;;  %v686_v2 = vmax.f32 %v404_v57, 0.0 }
  0xda   :  { %v2388_v62 = vpop.f32.mrf.mxu0  ;;  %2509 = vmatmul.mubr.f32.gmra.mxu1 %v684_v56  ;;  %v3414_v24 = vpop.f32.mrf.mxu1 }
  0xdb   :  { %v685_v0 = vmax.f32 %v399_v60, 0.0  ;;  %v414_v3 = vadd.f32 %v2388_v62, %v3337_v18 }
  0xdc   :  { %v408_v4 = vpop.f32.mrf.mxu0  ;;  %v3421_v32 = vpop.f32.mrf.mxu1 }
  0xdd   :  { %v409_v6 = vadd.f32 %v3337_v18, %v408_v4  ;;  %2511 = vmatprep.mubr.f32.mxu1 %v685_v0  ;;  %v688_v11 = vmax.f32 %v414_v3, 0.0 }
  0xde   :  { %v2391_v8 = vpop.f32.mrf.mxu0  ;;  %2512 = vmatmul.mubr.f32.gmra.mxu1 %v686_v2  ;;  %v3425_v41 = vpop.f32.mrf.mxu1 }
  0xdf   :  { %v687_v9 = vmax.f32 %v409_v6, 0.0  ;;  %v424_v12 = vadd.f32 %v2391_v8, %v3337_v18 }
  0xe0   :  { %v418_v13 = vpop.f32.mrf.mxu0  ;;  %v3429_v50 = vpop.f32.mrf.mxu1 }
  0xe1   :  { %v419_v15 = vadd.f32 %v3337_v18, %v418_v13  ;;  %2514 = vmatprep.mubr.f32.mxu1 %v687_v9  ;;  %v690_v21 = vmax.f32 %v424_v12, 0.0 }
  0xe2   :  { %v2394_v17 = vpop.f32.mrf.mxu0  ;;  %2515 = vmatmul.mubr.f32.gmra.mxu1 %v688_v11  ;;  %v3433_v58 = vpop.f32.mrf.mxu1 }
  0xe3   :  { %v689_v19 = vmax.f32 %v419_v15, 0.0  ;;  %v434_v22 = vadd.f32 %v2394_v17, %v3337_v18 }
  0xe4   :  { %v428_v23 = vpop.f32.mrf.mxu0  ;;  %v3437_v3 = vpop.f32.mrf.mxu1 }
  0xe5   :  { %v429_v25 = vadd.f32 %v3337_v18, %v428_v23  ;;  %2517 = vmatprep.mubr.f32.mxu1 %v689_v19  ;;  %v692_v29 = vmax.f32 %v434_v22, 0.0 }
  0xe6   :  { %v2397_v27 = vpop.f32.mrf.mxu0  ;;  %2518 = vmatmul.mubr.f32.gmra.mxu1 %v690_v21  ;;  %v3441_v11 = vpop.f32.mrf.mxu1 }
  0xe7   :  { %v691_v28 = vmax.f32 %v429_v25, 0.0  ;;  %v444_v30 = vadd.f32 %v2397_v27, %v3337_v18  ;;  %v519_v25 = vadd.f32 %v3337_v18, %v3358_v39 }
  0xe8   :  { %v438_v31 = vpop.f32.mrf.mxu0  ;;  %v3445_v20 = vpop.f32.mrf.mxu1 }
  0xe9   :  { %v439_v34 = vadd.f32 %v3337_v18, %v438_v31  ;;  %2520 = vmatprep.mubr.f32.mxu1 %v691_v28  ;;  %v694_v37 = vmax.f32 %v444_v30, 0.0 }
  0xea   :  { %v2400_v35 = vpop.f32.mrf.mxu0  ;;  %2521 = vmatmul.mubr.f32.gmra.mxu1 %v692_v29  ;;  %v598_v29 = vpop.f32.mrf.mxu1 }
  0xeb   :  { %v693_v36 = vmax.f32 %v439_v34, 0.0  ;;  %v454_v38 = vadd.f32 %v2400_v35, %v3337_v18  ;;  %v709_v34 = vmax.f32 %v519_v25, 0.0  ;;  %v529_v35 = vadd.f32 %v3337_v18, %v3370_v49 }
  0xec   :  { %v448_v40 = vpop.f32.mrf.mxu0 }
  0xed   :  { %v449_v42 = vadd.f32 %v3337_v18, %v448_v40  ;;  %2523 = vmatprep.mubr.f32.mxu1 %v693_v36  ;;  %v696_v46 = vmax.f32 %v454_v38, 0.0  ;;  %v3456_v38 = vpop.f32.mrf.mxu1  ;;  %v711_v39 = vmax.f32 %v529_v35, 0.0  ;;  %v539_v40 = vadd.f32 %v3337_v18, %v3382_v59 }
  0xee   :  { %v2403_v44 = vpop.f32.mrf.mxu0  ;;  %2524 = vmatmul.mubr.f32.gmra.mxu1 %v694_v37  ;;  %v524_v37 = vadd.f32 %v3352_v33, %v3337_v18  ;;  %v549_v33 = vadd.f32 %v3337_v18, %v3394_v5  ;;  %v559_v59 = vadd.f32 %v3337_v18, %v3414_v24  ;;  %v564_v24 = vadd.f32 %v3404_v14, %v3337_v18 }
  0xef   :  { %v695_v45 = vmax.f32 %v449_v42, 0.0  ;;  %v464_v47 = vadd.f32 %v2403_v44, %v3337_v18  ;;  %v534_v44 = vadd.f32 %v3364_v43, %v3337_v18  ;;  %v713_v49 = vmax.f32 %v539_v40, 0.0  ;;  %v1213_v43 = vld [vmem:[%s3900_s5] sm:$0xff] }
  0xf0   :  { %v458_v48 = vpop.f32.mrf.mxu0  ;;  %v710_v42 = vmax.f32 %v524_v37, 0.0  ;;  %2625 = vmatprep.subr.mxu0 %v1213_v43  ;;  %v584_v14 = vadd.f32 %v3429_v50, %v3337_v18  ;;  %v604_v50 = vadd.f32 %v3445_v20, %v3337_v18 }
  0xf1   :  { %v459_v51 = vadd.f32 %v3337_v18, %v458_v48  ;;  %2526 = vmatprep.mubr.f32.mxu1 %v695_v45  ;;  %v698_v55 = vmax.f32 %v464_v47, 0.0  ;;  %v608_v45 = vpop.f32.mrf.mxu1  ;;  %v544_v47 = vadd.f32 %v3376_v53, %v3337_v18  ;;  %2626 = vmatpush3.msra.mxu0 %v1213_v43  ;;  %v717_v53 = vmax.f32 %v559_v59, 0.0  ;;  %v3508_v59 = vld [vmem:[%s3901_s4] ss:$0 sm:$0xff] }
  0xf2   :  { %v2406_v52 = vpop.f32.mrf.mxu0  ;;  %2527 = vmatmul.mubr.f32.gmra.mxu1 %v696_v46  ;;  %v712_v46 = vmax.f32 %v534_v44, 0.0 }
  0xf3   :  { %v697_v54 = vmax.f32 %v459_v51, 0.0  ;;  %v474_v56 = vadd.f32 %v2406_v52, %v3337_v18  ;;  %v2451_v48 = vpop.f32.mrf.mxu1  ;;  %v715_v51 = vmax.f32 %v549_v33, 0.0  ;;  %v714_v52 = vmax.f32 %v544_v47, 0.0 }
  0xf4   :  { %v468_v57 = vpop.f32.mrf.mxu0 }
  0xf5   :  { %v469_v60 = vadd.f32 %v3337_v18, %v468_v57  ;;  %2529 = vmatprep.mubr.f32.mxu1 %v697_v54  ;;  %v700_v0 = vmax.f32 %v474_v56, 0.0  ;;  %v554_v54 = vadd.f32 %v3388_v63, %v3337_v18  ;;  %v618_v5 = vpop.f32.mrf.mxu1  ;;  %v579_v63 = vadd.f32 %v3337_v18, %v3433_v58 }
  0xf6   :  { %v2409_v61 = vpop.f32.mrf.mxu0  ;;  %2530 = vmatmul.mubr.f32.gmra.mxu1 %v698_v55  ;;  %v569_v55 = vadd.f32 %v3337_v18, %v3425_v41  ;;  %v589_v41 = vadd.f32 %v3337_v18, %v3441_v11  ;;  %v599_v58 = vadd.f32 %v3337_v18, %v598_v29 }
  0xf7   :  { %v699_v62 = vmax.f32 %v469_v60, 0.0  ;;  %v484_v1 = vadd.f32 %v2409_v61, %v3337_v18  ;;  %v716_v56 = vmax.f32 %v554_v54, 0.0  ;;  %v2454_v57 = vpop.f32.mrf.mxu1  ;;  %v718_v61 = vmax.f32 %v564_v24, 0.0 }
  0xf8   :  { %v478_v2 = vpop.f32.mrf.mxu0  ;;  %v719_v60 = vmax.f32 %v569_v55, 0.0 }
  0xf9   :  { %v479_v4 = vadd.f32 %v3337_v18, %v478_v2  ;;  %2532 = vmatprep.mubr.f32.mxu1 %v699_v62  ;;  %v702_v8 = vmax.f32 %v484_v1, 0.0  ;;  %v574_v62 = vadd.f32 %v3421_v32, %v3337_v18  ;;  %v721_v1 = vmax.f32 %v579_v63, 0.0 }
  0xfa   :  { %v2412_v6 = vpop.f32.mrf.mxu0  ;;  %2533 = vmatmul.mubr.f32.gmra.mxu1 %v700_v0  ;;  %v628_v0 = vpop.f32.mrf.mxu1  ;;  %v594_v32 = vadd.f32 %v3437_v3, %v3337_v18  ;;  %v614_v3 = vadd.f32 %v3456_v38, %v3337_v18 }
  0xfb   :  { %v701_v7 = vmax.f32 %v479_v4, 0.0  ;;  %v494_v9 = vadd.f32 %v2412_v6, %v3337_v18  ;;  %v720_v2 = vmax.f32 %v574_v62, 0.0  ;;  %v723_v6 = vmax.f32 %v589_v41, 0.0 }
  0xfc   :  { %v488_v10 = vpop.f32.mrf.mxu0  ;;  %v2457_v4 = vpop.f32.mrf.mxu1  ;;  %v724_v11 = vmax.f32 %v594_v32, 0.0 }
  0xfd   :  { %v489_v12 = vadd.f32 %v3337_v18, %v488_v10  ;;  %2535 = vmatprep.mubr.f32.mxu1 %v701_v7  ;;  %v704_v16 = vmax.f32 %v494_v9, 0.0  ;;  %v722_v7 = vmax.f32 %v584_v14, 0.0  ;;  %v725_v9 = vmax.f32 %v599_v58, 0.0 }
  0xfe   :  { %v2415_v13 = vpop.f32.mrf.mxu0  ;;  %2536 = vmatmul.mubr.f32.gmra.mxu1 %v702_v8  ;;  %v638_v8 = vpop.f32.mrf.mxu1  ;;  %v609_v10 = vadd.f32 %v3337_v18, %v608_v45  ;;  %v644_v35 = vadd.f32 %v2457_v4, %v3337_v18 }
  0xff   :  { %v703_v15 = vmax.f32 %v489_v12, 0.0  ;;  %v504_v17 = vadd.f32 %v2415_v13, %v3337_v18 }
 0x100   :  { %v498_v19 = vpop.f32.mrf.mxu0  ;;  %v2460_v12 = vpop.f32.mrf.mxu1  ;;  %v727_v13 = vmax.f32 %v609_v10, 0.0 }
 0x101   :  { %v499_v21 = vadd.f32 %v3337_v18, %v498_v19  ;;  %2538 = vmatprep.mubr.f32.mxu1 %v703_v15  ;;  %v706_v26 = vmax.f32 %v504_v17, 0.0  ;;  %v619_v15 = vadd.f32 %v3337_v18, %v618_v5  ;;  %v654_v40 = vadd.f32 %v2460_v12, %v3337_v18 }
 0x102   :  { %v2418_v22 = vpop.f32.mrf.mxu0  ;;  %2539 = vmatmul.mubr.f32.gmra.mxu1 %v704_v16  ;;  %v726_v16 = vmax.f32 %v604_v50, 0.0  ;;  %v648_v17 = vpop.f32.mrf.mxu1 }
 0x103   :  { %v705_v23 = vmax.f32 %v499_v21, 0.0  ;;  %v514_v27 = vadd.f32 %v2418_v22, %v3337_v18  ;;  %v729_v19 = vmax.f32 %v619_v15, 0.0  ;;  %v629_v21 = vadd.f32 %v3337_v18, %v628_v0 }
 0x104   :  { %v508_v28 = vpop.f32.mrf.mxu0  ;;  %v728_v22 = vmax.f32 %v614_v3, 0.0  ;;  %v2463_v20 = vpop.f32.mrf.mxu1 }
 0x105   :  { %v509_v30 = vadd.f32 %v3337_v18, %v508_v28  ;;  %2541 = vmatprep.mubr.f32.mxu1 %v705_v23  ;;  %v708_v36 = vmax.f32 %v514_v27, 0.0  ;;  %v624_v23 = vadd.f32 %v2451_v48, %v3337_v18  ;;  %v731_v25 = vmax.f32 %v629_v21, 0.0 }
 0x106   :  { %2542 = vmatmul.mubr.f32.gmra.mxu1 %v706_v26  ;;  %v639_v26 = vadd.f32 %v3337_v18, %v638_v8  ;;  %v634_v28 = vadd.f32 %v2454_v57, %v3337_v18  ;;  %v658_v29 = vpop.f32.mrf.mxu1  ;;  %v664_v33 = vadd.f32 %v2463_v20, %v3337_v18 }
 0x107   :  { %v707_v31 = vmax.f32 %v509_v30, 0.0  ;;  %v730_v27 = vmax.f32 %v624_v23, 0.0  ;;  %v659_v38 = vadd.f32 %v3337_v18, %v658_v29 }
 0x108   :  { %v733_v30 = vmax.f32 %v639_v26, 0.0  ;;  %v738_v47 = vmax.f32 %v664_v33, 0.0 }
 0x109   :  { %2544 = vmatprep.mubr.f32.mxu1 %v707_v31  ;;  %v649_v31 = vadd.f32 %v3337_v18, %v648_v17  ;;  %v737_v44 = vmax.f32 %v659_v38, 0.0 }
 0x10a   :  { %2545 = vmatmul.mubr.f32.gmra.mxu1 %v708_v36  ;;  %v2466_v36 = vpop.f32.mrf.mxu1 }
 0x10b   :  { %2547 = vmatprep.mubr.f32.mxu1 %v709_v34  ;;  %v732_v34 = vmax.f32 %v634_v28, 0.0  ;;  %v735_v37 = vmax.f32 %v649_v31, 0.0  ;;  %v674_v48 = vadd.f32 %v2466_v36, %v3337_v18 }
 0x10e   :  { %2548 = vmatmul.mubr.f32.gmra.mxu1 %v710_v42  ;;  %v668_v42 = vpop.f32.mrf.mxu1 }
 0x10f   :  { %2550 = vmatprep.mubr.f32.mxu1 %v711_v39  ;;  %v734_v39 = vmax.f32 %v644_v35, 0.0  ;;  %v669_v45 = vadd.f32 %v3337_v18, %v668_v42 }
 0x112   :  { %2551 = vmatmul.mubr.f32.gmra.mxu1 %v712_v46  ;;  %v739_v46 = vmax.f32 %v669_v45, 0.0 }
 0x113   :  { %2553 = vmatprep.mubr.f32.mxu1 %v713_v49  ;;  %v736_v49 = vmax.f32 %v654_v40, 0.0 }
 0x116   :  { %2554 = vmatmul.mubr.f32.gmra.mxu1 %v714_v52 }
 0x117   :  { %2556 = vmatprep.mubr.f32.mxu1 %v715_v51  ;;  %v740_v51 = vmax.f32 %v674_v48, 0.0 }
 0x11a   :  { %2557 = vmatmul.mubr.f32.gmra.mxu1 %v716_v56 }
 0x11b   :  { %2559 = vmatprep.mubr.f32.mxu1 %v717_v53 }
 0x11e   :  { %2560 = vmatmul.mubr.f32.gmra.mxu1 %v718_v61 }
 0x11f   :  { %2562 = vmatprep.mubr.f32.mxu1 %v719_v60 }
 0x122   :  { %2563 = vmatmul.mubr.f32.gmra.mxu1 %v720_v2 }
 0x123   :  { %2565 = vmatprep.mubr.f32.mxu1 %v721_v1 }
 0x126   :  { %2566 = vmatmul.mubr.f32.gmra.mxu1 %v722_v7 }
 0x127   :  { %2568 = vmatprep.mubr.f32.mxu1 %v723_v6 }
 0x12a   :  { %2569 = vmatmul.mubr.f32.gmra.mxu1 %v724_v11 }
 0x12b   :  { %2571 = vmatprep.mubr.f32.mxu1 %v725_v9 }
 0x12e   :  { %2572 = vmatmul.mubr.f32.gmra.mxu1 %v726_v16 }
 0x12f   :  { %2574 = vmatprep.mubr.f32.mxu1 %v727_v13 }
 0x132   :  { %2575 = vmatmul.mubr.f32.gmra.mxu1 %v728_v22 }
 0x133   :  { %2577 = vmatprep.mubr.f32.mxu1 %v729_v19 }
 0x136   :  { %2578 = vmatmul.mubr.f32.gmra.mxu1 %v730_v27 }
 0x137   :  { %2580 = vmatprep.mubr.f32.mxu1 %v731_v25 }
 0x13a   :  { %2581 = vmatmul.mubr.f32.gmra.mxu1 %v732_v34 }
 0x13b   :  { %2583 = vmatprep.mubr.f32.mxu1 %v733_v30 }
 0x13e   :  { %2584 = vmatmul.mubr.f32.gmra.mxu1 %v734_v39 }
 0x13f   :  { %2586 = vmatprep.mubr.f32.mxu1 %v735_v37 }
 0x142   :  { %2587 = vmatmul.mubr.f32.gmra.mxu1 %v736_v49 }
 0x143   :  { %2589 = vmatprep.mubr.f32.mxu1 %v737_v44 }
 0x146   :  { %2590 = vmatmul.mubr.f32.gmra.mxu1 %v738_v47 }
 0x147   :  { %2592 = vmatprep.mubr.f32.mxu1 %v739_v46 }
 0x14a   :  { %2593 = vmatmul.mubr.f32.gmra.mxu1 %v740_v51 }
 0x18e   :  { %v2501_v43 = vpop.f32.mrf.mxu1 }
 0x18f   :  { %v836_v52 = vadd.f32 %v2501_v43, %v3508_v59 }
 0x190   :  { %v830_v54 = vpop.f32.mrf.mxu1 }
 0x191   :  { %v831_v5 = vadd.f32 %v3508_v59, %v830_v54  ;;  %v1150_v56 = vmax.f32 %v836_v52, 0.0 }
 0x192   :  { %v2504_v53 = vpop.f32.mrf.mxu1 }
 0x193   :  { %v1149_v55 = vmax.f32 %v831_v5, 0.0  ;;  %v846_v18 = vadd.f32 %v2504_v53, %v3508_v59 }
 0x194   :  { %v840_v24 = vpop.f32.mrf.mxu1 }
 0x195   :  { %v841_v57 = vadd.f32 %v3508_v59, %v840_v24  ;;  %2627 = vmatprep.mubr.f32.mxu0 %v1149_v55  ;;  %v1152_v61 = vmax.f32 %v846_v18, 0.0 }
 0x196   :  { %v2507_v60 = vpop.f32.mrf.mxu1  ;;  %2628 = vmatmul.mubr.f32.vlgmr.msra.gmra.mxu0 %v1150_v56 }
 0x197   :  { %v1151_v63 = vmax.f32 %v841_v57, 0.0  ;;  %v856_v62 = vadd.f32 %v2507_v60, %v3508_v59 }
 0x198   :  { %v850_v0 = vpop.f32.mrf.mxu1 }
 0x199   :  { %v851_v1 = vadd.f32 %v3508_v59, %v850_v0  ;;  %2630 = vmatprep.mubr.f32.mxu0 %v1151_v63  ;;  %v1154_v14 = vmax.f32 %v856_v62, 0.0 }
 0x19a   :  { %v2510_v41 = vpop.f32.mrf.mxu1  ;;  %2631 = vmatmul.mubr.f32.gmra.mxu0 %v1152_v61 }
 0x19b   :  { %v1153_v2 = vmax.f32 %v851_v1, 0.0  ;;  %v866_v4 = vadd.f32 %v2510_v41, %v3508_v59 }
 0x19c   :  { %v860_v6 = vpop.f32.mrf.mxu1 }
 0x19d   :  { %v861_v58 = vadd.f32 %v3508_v59, %v860_v6  ;;  %2633 = vmatprep.mubr.f32.mxu0 %v1153_v2  ;;  %v1156_v8 = vmax.f32 %v866_v4, 0.0 }
 0x19e   :  { %v2513_v7 = vpop.f32.mrf.mxu1  ;;  %2634 = vmatmul.mubr.f32.gmra.mxu0 %v1154_v14 }
 0x19f   :  { %v1155_v32 = vmax.f32 %v861_v58, 0.0  ;;  %v876_v9 = vadd.f32 %v2513_v7, %v3508_v59 }
 0x1a0   :  { %v870_v10 = vpop.f32.mrf.mxu1 }
 0x1a1   :  { %v871_v11 = vadd.f32 %v3508_v59, %v870_v10  ;;  %2636 = vmatprep.mubr.f32.mxu0 %v1155_v32  ;;  %v1158_v13 = vmax.f32 %v876_v9, 0.0 }
 0x1a2   :  { %v2516_v50 = vpop.f32.mrf.mxu1  ;;  %2637 = vmatmul.mubr.f32.gmra.mxu0 %v1156_v8 }
 0x1a3   :  { %v1157_v12 = vmax.f32 %v871_v11, 0.0  ;;  %v886_v15 = vadd.f32 %v2516_v50, %v3508_v59 }
 0x1a4   :  { %v880_v16 = vpop.f32.mrf.mxu1 }
 0x1a5   :  { %v881_v3 = vadd.f32 %v3508_v59, %v880_v16  ;;  %2639 = vmatprep.mubr.f32.mxu0 %v1157_v12  ;;  %v1160_v21 = vmax.f32 %v886_v15, 0.0 }
 0x1a6   :  { %v2519_v17 = vpop.f32.mrf.mxu1  ;;  %2640 = vmatmul.mubr.f32.gmra.mxu0 %v1158_v13 }
 0x1a7   :  { %v1159_v19 = vmax.f32 %v881_v3, 0.0  ;;  %v896_v22 = vadd.f32 %v2519_v17, %v3508_v59 }
 0x1a8   :  { %v890_v23 = vpop.f32.mrf.mxu1 }
 0x1a9   :  { %v891_v20 = vadd.f32 %v3508_v59, %v890_v23  ;;  %2642 = vmatprep.mubr.f32.mxu0 %v1159_v19  ;;  %v1162_v27 = vmax.f32 %v896_v22, 0.0 }
 0x1aa   :  { %v2522_v25 = vpop.f32.mrf.mxu1  ;;  %2643 = vmatmul.mubr.f32.gmra.mxu0 %v1160_v21 }
 0x1ab   :  { %v1161_v26 = vmax.f32 %v891_v20, 0.0  ;;  %v906_v28 = vadd.f32 %v2522_v25, %v3508_v59 }
 0x1ac   :  { %v900_v29 = vpop.f32.mrf.mxu1 }
 0x1ad   :  { %v901_v30 = vadd.f32 %v3508_v59, %v900_v29  ;;  %2645 = vmatprep.mubr.f32.mxu0 %v1161_v26  ;;  %v1164_v35 = vmax.f32 %v906_v28, 0.0 }
 0x1ae   :  { %v2525_v31 = vpop.f32.mrf.mxu1  ;;  %2646 = vmatmul.mubr.f32.gmra.mxu0 %v1162_v27 }
 0x1af   :  { %v1163_v34 = vmax.f32 %v901_v30, 0.0  ;;  %v916_v36 = vadd.f32 %v2525_v31, %v3508_v59 }
 0x1b0   :  { %v910_v37 = vpop.f32.mrf.mxu1 }
 0x1b1   :  { %v911_v38 = vadd.f32 %v3508_v59, %v910_v37  ;;  %2648 = vmatprep.mubr.f32.mxu0 %v1163_v34  ;;  %v1166_v42 = vmax.f32 %v916_v36, 0.0 }
 0x1b2   :  { %v2528_v39 = vpop.f32.mrf.mxu1  ;;  %2649 = vmatmul.mubr.f32.gmra.mxu0 %v1164_v35 }
 0x1b3   :  { %v1165_v40 = vmax.f32 %v911_v38, 0.0  ;;  %v926_v44 = vadd.f32 %v2528_v39, %v3508_v59 }
 0x1b4   :  { %v920_v45 = vpop.f32.mrf.mxu1 }
 0x1b5   :  { %v921_v49 = vadd.f32 %v3508_v59, %v920_v45  ;;  %2651 = vmatprep.mubr.f32.mxu0 %v1165_v40  ;;  %v1168_v47 = vmax.f32 %v926_v44, 0.0 }
 0x1b6   :  { %v2531_v33 = vpop.f32.mrf.mxu1  ;;  %2652 = vmatmul.mubr.f32.gmra.mxu0 %v1166_v42 }
 0x1b7   :  { %v1167_v46 = vmax.f32 %v921_v49, 0.0  ;;  %v936_v48 = vadd.f32 %v2531_v33, %v3508_v59 }
 0x1b8   :  { %v930_v51 = vpop.f32.mrf.mxu1 }
 0x1b9   :  { %v931_v43 = vadd.f32 %v3508_v59, %v930_v51  ;;  %2654 = vmatprep.mubr.f32.mxu0 %v1167_v46  ;;  %v1170_v5 = vmax.f32 %v936_v48, 0.0 }
 0x1ba   :  { %v2534_v52 = vpop.f32.mrf.mxu1  ;;  %2655 = vmatmul.mubr.f32.gmra.mxu0 %v1168_v47 }
 0x1bb   :  { %v1169_v54 = vmax.f32 %v931_v43, 0.0  ;;  %v946_v53 = vadd.f32 %v2534_v52, %v3508_v59 }
 0x1bc   :  { %v940_v55 = vpop.f32.mrf.mxu1 }
 0x1bd   :  { %v941_v56 = vadd.f32 %v3508_v59, %v940_v55  ;;  %2657 = vmatprep.mubr.f32.mxu0 %v1169_v54  ;;  %v1172_v57 = vmax.f32 %v946_v53, 0.0 }
 0x1be   :  { %v2537_v18 = vpop.f32.mrf.mxu1  ;;  %2658 = vmatmul.mubr.f32.gmra.mxu0 %v1170_v5 }
 0x1bf   :  { %v1171_v24 = vmax.f32 %v941_v56, 0.0  ;;  %v956_v60 = vadd.f32 %v2537_v18, %v3508_v59 }
 0x1c0   :  { %v950_v63 = vpop.f32.mrf.mxu1 }
 0x1c1   :  { %v951_v61 = vadd.f32 %v3508_v59, %v950_v63  ;;  %2660 = vmatprep.mubr.f32.mxu0 %v1171_v24  ;;  %v1174_v1 = vmax.f32 %v956_v60, 0.0 }
 0x1c2   :  { %v2540_v62 = vpop.f32.mrf.mxu1  ;;  %2661 = vmatmul.mubr.f32.gmra.mxu0 %v1172_v57 }
 0x1c3   :  { %v1173_v0 = vmax.f32 %v951_v61, 0.0  ;;  %v966_v41 = vadd.f32 %v2540_v62, %v3508_v59 }
 0x1c4   :  { %v960_v2 = vpop.f32.mrf.mxu1 }
 0x1c5   :  { %v961_v14 = vadd.f32 %v3508_v59, %v960_v2  ;;  %2663 = vmatprep.mubr.f32.mxu0 %v1173_v0  ;;  %v1176_v58 = vmax.f32 %v966_v41, 0.0 }
 0x1c6   :  { %v2543_v4 = vpop.f32.mrf.mxu1  ;;  %2664 = vmatmul.mubr.f32.gmra.mxu0 %v1174_v1 }
 0x1c7   :  { %v1175_v6 = vmax.f32 %v961_v14, 0.0  ;;  %v976_v7 = vadd.f32 %v2543_v4, %v3508_v59 }
 0x1c8   :  { %v970_v32 = vpop.f32.mrf.mxu1 }
 0x1c9   :  { %v971_v8 = vadd.f32 %v3508_v59, %v970_v32  ;;  %2666 = vmatprep.mubr.f32.mxu0 %v1175_v6  ;;  %v1178_v11 = vmax.f32 %v976_v7, 0.0 }
 0x1ca   :  { %v2546_v9 = vpop.f32.mrf.mxu1  ;;  %2667 = vmatmul.mubr.f32.gmra.mxu0 %v1176_v58 }
 0x1cb   :  { %v1177_v10 = vmax.f32 %v971_v8, 0.0  ;;  %v986_v50 = vadd.f32 %v2546_v9, %v3508_v59 }
 0x1cc   :  { %v980_v12 = vpop.f32.mrf.mxu1 }
 0x1cd   :  { %v981_v13 = vadd.f32 %v3508_v59, %v980_v12  ;;  %2669 = vmatprep.mubr.f32.mxu0 %v1177_v10  ;;  %v1180_v3 = vmax.f32 %v986_v50, 0.0 }
 0x1ce   :  { %v2549_v15 = vpop.f32.mrf.mxu1  ;;  %2670 = vmatmul.mubr.f32.gmra.mxu0 %v1178_v11 }
 0x1cf   :  { %v1179_v16 = vmax.f32 %v981_v13, 0.0  ;;  %v996_v17 = vadd.f32 %v2549_v15, %v3508_v59 }
 0x1d0   :  { %v990_v19 = vpop.f32.mrf.mxu1 }
 0x1d1   :  { %v991_v21 = vadd.f32 %v3508_v59, %v990_v19  ;;  %2672 = vmatprep.mubr.f32.mxu0 %v1179_v16  ;;  %v1182_v20 = vmax.f32 %v996_v17, 0.0 }
 0x1d2   :  { %v2552_v22 = vpop.f32.mrf.mxu1  ;;  %2673 = vmatmul.mubr.f32.gmra.mxu0 %v1180_v3 }
 0x1d3   :  { %v1181_v23 = vmax.f32 %v991_v21, 0.0  ;;  %v1006_v25 = vadd.f32 %v2552_v22, %v3508_v59 }
 0x1d4   :  { %v1000_v26 = vpop.f32.mrf.mxu1 }
 0x1d5   :  { %v1001_v27 = vadd.f32 %v3508_v59, %v1000_v26  ;;  %2675 = vmatprep.mubr.f32.mxu0 %v1181_v23  ;;  %v1184_v30 = vmax.f32 %v1006_v25, 0.0 }
 0x1d6   :  { %v2555_v28 = vpop.f32.mrf.mxu1  ;;  %2676 = vmatmul.mubr.f32.gmra.mxu0 %v1182_v20 }
 0x1d7   :  { %v1183_v29 = vmax.f32 %v1001_v27, 0.0  ;;  %v1016_v31 = vadd.f32 %v2555_v28, %v3508_v59 }
 0x1d8   :  { %v1010_v34 = vpop.f32.mrf.mxu1 }
 0x1d9   :  { %v1011_v35 = vadd.f32 %v3508_v59, %v1010_v34  ;;  %2678 = vmatprep.mubr.f32.mxu0 %v1183_v29  ;;  %v1186_v38 = vmax.f32 %v1016_v31, 0.0 }
 0x1da   :  { %v2558_v36 = vpop.f32.mrf.mxu1  ;;  %2679 = vmatmul.mubr.f32.gmra.mxu0 %v1184_v30 }
 0x1db   :  { %v1185_v37 = vmax.f32 %v1011_v35, 0.0  ;;  %v1026_v39 = vadd.f32 %v2558_v36, %v3508_v59 }
 0x1dc   :  { %v1020_v40 = vpop.f32.mrf.mxu1 }
 0x1dd   :  { %v1021_v42 = vadd.f32 %v3508_v59, %v1020_v40  ;;  %2681 = vmatprep.mubr.f32.mxu0 %v1185_v37  ;;  %v1188_v49 = vmax.f32 %v1026_v39, 0.0 }
 0x1de   :  { %v2561_v44 = vpop.f32.mrf.mxu1  ;;  %2682 = vmatmul.mubr.f32.gmra.mxu0 %v1186_v38 }
 0x1df   :  { %v1187_v45 = vmax.f32 %v1021_v42, 0.0  ;;  %v1036_v33 = vadd.f32 %v2561_v44, %v3508_v59 }
 0x1e0   :  { %v1030_v46 = vpop.f32.mrf.mxu1 }
 0x1e1   :  { %v1031_v47 = vadd.f32 %v3508_v59, %v1030_v46  ;;  %2684 = vmatprep.mubr.f32.mxu0 %v1187_v45  ;;  %v1190_v43 = vmax.f32 %v1036_v33, 0.0 }
 0x1e2   :  { %v2564_v48 = vpop.f32.mrf.mxu1  ;;  %2685 = vmatmul.mubr.f32.gmra.mxu0 %v1188_v49 }
 0x1e3   :  { %v1189_v51 = vmax.f32 %v1031_v47, 0.0  ;;  %v1046_v52 = vadd.f32 %v2564_v48, %v3508_v59 }
 0x1e4   :  { %v1040_v54 = vpop.f32.mrf.mxu1 }
 0x1e5   :  { %v1041_v5 = vadd.f32 %v3508_v59, %v1040_v54  ;;  %2687 = vmatprep.mubr.f32.mxu0 %v1189_v51  ;;  %v1192_v56 = vmax.f32 %v1046_v52, 0.0 }
 0x1e6   :  { %v2567_v53 = vpop.f32.mrf.mxu1  ;;  %2688 = vmatmul.mubr.f32.gmra.mxu0 %v1190_v43 }
 0x1e7   :  { %v1191_v55 = vmax.f32 %v1041_v5, 0.0  ;;  %v1056_v18 = vadd.f32 %v2567_v53, %v3508_v59  ;;  %v3577_v5 = vld [vmem:[%s3902_s6] ss:$0 sm:$0xff] }
 0x1e8   :  { %v1050_v24 = vpop.f32.mrf.mxu1 }
 0x1e9   :  { %v1051_v57 = vadd.f32 %v3508_v59, %v1050_v24  ;;  %2690 = vmatprep.mubr.f32.mxu0 %v1191_v55  ;;  %v1194_v61 = vmax.f32 %v1056_v18, 0.0 }
 0x1ea   :  { %v2570_v60 = vpop.f32.mrf.mxu1  ;;  %2691 = vmatmul.mubr.f32.gmra.mxu0 %v1192_v56 }
 0x1eb   :  { %v1193_v63 = vmax.f32 %v1051_v57, 0.0  ;;  %v1066_v62 = vadd.f32 %v2570_v60, %v3508_v59 }
 0x1ec   :  { %v1060_v0 = vpop.f32.mrf.mxu1 }
 0x1ed   :  { %v1061_v1 = vadd.f32 %v3508_v59, %v1060_v0  ;;  %2693 = vmatprep.mubr.f32.mxu0 %v1193_v63  ;;  %v1196_v14 = vmax.f32 %v1066_v62, 0.0 }
 0x1ee   :  { %v2573_v41 = vpop.f32.mrf.mxu1  ;;  %2694 = vmatmul.mubr.f32.gmra.mxu0 %v1194_v61 }
 0x1ef   :  { %v1195_v2 = vmax.f32 %v1061_v1, 0.0  ;;  %v1076_v4 = vadd.f32 %v2573_v41, %v3508_v59 }
 0x1f0   :  { %v1070_v6 = vpop.f32.mrf.mxu1 }
 0x1f1   :  { %v1071_v58 = vadd.f32 %v3508_v59, %v1070_v6  ;;  %2696 = vmatprep.mubr.f32.mxu0 %v1195_v2  ;;  %v1198_v8 = vmax.f32 %v1076_v4, 0.0 }
 0x1f2   :  { %v2576_v7 = vpop.f32.mrf.mxu1  ;;  %2697 = vmatmul.mubr.f32.gmra.mxu0 %v1196_v14 }
 0x1f3   :  { %v1197_v32 = vmax.f32 %v1071_v58, 0.0  ;;  %v1086_v9 = vadd.f32 %v2576_v7, %v3508_v59 }
 0x1f4   :  { %v1080_v10 = vpop.f32.mrf.mxu1 }
 0x1f5   :  { %v1081_v11 = vadd.f32 %v3508_v59, %v1080_v10  ;;  %2699 = vmatprep.mubr.f32.mxu0 %v1197_v32  ;;  %v1200_v13 = vmax.f32 %v1086_v9, 0.0 }
 0x1f6   :  { %v2579_v50 = vpop.f32.mrf.mxu1  ;;  %2700 = vmatmul.mubr.f32.gmra.mxu0 %v1198_v8 }
 0x1f7   :  { %v1199_v12 = vmax.f32 %v1081_v11, 0.0  ;;  %v1096_v15 = vadd.f32 %v2579_v50, %v3508_v59 }
 0x1f8   :  { %v1090_v16 = vpop.f32.mrf.mxu1 }
 0x1f9   :  { %v1091_v3 = vadd.f32 %v3508_v59, %v1090_v16  ;;  %2702 = vmatprep.mubr.f32.mxu0 %v1199_v12  ;;  %v1202_v21 = vmax.f32 %v1096_v15, 0.0 }
 0x1fa   :  { %v2582_v17 = vpop.f32.mrf.mxu1  ;;  %2703 = vmatmul.mubr.f32.gmra.mxu0 %v1200_v13 }
 0x1fb   :  { %v1201_v19 = vmax.f32 %v1091_v3, 0.0  ;;  %v1106_v22 = vadd.f32 %v2582_v17, %v3508_v59 }
 0x1fc   :  { %v1100_v23 = vpop.f32.mrf.mxu1 }
 0x1fd   :  { %v1101_v20 = vadd.f32 %v3508_v59, %v1100_v23  ;;  %2705 = vmatprep.mubr.f32.mxu0 %v1201_v19  ;;  %v1204_v27 = vmax.f32 %v1106_v22, 0.0 }
 0x1fe   :  { %v2585_v25 = vpop.f32.mrf.mxu1  ;;  %2706 = vmatmul.mubr.f32.gmra.mxu0 %v1202_v21 }
 0x1ff   :  { %v1203_v26 = vmax.f32 %v1101_v20, 0.0  ;;  %v1116_v28 = vadd.f32 %v2585_v25, %v3508_v59 }
 0x200   :  { %v1110_v29 = vpop.f32.mrf.mxu1 }
 0x201   :  { %v1111_v30 = vadd.f32 %v3508_v59, %v1110_v29  ;;  %2708 = vmatprep.mubr.f32.mxu0 %v1203_v26  ;;  %v1206_v35 = vmax.f32 %v1116_v28, 0.0 }
 0x202   :  { %v2588_v31 = vpop.f32.mrf.mxu1  ;;  %2709 = vmatmul.mubr.f32.gmra.mxu0 %v1204_v27 }
 0x203   :  { %v1205_v34 = vmax.f32 %v1111_v30, 0.0  ;;  %v1126_v36 = vadd.f32 %v2588_v31, %v3508_v59 }
 0x204   :  { %v1120_v37 = vpop.f32.mrf.mxu1 }
 0x205   :  { %v1121_v38 = vadd.f32 %v3508_v59, %v1120_v37  ;;  %2711 = vmatprep.mubr.f32.mxu0 %v1205_v34  ;;  %v1208_v42 = vmax.f32 %v1126_v36, 0.0 }
 0x206   :  { %v2591_v39 = vpop.f32.mrf.mxu1  ;;  %2712 = vmatmul.mubr.f32.gmra.mxu0 %v1206_v35 }
 0x207   :  { %v1207_v40 = vmax.f32 %v1121_v38, 0.0  ;;  %v1136_v44 = vadd.f32 %v2591_v39, %v3508_v59 }
 0x208   :  { %v1130_v45 = vpop.f32.mrf.mxu1 }
 0x209   :  { %v1131_v49 = vadd.f32 %v3508_v59, %v1130_v45  ;;  %2714 = vmatprep.mubr.f32.mxu0 %v1207_v40  ;;  %v1210_v47 = vmax.f32 %v1136_v44, 0.0 }
 0x20a   :  { %v2594_v33 = vpop.f32.mrf.mxu1  ;;  %2715 = vmatmul.mubr.f32.gmra.mxu0 %v1208_v42 }
 0x20b   :  { %v1209_v46 = vmax.f32 %v1131_v49, 0.0  ;;  %v1146_v48 = vadd.f32 %v2594_v33, %v3508_v59 }
 0x20c   :  { %v1140_v51 = vpop.f32.mrf.mxu1 }
 0x20d   :  { %v1141_v43 = vadd.f32 %v3508_v59, %v1140_v51  ;;  %2717 = vmatprep.mubr.f32.mxu0 %v1209_v46  ;;  %v1212_v54 = vmax.f32 %v1146_v48, 0.0 }
 0x20e   :  { %2718 = vmatmul.mubr.f32.gmra.mxu0 %v1210_v47 }
 0x20f   :  { %v1211_v52 = vmax.f32 %v1141_v43, 0.0 }
 0x211   :  { %2720 = vmatprep.mubr.f32.mxu0 %v1211_v52 }
 0x212   :  { %2721 = vmatmul.mubr.f32.gmra.mxu0 %v1212_v54 }
 0x256   :  { %v2629_v53 = vpop.f32.mrf.mxu0 }
 0x257   :  { %v1308_v55 = vadd.f32 %v2629_v53, %v3577_v5 }
 0x258   :  { %v1302_v56 = vpop.f32.mrf.mxu0 }
 0x259   :  { %v1622_v18 = vsub.f32 0.0, %v1308_v55  ;;  %v1303_v24 = vadd.f32 %v3577_v5, %v1302_v56 }
 0x25a   :  { %v2632_v57 = vpop.f32.mrf.mxu0 }
 0x25b   :  { %v1687_v59 = vmul.f32 1.442695, %v1622_v18  ;;  %v1621_v60 = vsub.f32 0.0, %v1303_v24  ;;  %v1318_v63 = vadd.f32 %v2632_v57, %v3577_v5 }
 0x25c   :  { %v1312_v61 = vpop.f32.mrf.mxu0 }
 0x25d   :  { %2727 = vpow2.f32 %v1687_v59  ;;  %v1685_v62 = vmul.f32 1.442695, %v1621_v60  ;;  %v1624_v0 = vsub.f32 0.0, %v1318_v63  ;;  %v1313_v1 = vadd.f32 %v3577_v5, %v1312_v61 }
 0x25e   :  { %v2635_v41 = vpop.f32.mrf.mxu0 }
 0x25f   :  { %2729 = vpow2.f32 %v1685_v62  ;;  %v1691_v2 = vmul.f32 1.442695, %v1624_v0  ;;  %v1623_v14 = vsub.f32 0.0, %v1313_v1  ;;  %v1328_v4 = vadd.f32 %v2635_v41, %v3577_v5 }
 0x260   :  { %v1322_v6 = vpop.f32.mrf.mxu0 }
 0x261   :  { %2731 = vpow2.f32 %v1691_v2  ;;  %v1689_v58 = vmul.f32 1.442695, %v1623_v14  ;;  %v1626_v7 = vsub.f32 0.0, %v1328_v4  ;;  %v1323_v32 = vadd.f32 %v3577_v5, %v1322_v6 }
 0x262   :  { %v2638_v8 = vpop.f32.mrf.mxu0 }
 0x263   :  { %2733 = vpow2.f32 %v1689_v58  ;;  %v1695_v9 = vmul.f32 1.442695, %v1626_v7  ;;  %v1625_v10 = vsub.f32 0.0, %v1323_v32  ;;  %v1338_v11 = vadd.f32 %v2638_v8, %v3577_v5 }
 0x264   :  { %v1332_v50 = vpop.f32.mrf.mxu0 }
 0x265   :  { %2735 = vpow2.f32 %v1695_v9  ;;  %v1693_v12 = vmul.f32 1.442695, %v1625_v10  ;;  %v1628_v13 = vsub.f32 0.0, %v1338_v11  ;;  %v1333_v15 = vadd.f32 %v3577_v5, %v1332_v50 }
 0x266   :  { %v2641_v16 = vpop.f32.mrf.mxu0 }
 0x267   :  { %2737 = vpow2.f32 %v1693_v12  ;;  %v1699_v3 = vmul.f32 1.442695, %v1628_v13  ;;  %v1627_v17 = vsub.f32 0.0, %v1333_v15  ;;  %v1348_v19 = vadd.f32 %v2641_v16, %v3577_v5 }
 0x268   :  { %v1342_v21 = vpop.f32.mrf.mxu0 }
 0x269   :  { %2739 = vpow2.f32 %v1699_v3  ;;  %v1697_v22 = vmul.f32 1.442695, %v1627_v17  ;;  %v1630_v23 = vsub.f32 0.0, %v1348_v19  ;;  %v1343_v20 = vadd.f32 %v3577_v5, %v1342_v21 }
 0x26a   :  { %v2728_v25 = vpop.eup %2727  ;;  %v2644_v26 = vpop.f32.mrf.mxu0 }
 0x26b   :  { %v1814_v27 = vadd.f32 1.0, %v2728_v25  ;;  %2741 = vpow2.f32 %v1697_v22  ;;  %v1703_v28 = vmul.f32 1.442695, %v1630_v23  ;;  %v1629_v29 = vsub.f32 0.0, %v1343_v20 }
 0x26c   :  { %v2730_v30 = vpop.eup %2729  ;;  %v1358_v31 = vadd.f32 %v2644_v26, %v3577_v5  ;;  %v1352_v34 = vpop.f32.mrf.mxu0 }
 0x26d   :  { %2743 = vrcp.f32 %v1814_v27  ;;  %v1813_v35 = vadd.f32 1.0, %v2730_v30  ;;  %v1701_v36 = vmul.f32 1.442695, %v1629_v29  ;;  %v1353_v37 = vadd.f32 %v3577_v5, %v1352_v34 }
 0x26e   :  { %v2732_v38 = vpop.eup %2731  ;;  %2745 = vpow2.f32 %v1703_v28  ;;  %v1632_v39 = vsub.f32 0.0, %v1358_v31  ;;  %v2647_v40 = vpop.f32.mrf.mxu0 }
 0x26f   :  { %2747 = vrcp.f32 %v1813_v35  ;;  %v1816_v42 = vadd.f32 1.0, %v2732_v38  ;;  %v1631_v44 = vsub.f32 0.0, %v1353_v37  ;;  %v1368_v45 = vadd.f32 %v2647_v40, %v3577_v5 }
 0x270   :  { %v2734_v49 = vpop.eup %2733  ;;  %2749 = vpow2.f32 %v1701_v36  ;;  %v1707_v33 = vmul.f32 1.442695, %v1632_v39  ;;  %v1362_v46 = vpop.f32.mrf.mxu0 }
 0x271   :  { %2751 = vrcp.f32 %v1816_v42  ;;  %v1815_v47 = vadd.f32 1.0, %v2734_v49  ;;  %v1705_v48 = vmul.f32 1.442695, %v1631_v44  ;;  %v1634_v51 = vsub.f32 0.0, %v1368_v45 }
 0x272   :  { %v2736_v43 = vpop.eup %2735  ;;  %2753 = vpow2.f32 %v1707_v33  ;;  %v1363_v52 = vadd.f32 %v3577_v5, %v1362_v46  ;;  %v2650_v54 = vpop.f32.mrf.mxu0 }
 0x273   :  { %2755 = vrcp.f32 %v1815_v47  ;;  %v1818_v53 = vadd.f32 1.0, %v2736_v43  ;;  %v1711_v55 = vmul.f32 1.442695, %v1634_v51  ;;  %v1378_v56 = vadd.f32 %v2650_v54, %v3577_v5 }
 0x274   :  { %v2738_v18 = vpop.eup %2737  ;;  %2757 = vpow2.f32 %v1705_v48  ;;  %v1633_v24 = vsub.f32 0.0, %v1363_v52  ;;  %v1372_v57 = vpop.f32.mrf.mxu0 }
 0x275   :  { %2759 = vrcp.f32 %v1818_v53  ;;  %v1817_v59 = vadd.f32 1.0, %v2738_v18  ;;  %v1636_v60 = vsub.f32 0.0, %v1378_v56  ;;  %v1373_v63 = vadd.f32 %v3577_v5, %v1372_v57 }
 0x276   :  { %v2740_v61 = vpop.eup %2739  ;;  %2761 = vpow2.f32 %v1711_v55  ;;  %v1709_v62 = vmul.f32 1.442695, %v1633_v24  ;;  %v2653_v0 = vpop.f32.mrf.mxu0 }
 0x277   :  { %2763 = vrcp.f32 %v1817_v59  ;;  %v1820_v1 = vadd.f32 1.0, %v2740_v61  ;;  %v1715_v41 = vmul.f32 1.442695, %v1636_v60  ;;  %v1635_v2 = vsub.f32 0.0, %v1373_v63 }
 0x278   :  { %v2742_v14 = vpop.eup %2741  ;;  %2765 = vpow2.f32 %v1709_v62  ;;  %v1388_v4 = vadd.f32 %v2653_v0, %v3577_v5  ;;  %v1382_v6 = vpop.f32.mrf.mxu0 }
 0x279   :  { %2767 = vrcp.f32 %v1820_v1  ;;  %v1819_v58 = vadd.f32 1.0, %v2742_v14  ;;  %v1713_v7 = vmul.f32 1.442695, %v1635_v2  ;;  %v1383_v32 = vadd.f32 %v3577_v5, %v1382_v6 }
 0x27a   :  { %v2744_v8 = vpop.eup %2743  ;;  %2769 = vpow2.f32 %v1715_v41  ;;  %v1638_v9 = vsub.f32 0.0, %v1388_v4  ;;  %v2656_v10 = vpop.f32.mrf.mxu0 }
 0x27b   :  { %v2746_v11 = vpop.eup %2745  ;;  %2007 = vst.msk [vmem:[%s3903_s7 + $0x8] sm:$0xff] %vm2005_vm1, %v2744_v8  ;;  %2771 = vrcp.f32 %v1819_v58  ;;  %v1637_v50 = vsub.f32 0.0, %v1383_v32  ;;  %v1398_v12 = vadd.f32 %v2656_v10, %v3577_v5 }
 0x27c   :  { %v2748_v13 = vpop.eup %2747  ;;  %v1822_v15 = vadd.f32 1.0, %v2746_v11  ;;  %2773 = vpow2.f32 %v1713_v7  ;;  %v1719_v16 = vmul.f32 1.442695, %v1638_v9  ;;  %v1392_v3 = vpop.f32.mrf.mxu0 }
 0x27d   :  { %v2750_v17 = vpop.eup %2749  ;;  %2006 = vst.msk [vmem:[%s3903_s7] sm:$0xff] %vm2005_vm1, %v2748_v13  ;;  %v1717_v19 = vmul.f32 1.442695, %v1637_v50  ;;  %v1640_v21 = vsub.f32 0.0, %v1398_v12  ;;  %v1393_v22 = vadd.f32 %v3577_v5, %v1392_v3 }
 0x27e   :  { %v2752_v23 = vpop.eup %2751  ;;  %2775 = vrcp.f32 %v1822_v15  ;;  %v1821_v20 = vadd.f32 1.0, %v2750_v17  ;;  %v2659_v25 = vpop.f32.mrf.mxu0 }
 0x27f   :  { %v2754_v26 = vpop.eup %2753  ;;  %2009 = vst.msk [vmem:[%s3903_s7 + $0x18] sm:$0xff] %vm2005_vm1, %v2752_v23  ;;  %2777 = vpow2.f32 %v1719_v16  ;;  %v1723_v27 = vmul.f32 1.442695, %v1640_v21  ;;  %v1639_v28 = vsub.f32 0.0, %v1393_v22  ;;  %v1408_v29 = vadd.f32 %v2659_v25, %v3577_v5 }
 0x280   :  { %v2756_v30 = vpop.eup %2755  ;;  %2779 = vrcp.f32 %v1821_v20  ;;  %v1824_v31 = vadd.f32 1.0, %v2754_v26  ;;  %v1402_v34 = vpop.f32.mrf.mxu0 }
 0x281   :  { %v2758_v35 = vpop.eup %2757  ;;  %2008 = vst.msk [vmem:[%s3903_s7 + $0x10] sm:$0xff] %vm2005_vm1, %v2756_v30  ;;  %2781 = vpow2.f32 %v1717_v19  ;;  %v1721_v36 = vmul.f32 1.442695, %v1639_v28  ;;  %v1642_v37 = vsub.f32 0.0, %v1408_v29  ;;  %v1403_v38 = vadd.f32 %v3577_v5, %v1402_v34 }
 0x282   :  { %v2760_v39 = vpop.eup %2759  ;;  %2783 = vrcp.f32 %v1824_v31  ;;  %v1823_v40 = vadd.f32 1.0, %v2758_v35  ;;  %v2662_v42 = vpop.f32.mrf.mxu0 }
 0x283   :  { %v2762_v44 = vpop.eup %2761  ;;  %2011 = vst.msk [vmem:[%s3903_s7 + $0x28] sm:$0xff] %vm2005_vm1, %v2760_v39  ;;  %2785 = vpow2.f32 %v1723_v27  ;;  %v1727_v45 = vmul.f32 1.442695, %v1642_v37  ;;  %v1641_v49 = vsub.f32 0.0, %v1403_v38  ;;  %v1418_v33 = vadd.f32 %v2662_v42, %v3577_v5 }
 0x284   :  { %v2764_v46 = vpop.eup %2763  ;;  %2787 = vrcp.f32 %v1823_v40  ;;  %v1826_v47 = vadd.f32 1.0, %v2762_v44  ;;  %v1412_v48 = vpop.f32.mrf.mxu0 }
 0x285   :  { %v2766_v51 = vpop.eup %2765  ;;  %2010 = vst.msk [vmem:[%s3903_s7 + $0x20] sm:$0xff] %vm2005_vm1, %v2764_v46  ;;  %2789 = vpow2.f32 %v1721_v36  ;;  %v1725_v43 = vmul.f32 1.442695, %v1641_v49  ;;  %v1644_v52 = vsub.f32 0.0, %v1418_v33  ;;  %v1413_v54 = vadd.f32 %v3577_v5, %v1412_v48 }
 0x286   :  { %v2768_v53 = vpop.eup %2767  ;;  %2791 = vrcp.f32 %v1826_v47  ;;  %v1825_v55 = vadd.f32 1.0, %v2766_v51  ;;  %v2665_v56 = vpop.f32.mrf.mxu0 }
 0x287   :  { %v2770_v18 = vpop.eup %2769  ;;  %2013 = vst.msk [vmem:[%s3903_s7 + $0x38] sm:$0xff] %vm2005_vm1, %v2768_v53  ;;  %2793 = vpow2.f32 %v1727_v45  ;;  %v1731_v24 = vmul.f32 1.442695, %v1644_v52  ;;  %v1643_v57 = vsub.f32 0.0, %v1413_v54  ;;  %v1428_v59 = vadd.f32 %v2665_v56, %v3577_v5 }
 0x288   :  { %v2772_v60 = vpop.eup %2771  ;;  %2795 = vrcp.f32 %v1825_v55  ;;  %v1828_v63 = vadd.f32 1.0, %v2770_v18  ;;  %v1422_v61 = vpop.f32.mrf.mxu0 }
 0x289   :  { %v2774_v62 = vpop.eup %2773  ;;  %2012 = vst.msk [vmem:[%s3903_s7 + $0x30] sm:$0xff] %vm2005_vm1, %v2772_v60  ;;  %2797 = vpow2.f32 %v1725_v43  ;;  %v1729_v0 = vmul.f32 1.442695, %v1643_v57  ;;  %v1646_v1 = vsub.f32 0.0, %v1428_v59  ;;  %v1423_v41 = vadd.f32 %v3577_v5, %v1422_v61 }
 0x28a   :  { %2799 = vrcp.f32 %v1828_v63  ;;  %v1827_v2 = vadd.f32 1.0, %v2774_v62  ;;  %v2668_v14 = vpop.f32.mrf.mxu0 }
 0x28b   :  { %v2776_v4 = vpop.eup %2775  ;;  %2801 = vpow2.f32 %v1731_v24  ;;  %v1735_v6 = vmul.f32 1.442695, %v1646_v1  ;;  %v1645_v58 = vsub.f32 0.0, %v1423_v41  ;;  %v1438_v7 = vadd.f32 %v2668_v14, %v3577_v5 }
 0x28c   :  { %v2778_v32 = vpop.eup %2777  ;;  %2015 = vst.msk [vmem:[%s3903_s7 + $0x48] sm:$0xff] %vm2005_vm1, %v2776_v4  ;;  %2803 = vrcp.f32 %v1827_v2  ;;  %v1432_v8 = vpop.f32.mrf.mxu0 }
 0x28d   :  { %v2780_v9 = vpop.eup %2779  ;;  %v1830_v10 = vadd.f32 1.0, %v2778_v32  ;;  %2805 = vpow2.f32 %v1729_v0  ;;  %v1733_v11 = vmul.f32 1.442695, %v1645_v58  ;;  %v1648_v50 = vsub.f32 0.0, %v1438_v7 }
 0x28e   :  { %v2782_v12 = vpop.eup %2781  ;;  %2014 = vst.msk [vmem:[%s3903_s7 + $0x40] sm:$0xff] %vm2005_vm1, %v2780_v9  ;;  %2807 = vpow2.f32 %v1735_v6  ;;  %v1433_v13 = vadd.f32 %v3577_v5, %v1432_v8  ;;  %v2671_v15 = vpop.f32.mrf.mxu0 }
 0x28f   :  { %v2784_v16 = vpop.eup %2783  ;;  %2809 = vrcp.f32 %v1830_v10  ;;  %v1829_v3 = vadd.f32 1.0, %v2782_v12  ;;  %v1739_v17 = vmul.f32 1.442695, %v1648_v50  ;;  %v1448_v19 = vadd.f32 %v2671_v15, %v3577_v5 }
 0x290   :  { %v2786_v21 = vpop.eup %2785  ;;  %2017 = vst.msk [vmem:[%s3903_s7 + $0x58] sm:$0xff] %vm2005_vm1, %v2784_v16  ;;  %2811 = vpow2.f32 %v1733_v11  ;;  %v1647_v22 = vsub.f32 0.0, %v1433_v13  ;;  %v1442_v23 = vpop.f32.mrf.mxu0 }
 0x291   :  { %v2788_v20 = vpop.eup %2787  ;;  %2813 = vrcp.f32 %v1829_v3  ;;  %v1832_v25 = vadd.f32 1.0, %v2786_v21  ;;  %v1650_v26 = vsub.f32 0.0, %v1448_v19  ;;  %v1443_v27 = vadd.f32 %v3577_v5, %v1442_v23 }
 0x292   :  { %v2790_v28 = vpop.eup %2789  ;;  %2016 = vst.msk [vmem:[%s3903_s7 + $0x50] sm:$0xff] %vm2005_vm1, %v2788_v20  ;;  %2815 = vpow2.f32 %v1739_v17  ;;  %v1737_v29 = vmul.f32 1.442695, %v1647_v22  ;;  %v2674_v30 = vpop.f32.mrf.mxu0 }
 0x293   :  { %v2792_v31 = vpop.eup %2791  ;;  %2817 = vrcp.f32 %v1832_v25  ;;  %v1831_v34 = vadd.f32 1.0, %v2790_v28  ;;  %v1743_v35 = vmul.f32 1.442695, %v1650_v26  ;;  %v1649_v36 = vsub.f32 0.0, %v1443_v27 }
 0x294   :  { %v2794_v37 = vpop.eup %2793  ;;  %2019 = vst.msk [vmem:[%s3903_s7 + $0x68] sm:$0xff] %vm2005_vm1, %v2792_v31  ;;  %2819 = vpow2.f32 %v1737_v29  ;;  %v1458_v38 = vadd.f32 %v2674_v30, %v3577_v5  ;;  %v1452_v39 = vpop.f32.mrf.mxu0 }
 0x295   :  { %v2796_v40 = vpop.eup %2795  ;;  %2821 = vrcp.f32 %v1831_v34  ;;  %v1834_v42 = vadd.f32 1.0, %v2794_v37  ;;  %v1741_v44 = vmul.f32 1.442695, %v1649_v36  ;;  %v1453_v45 = vadd.f32 %v3577_v5, %v1452_v39 }
 0x296   :  { %v2798_v49 = vpop.eup %2797  ;;  %2018 = vst.msk [vmem:[%s3903_s7 + $0x60] sm:$0xff] %vm2005_vm1, %v2796_v40  ;;  %2823 = vpow2.f32 %v1743_v35  ;;  %v1652_v33 = vsub.f32 0.0, %v1458_v38  ;;  %v2677_v46 = vpop.f32.mrf.mxu0 }
 0x297   :  { %v2800_v47 = vpop.eup %2799  ;;  %2825 = vrcp.f32 %v1834_v42  ;;  %v1833_v48 = vadd.f32 1.0, %v2798_v49  ;;  %v1651_v51 = vsub.f32 0.0, %v1453_v45  ;;  %v1468_v43 = vadd.f32 %v2677_v46, %v3577_v5 }
 0x298   :  { %v2802_v52 = vpop.eup %2801  ;;  %2021 = vst.msk [vmem:[%s3903_s7 + $0x78] sm:$0xff] %vm2005_vm1, %v2800_v47  ;;  %2827 = vpow2.f32 %v1741_v44  ;;  %v1747_v54 = vmul.f32 1.442695, %v1652_v33  ;;  %v1462_v53 = vpop.f32.mrf.mxu0 }
 0x299   :  { %v2804_v55 = vpop.eup %2803  ;;  %2829 = vrcp.f32 %v1833_v48  ;;  %v1836_v56 = vadd.f32 1.0, %v2802_v52  ;;  %v1745_v18 = vmul.f32 1.442695, %v1651_v51  ;;  %v1654_v24 = vsub.f32 0.0, %v1468_v43 }
 0x29a   :  { %v2806_v57 = vpop.eup %2805  ;;  %2020 = vst.msk [vmem:[%s3903_s7 + $0x70] sm:$0xff] %vm2005_vm1, %v2804_v55  ;;  %2831 = vpow2.f32 %v1747_v54  ;;  %v1463_v59 = vadd.f32 %v3577_v5, %v1462_v53  ;;  %v2680_v60 = vpop.f32.mrf.mxu0 }
 0x29b   :  { %v2808_v63 = vpop.eup %2807  ;;  %2833 = vrcp.f32 %v1836_v56  ;;  %v1835_v61 = vadd.f32 1.0, %v2806_v57  ;;  %v1751_v62 = vmul.f32 1.442695, %v1654_v24  ;;  %v1478_v0 = vadd.f32 %v2680_v60, %v3577_v5 }
 0x29c   :  { %v2810_v1 = vpop.eup %2809  ;;  %v1838_v41 = vadd.f32 1.0, %v2808_v63  ;;  %2835 = vpow2.f32 %v1745_v18  ;;  %v1653_v2 = vsub.f32 0.0, %v1463_v59  ;;  %v1472_v14 = vpop.f32.mrf.mxu0 }
 0x29d   :  { %v2812_v4 = vpop.eup %2811  ;;  %2023 = vst.msk [vmem:[%s3903_s7 + $0x88] sm:$0xff] %vm2005_vm1, %v2810_v1  ;;  %2837 = vrcp.f32 %v1835_v61  ;;  %v1656_v6 = vsub.f32 0.0, %v1478_v0  ;;  %v1473_v58 = vadd.f32 %v3577_v5, %v1472_v14 }
 0x29e   :  { %v2814_v7 = vpop.eup %2813  ;;  %2839 = vrcp.f32 %v1838_v41  ;;  %v1837_v32 = vadd.f32 1.0, %v2812_v4  ;;  %v1749_v8 = vmul.f32 1.442695, %v1653_v2  ;;  %v2683_v9 = vpop.f32.mrf.mxu0 }
 0x29f   :  { %v2816_v10 = vpop.eup %2815  ;;  %2022 = vst.msk [vmem:[%s3903_s7 + $0x80] sm:$0xff] %vm2005_vm1, %v2814_v7  ;;  %2841 = vpow2.f32 %v1751_v62  ;;  %v1755_v11 = vmul.f32 1.442695, %v1656_v6  ;;  %v1655_v50 = vsub.f32 0.0, %v1473_v58  ;;  %v1488_v12 = vadd.f32 %v2683_v9, %v3577_v5 }
 0x2a0   :  { %v2818_v13 = vpop.eup %2817  ;;  %2843 = vrcp.f32 %v1837_v32  ;;  %v1840_v15 = vadd.f32 1.0, %v2816_v10  ;;  %v1482_v16 = vpop.f32.mrf.mxu0 }
 0x2a1   :  { %v2820_v3 = vpop.eup %2819  ;;  %2025 = vst.msk [vmem:[%s3903_s7 + $0x98] sm:$0xff] %vm2005_vm1, %v2818_v13  ;;  %2845 = vpow2.f32 %v1749_v8  ;;  %v1753_v17 = vmul.f32 1.442695, %v1655_v50  ;;  %v1658_v19 = vsub.f32 0.0, %v1488_v12  ;;  %v1483_v21 = vadd.f32 %v3577_v5, %v1482_v16 }
 0x2a2   :  { %v2822_v22 = vpop.eup %2821  ;;  %2847 = vrcp.f32 %v1840_v15  ;;  %v1839_v23 = vadd.f32 1.0, %v2820_v3  ;;  %v2686_v20 = vpop.f32.mrf.mxu0 }
 0x2a3   :  { %v2824_v25 = vpop.eup %2823  ;;  %2024 = vst.msk [vmem:[%s3903_s7 + $0x90] sm:$0xff] %vm2005_vm1, %v2822_v22  ;;  %2849 = vpow2.f32 %v1755_v11  ;;  %v1759_v26 = vmul.f32 1.442695, %v1658_v19  ;;  %v1657_v27 = vsub.f32 0.0, %v1483_v21  ;;  %v1498_v28 = vadd.f32 %v2686_v20, %v3577_v5 }
 0x2a4   :  { %v2826_v29 = vpop.eup %2825  ;;  %2851 = vrcp.f32 %v1839_v23  ;;  %v1842_v30 = vadd.f32 1.0, %v2824_v25  ;;  %v1492_v31 = vpop.f32.mrf.mxu0 }
 0x2a5   :  { %v2828_v34 = vpop.eup %2827  ;;  %2027 = vst.msk [vmem:[%s3903_s7 + $0xa8] sm:$0xff] %vm2005_vm1, %v2826_v29  ;;  %2853 = vpow2.f32 %v1753_v17  ;;  %v1757_v35 = vmul.f32 1.442695, %v1657_v27  ;;  %v1660_v36 = vsub.f32 0.0, %v1498_v28  ;;  %v1493_v37 = vadd.f32 %v3577_v5, %v1492_v31 }
 0x2a6   :  { %v2830_v38 = vpop.eup %2829  ;;  %2855 = vrcp.f32 %v1842_v30  ;;  %v1841_v39 = vadd.f32 1.0, %v2828_v34  ;;  %v2689_v40 = vpop.f32.mrf.mxu0 }
 0x2a7   :  { %v2832_v42 = vpop.eup %2831  ;;  %2026 = vst.msk [vmem:[%s3903_s7 + $0xa0] sm:$0xff] %vm2005_vm1, %v2830_v38  ;;  %2857 = vpow2.f32 %v1759_v26  ;;  %v1763_v44 = vmul.f32 1.442695, %v1660_v36  ;;  %v1659_v45 = vsub.f32 0.0, %v1493_v37  ;;  %v1508_v49 = vadd.f32 %v2689_v40, %v3577_v5 }
 0x2a8   :  { %v2834_v33 = vpop.eup %2833  ;;  %2859 = vrcp.f32 %v1841_v39  ;;  %v1844_v46 = vadd.f32 1.0, %v2832_v42  ;;  %v1502_v47 = vpop.f32.mrf.mxu0 }
 0x2a9   :  { %v2836_v48 = vpop.eup %2835  ;;  %2029 = vst.msk [vmem:[%s3903_s7 + $0xb8] sm:$0xff] %vm2005_vm1, %v2834_v33  ;;  %2861 = vpow2.f32 %v1757_v35  ;;  %v1761_v51 = vmul.f32 1.442695, %v1659_v45  ;;  %v1662_v43 = vsub.f32 0.0, %v1508_v49  ;;  %v1503_v52 = vadd.f32 %v3577_v5, %v1502_v47 }
 0x2aa   :  { %v2838_v54 = vpop.eup %2837  ;;  %2863 = vrcp.f32 %v1844_v46  ;;  %v1843_v53 = vadd.f32 1.0, %v2836_v48  ;;  %v2692_v55 = vpop.f32.mrf.mxu0 }
 0x2ab   :  { %v2840_v56 = vpop.eup %2839  ;;  %2028 = vst.msk [vmem:[%s3903_s7 + $0xb0] sm:$0xff] %vm2005_vm1, %v2838_v54  ;;  %2865 = vpow2.f32 %v1763_v44  ;;  %v1767_v18 = vmul.f32 1.442695, %v1662_v43  ;;  %v1661_v24 = vsub.f32 0.0, %v1503_v52  ;;  %v1518_v57 = vadd.f32 %v2692_v55, %v3577_v5 }
 0x2ac   :  { %v2842_v59 = vpop.eup %2841  ;;  %2031 = vst.msk [vmem:[%s3903_s7 + $0xc8] sm:$0xff] %vm2005_vm1, %v2840_v56  ;;  %2867 = vrcp.f32 %v1843_v53  ;;  %v1512_v60 = vpop.f32.mrf.mxu0 }
 0x2ad   :  { %v2844_v63 = vpop.eup %2843  ;;  %v1846_v61 = vadd.f32 1.0, %v2842_v59  ;;  %2869 = vpow2.f32 %v1761_v51  ;;  %v1765_v62 = vmul.f32 1.442695, %v1661_v24  ;;  %v1664_v0 = vsub.f32 0.0, %v1518_v57 }
 0x2ae   :  { %v2846_v1 = vpop.eup %2845  ;;  %2030 = vst.msk [vmem:[%s3903_s7 + $0xc0] sm:$0xff] %vm2005_vm1, %v2844_v63  ;;  %2871 = vpow2.f32 %v1767_v18  ;;  %v1513_v41 = vadd.f32 %v3577_v5, %v1512_v60  ;;  %v2695_v2 = vpop.f32.mrf.mxu0 }
 0x2af   :  { %v2848_v14 = vpop.eup %2847  ;;  %2873 = vrcp.f32 %v1846_v61  ;;  %v1845_v4 = vadd.f32 1.0, %v2846_v1  ;;  %v1771_v6 = vmul.f32 1.442695, %v1664_v0  ;;  %v1528_v58 = vadd.f32 %v2695_v2, %v3577_v5 }
 0x2b0   :  { %v2850_v7 = vpop.eup %2849  ;;  %2033 = vst.msk [vmem:[%s3903_s7 + $0xd8] sm:$0xff] %vm2005_vm1, %v2848_v14  ;;  %2875 = vpow2.f32 %v1765_v62  ;;  %v1663_v32 = vsub.f32 0.0, %v1513_v41  ;;  %v1522_v8 = vpop.f32.mrf.mxu0 }
 0x2b1   :  { %v2852_v9 = vpop.eup %2851  ;;  %2877 = vrcp.f32 %v1845_v4  ;;  %v1848_v10 = vadd.f32 1.0, %v2850_v7  ;;  %v1666_v11 = vsub.f32 0.0, %v1528_v58  ;;  %v1523_v50 = vadd.f32 %v3577_v5, %v1522_v8 }
 0x2b2   :  { %v2854_v12 = vpop.eup %2853  ;;  %2032 = vst.msk [vmem:[%s3903_s7 + $0xd0] sm:$0xff] %vm2005_vm1, %v2852_v9  ;;  %2879 = vpow2.f32 %v1771_v6  ;;  %v1769_v13 = vmul.f32 1.442695, %v1663_v32  ;;  %v2698_v15 = vpop.f32.mrf.mxu0 }
 0x2b3   :  { %v2856_v16 = vpop.eup %2855  ;;  %2881 = vrcp.f32 %v1848_v10  ;;  %v1847_v3 = vadd.f32 1.0, %v2854_v12  ;;  %v1775_v17 = vmul.f32 1.442695, %v1666_v11  ;;  %v1665_v19 = vsub.f32 0.0, %v1523_v50 }
 0x2b4   :  { %v2858_v21 = vpop.eup %2857  ;;  %2035 = vst.msk [vmem:[%s3903_s7 + $0xe8] sm:$0xff] %vm2005_vm1, %v2856_v16  ;;  %2883 = vpow2.f32 %v1769_v13  ;;  %v1538_v22 = vadd.f32 %v2698_v15, %v3577_v5  ;;  %v1532_v23 = vpop.f32.mrf.mxu0 }
 0x2b5   :  { %v2860_v20 = vpop.eup %2859  ;;  %2885 = vrcp.f32 %v1847_v3  ;;  %v1850_v25 = vadd.f32 1.0, %v2858_v21  ;;  %v1773_v26 = vmul.f32 1.442695, %v1665_v19  ;;  %v1533_v27 = vadd.f32 %v3577_v5, %v1532_v23 }
 0x2b6   :  { %v2862_v28 = vpop.eup %2861  ;;  %2034 = vst.msk [vmem:[%s3903_s7 + $0xe0] sm:$0xff] %vm2005_vm1, %v2860_v20  ;;  %2887 = vpow2.f32 %v1775_v17  ;;  %v1668_v29 = vsub.f32 0.0, %v1538_v22  ;;  %v2701_v30 = vpop.f32.mrf.mxu0 }
 0x2b7   :  { %v2864_v31 = vpop.eup %2863  ;;  %2889 = vrcp.f32 %v1850_v25  ;;  %v1849_v34 = vadd.f32 1.0, %v2862_v28  ;;  %v1667_v35 = vsub.f32 0.0, %v1533_v27  ;;  %v1548_v36 = vadd.f32 %v2701_v30, %v3577_v5 }
 0x2b8   :  { %v2866_v37 = vpop.eup %2865  ;;  %2037 = vst.msk [vmem:[%s3903_s7 + $0xf8] sm:$0xff] %vm2005_vm1, %v2864_v31  ;;  %2891 = vpow2.f32 %v1773_v26  ;;  %v1779_v38 = vmul.f32 1.442695, %v1668_v29  ;;  %v1542_v39 = vpop.f32.mrf.mxu0 }
 0x2b9   :  { %v2868_v40 = vpop.eup %2867  ;;  %2893 = vrcp.f32 %v1849_v34  ;;  %v1852_v42 = vadd.f32 1.0, %v2866_v37  ;;  %v1777_v44 = vmul.f32 1.442695, %v1667_v35  ;;  %v1670_v45 = vsub.f32 0.0, %v1548_v36 }
 0x2ba   :  { %v2870_v49 = vpop.eup %2869  ;;  %2036 = vst.msk [vmem:[%s3903_s7 + $0xf0] sm:$0xff] %vm2005_vm1, %v2868_v40  ;;  %2895 = vpow2.f32 %v1779_v38  ;;  %v1543_v33 = vadd.f32 %v3577_v5, %v1542_v39  ;;  %v2704_v46 = vpop.f32.mrf.mxu0 }
 0x2bb   :  { %v2872_v47 = vpop.eup %2871  ;;  %2897 = vrcp.f32 %v1852_v42  ;;  %v1851_v48 = vadd.f32 1.0, %v2870_v49  ;;  %v1783_v51 = vmul.f32 1.442695, %v1670_v45  ;;  %v1558_v43 = vadd.f32 %v2704_v46, %v3577_v5  ;;  %v2983_v49 = vld [vmem:[%s3902_s6] ss:$0 sm:$0xff] }
 0x2bc   :  { %v2874_v52 = vpop.eup %2873  ;;  %v1854_v54 = vadd.f32 1.0, %v2872_v47  ;;  %2899 = vpow2.f32 %v1777_v44  ;;  %v1669_v53 = vsub.f32 0.0, %v1543_v33  ;;  %v1552_v55 = vpop.f32.mrf.mxu0 }
 0x2bd   :  { %v2876_v56 = vpop.eup %2875  ;;  %2039 = vst.msk [vmem:[%s3903_s7 + $0x108] sm:$0xff] %vm2005_vm1, %v2874_v52  ;;  %2901 = vrcp.f32 %v1851_v48  ;;  %v1672_v18 = vsub.f32 0.0, %v1558_v43  ;;  %v1553_v24 = vadd.f32 %v3577_v5, %v1552_v55 }
 0x2be   :  { %v2878_v57 = vpop.eup %2877  ;;  %2903 = vrcp.f32 %v1854_v54  ;;  %v1853_v59 = vadd.f32 1.0, %v2876_v56  ;;  %v1781_v60 = vmul.f32 1.442695, %v1669_v53  ;;  %v2707_v63 = vpop.f32.mrf.mxu0 }
 0x2bf   :  { %v2880_v61 = vpop.eup %2879  ;;  %2038 = vst.msk [vmem:[%s3903_s7 + $0x100] sm:$0xff] %vm2005_vm1, %v2878_v57  ;;  %2905 = vpow2.f32 %v1783_v51  ;;  %v1787_v62 = vmul.f32 1.442695, %v1672_v18  ;;  %v1671_v0 = vsub.f32 0.0, %v1553_v24  ;;  %v1568_v1 = vadd.f32 %v2707_v63, %v3577_v5 }
 0x2c0   :  { %v2882_v41 = vpop.eup %2881  ;;  %2907 = vrcp.f32 %v1853_v59  ;;  %v1856_v2 = vadd.f32 1.0, %v2880_v61  ;;  %v1562_v14 = vpop.f32.mrf.mxu0 }
 0x2c1   :  { %v2884_v4 = vpop.eup %2883  ;;  %2041 = vst.msk [vmem:[%s3903_s7 + $0x118] sm:$0xff] %vm2005_vm1, %v2882_v41  ;;  %2909 = vpow2.f32 %v1781_v60  ;;  %v1785_v6 = vmul.f32 1.442695, %v1671_v0  ;;  %v1674_v58 = vsub.f32 0.0, %v1568_v1  ;;  %v1563_v7 = vadd.f32 %v3577_v5, %v1562_v14 }
 0x2c2   :  { %v2886_v32 = vpop.eup %2885  ;;  %2911 = vrcp.f32 %v1856_v2  ;;  %v1855_v8 = vadd.f32 1.0, %v2884_v4  ;;  %v2710_v9 = vpop.f32.mrf.mxu0 }
 0x2c3   :  { %v2888_v10 = vpop.eup %2887  ;;  %2040 = vst.msk [vmem:[%s3903_s7 + $0x110] sm:$0xff] %vm2005_vm1, %v2886_v32  ;;  %2913 = vpow2.f32 %v1787_v62  ;;  %v1791_v11 = vmul.f32 1.442695, %v1674_v58  ;;  %v1673_v50 = vsub.f32 0.0, %v1563_v7  ;;  %v1578_v12 = vadd.f32 %v2710_v9, %v3577_v5 }
 0x2c4   :  { %v2890_v13 = vpop.eup %2889  ;;  %2915 = vrcp.f32 %v1855_v8  ;;  %v1858_v15 = vadd.f32 1.0, %v2888_v10  ;;  %v1572_v16 = vpop.f32.mrf.mxu0 }
 0x2c5   :  { %v2892_v3 = vpop.eup %2891  ;;  %2043 = vst.msk [vmem:[%s3903_s7 + $0x128] sm:$0xff] %vm2005_vm1, %v2890_v13  ;;  %2917 = vpow2.f32 %v1785_v6  ;;  %v1789_v17 = vmul.f32 1.442695, %v1673_v50  ;;  %v1676_v19 = vsub.f32 0.0, %v1578_v12  ;;  %v1573_v21 = vadd.f32 %v3577_v5, %v1572_v16 }
 0x2c6   :  { %v2894_v22 = vpop.eup %2893  ;;  %2919 = vrcp.f32 %v1858_v15  ;;  %v1857_v23 = vadd.f32 1.0, %v2892_v3  ;;  %v2713_v20 = vpop.f32.mrf.mxu0 }
 0x2c7   :  { %v2896_v25 = vpop.eup %2895  ;;  %2042 = vst.msk [vmem:[%s3903_s7 + $0x120] sm:$0xff] %vm2005_vm1, %v2894_v22  ;;  %2921 = vpow2.f32 %v1791_v11  ;;  %v1795_v26 = vmul.f32 1.442695, %v1676_v19  ;;  %v1675_v27 = vsub.f32 0.0, %v1573_v21  ;;  %v1588_v28 = vadd.f32 %v2713_v20, %v3577_v5 }
 0x2c8   :  { %v2898_v29 = vpop.eup %2897  ;;  %2923 = vrcp.f32 %v1857_v23  ;;  %v1860_v30 = vadd.f32 1.0, %v2896_v25  ;;  %v1582_v31 = vpop.f32.mrf.mxu0 }
 0x2c9   :  { %v2900_v34 = vpop.eup %2899  ;;  %2045 = vst.msk [vmem:[%s3903_s7 + $0x138] sm:$0xff] %vm2005_vm1, %v2898_v29  ;;  %2925 = vpow2.f32 %v1789_v17  ;;  %v1793_v35 = vmul.f32 1.442695, %v1675_v27  ;;  %v1678_v36 = vsub.f32 0.0, %v1588_v28  ;;  %v1583_v37 = vadd.f32 %v3577_v5, %v1582_v31 }
 0x2ca   :  { %v2902_v38 = vpop.eup %2901  ;;  %2927 = vrcp.f32 %v1860_v30  ;;  %v1859_v39 = vadd.f32 1.0, %v2900_v34  ;;  %v2716_v40 = vpop.f32.mrf.mxu0 }
 0x2cb   :  { %v2904_v42 = vpop.eup %2903  ;;  %2044 = vst.msk [vmem:[%s3903_s7 + $0x130] sm:$0xff] %vm2005_vm1, %v2902_v38  ;;  %2929 = vpow2.f32 %v1795_v26  ;;  %v1799_v44 = vmul.f32 1.442695, %v1678_v36  ;;  %v1677_v45 = vsub.f32 0.0, %v1583_v37  ;;  %v1598_v33 = vadd.f32 %v2983_v49, %v2716_v40 }
 0x2cc   :  { %v2906_v46 = vpop.eup %2905  ;;  %2047 = vst.msk [vmem:[%s3903_s7 + $0x148] sm:$0xff] %vm2005_vm1, %v2904_v42  ;;  %2931 = vrcp.f32 %v1859_v39  ;;  %v1592_v5 = vpop.f32.mrf.mxu0 }
 0x2cd   :  { %v2908_v47 = vpop.eup %2907  ;;  %v1862_v48 = vadd.f32 1.0, %v2906_v46  ;;  %2933 = vpow2.f32 %v1793_v35  ;;  %v1797_v51 = vmul.f32 1.442695, %v1677_v45  ;;  %v1680_v43 = vsub.f32 0.0, %v1598_v33 }
 0x2ce   :  { %v2910_v52 = vpop.eup %2909  ;;  %2046 = vst.msk [vmem:[%s3903_s7 + $0x140] sm:$0xff] %vm2005_vm1, %v2908_v47  ;;  %2935 = vpow2.f32 %v1799_v44  ;;  %v1593_v54 = vadd.f32 %v2983_v49, %v1592_v5  ;;  %v2719_v53 = vpop.f32.mrf.mxu0 }
 0x2cf   :  { %v2912_v55 = vpop.eup %2911  ;;  %2937 = vrcp.f32 %v1862_v48  ;;  %v1861_v56 = vadd.f32 1.0, %v2910_v52  ;;  %v1803_v18 = vmul.f32 1.442695, %v1680_v43  ;;  %v1608_v24 = vadd.f32 %v2983_v49, %v2719_v53 }
 0x2d0   :  { %v2914_v57 = vpop.eup %2913  ;;  %2049 = vst.msk [vmem:[%s3903_s7 + $0x158] sm:$0xff] %vm2005_vm1, %v2912_v55  ;;  %2939 = vpow2.f32 %v1797_v51  ;;  %v1679_v59 = vsub.f32 0.0, %v1593_v54  ;;  %v1602_v60 = vpop.f32.mrf.mxu0 }
 0x2d1   :  { %v2916_v63 = vpop.eup %2915  ;;  %2941 = vrcp.f32 %v1861_v56  ;;  %v1864_v61 = vadd.f32 1.0, %v2914_v57  ;;  %v1682_v62 = vsub.f32 0.0, %v1608_v24  ;;  %v1603_v0 = vadd.f32 %v2983_v49, %v1602_v60 }
 0x2d2   :  { %v2918_v1 = vpop.eup %2917  ;;  %2048 = vst.msk [vmem:[%s3903_s7 + $0x150] sm:$0xff] %vm2005_vm1, %v2916_v63  ;;  %2943 = vpow2.f32 %v1803_v18  ;;  %v1801_v41 = vmul.f32 1.442695, %v1679_v59  ;;  %v2722_v2 = vpop.f32.mrf.mxu0 }
 0x2d3   :  { %v2920_v14 = vpop.eup %2919  ;;  %2945 = vrcp.f32 %v1864_v61  ;;  %v1863_v4 = vadd.f32 1.0, %v2918_v1  ;;  %v1807_v6 = vmul.f32 1.442695, %v1682_v62  ;;  %v1681_v58 = vsub.f32 0.0, %v1603_v0 }
 0x2d4   :  { %v2922_v7 = vpop.eup %2921  ;;  %2051 = vst.msk [vmem:[%s3903_s7 + $0x168] sm:$0xff] %vm2005_vm1, %v2920_v14  ;;  %2947 = vpow2.f32 %v1801_v41  ;;  %v1618_v32 = vadd.f32 %v2983_v49, %v2722_v2  ;;  %v1612_v8 = vpop.f32.mrf.mxu0 }
 0x2d5   :  { %v2924_v9 = vpop.eup %2923  ;;  %2949 = vrcp.f32 %v1863_v4  ;;  %v1866_v10 = vadd.f32 1.0, %v2922_v7  ;;  %v1805_v11 = vmul.f32 1.442695, %v1681_v58  ;;  %v1613_v50 = vadd.f32 %v2983_v49, %v1612_v8 }
 0x2d6   :  { %v2926_v12 = vpop.eup %2925  ;;  %2050 = vst.msk [vmem:[%s3903_s7 + $0x160] sm:$0xff] %vm2005_vm1, %v2924_v9  ;;  %2951 = vpow2.f32 %v1807_v6  ;;  %v1684_v13 = vsub.f32 0.0, %v1618_v32 }
 0x2d7   :  { %v2928_v15 = vpop.eup %2927  ;;  %2953 = vrcp.f32 %v1866_v10  ;;  %v1865_v16 = vadd.f32 1.0, %v2926_v12  ;;  %v1683_v3 = vsub.f32 0.0, %v1613_v50 }
 0x2d8   :  { %v2930_v17 = vpop.eup %2929  ;;  %2053 = vst.msk [vmem:[%s3903_s7 + $0x178] sm:$0xff] %vm2005_vm1, %v2928_v15  ;;  %2955 = vpow2.f32 %v1805_v11  ;;  %v1811_v19 = vmul.f32 1.442695, %v1684_v13 }
 0x2d9   :  { %v2932_v21 = vpop.eup %2931  ;;  %2957 = vrcp.f32 %v1865_v16  ;;  %v1868_v22 = vadd.f32 1.0, %v2930_v17  ;;  %v1809_v23 = vmul.f32 1.442695, %v1683_v3 }
 0x2da   :  { %v2934_v20 = vpop.eup %2933  ;;  %2052 = vst.msk [vmem:[%s3903_s7 + $0x170] sm:$0xff] %vm2005_vm1, %v2932_v21  ;;  %2959 = vpow2.f32 %v1811_v19 }
 0x2db   :  { %v2936_v25 = vpop.eup %2935  ;;  %2961 = vrcp.f32 %v1868_v22  ;;  %v1867_v26 = vadd.f32 1.0, %v2934_v20 }
 0x2dc   :  { %v2938_v27 = vpop.eup %2937  ;;  %v1870_v28 = vadd.f32 1.0, %v2936_v25  ;;  %2963 = vpow2.f32 %v1809_v23 }
 0x2dd   :  { %v2940_v29 = vpop.eup %2939  ;;  %2055 = vst.msk [vmem:[%s3903_s7 + $0x188] sm:$0xff] %vm2005_vm1, %v2938_v27  ;;  %2965 = vrcp.f32 %v1867_v26 }
 0x2de   :  { %v2942_v30 = vpop.eup %2941  ;;  %2967 = vrcp.f32 %v1870_v28  ;;  %v1869_v31 = vadd.f32 1.0, %v2940_v29 }
 0x2df   :  { %v2944_v34 = vpop.eup %2943  ;;  %2054 = vst.msk [vmem:[%s3903_s7 + $0x180] sm:$0xff] %vm2005_vm1, %v2942_v30 }
 0x2e0   :  { %v2946_v35 = vpop.eup %2945  ;;  %2969 = vrcp.f32 %v1869_v31  ;;  %v1872_v36 = vadd.f32 1.0, %v2944_v34 }
 0x2e1   :  { %v2948_v37 = vpop.eup %2947  ;;  %2057 = vst.msk [vmem:[%s3903_s7 + $0x198] sm:$0xff] %vm2005_vm1, %v2946_v35 }
 0x2e2   :  { %v2950_v38 = vpop.eup %2949  ;;  %2971 = vrcp.f32 %v1872_v36  ;;  %v1871_v39 = vadd.f32 1.0, %v2948_v37 }
 0x2e3   :  { %v2952_v40 = vpop.eup %2951  ;;  %2056 = vst.msk [vmem:[%s3903_s7 + $0x190] sm:$0xff] %vm2005_vm1, %v2950_v38 }
 0x2e4   :  { %v2954_v42 = vpop.eup %2953  ;;  %2973 = vrcp.f32 %v1871_v39  ;;  %v1874_v44 = vadd.f32 1.0, %v2952_v40 }
 0x2e5   :  { %v2956_v45 = vpop.eup %2955  ;;  %2059 = vst.msk [vmem:[%s3903_s7 + $0x1a8] sm:$0xff] %vm2005_vm1, %v2954_v42 }
 0x2e6   :  { %v2958_v49 = vpop.eup %2957  ;;  %2975 = vrcp.f32 %v1874_v44  ;;  %v1873_v33 = vadd.f32 1.0, %v2956_v45 }
 0x2e7   :  { %v2960_v46 = vpop.eup %2959  ;;  %2058 = vst.msk [vmem:[%s3903_s7 + $0x1a0] sm:$0xff] %vm2005_vm1, %v2958_v49 }
 0x2e8   :  { %v2962_v5 = vpop.eup %2961  ;;  %2977 = vrcp.f32 %v1873_v33  ;;  %v1876_v47 = vadd.f32 1.0, %v2960_v46 }
 0x2e9   :  { %v2964_v48 = vpop.eup %2963  ;;  %2061 = vst.msk [vmem:[%s3903_s7 + $0x1b8] sm:$0xff] %vm2005_vm1, %v2962_v5 }
 0x2ea   :  { %v2966_v51 = vpop.eup %2965  ;;  %2979 = vrcp.f32 %v1876_v47  ;;  %v1875_v43 = vadd.f32 1.0, %v2964_v48 }
 0x2eb   :  { %v2968_v52 = vpop.eup %2967  ;;  %2060 = vst.msk [vmem:[%s3903_s7 + $0x1b0] sm:$0xff] %vm2005_vm1, %v2966_v51 }
 0x2ec   :  { %2063 = vst.msk [vmem:[%s3903_s7 + $0x1c8] sm:$0xff] %vm2005_vm1, %v2968_v52  ;;  %2981 = vrcp.f32 %v1875_v43 }
 0x2ed   :  { %v2970_v54 = vpop.eup %2969 }
 0x2ee   :  { %2062 = vst.msk [vmem:[%s3903_s7 + $0x1c0] sm:$0xff] %vm2005_vm1, %v2970_v54 }
 0x2ef   :  { %v2972_v53 = vpop.eup %2971 }
 0x2f0   :  { %2065 = vst.msk [vmem:[%s3903_s7 + $0x1d8] sm:$0xff] %vm2005_vm1, %v2972_v53 }
 0x2f1   :  { %v2974_v55 = vpop.eup %2973 }
 0x2f2   :  { %2064 = vst.msk [vmem:[%s3903_s7 + $0x1d0] sm:$0xff] %vm2005_vm1, %v2974_v55 }
 0x2f3   :  { %v2976_v56 = vpop.eup %2975 }
 0x2f4   :  { %2067 = vst.msk [vmem:[%s3903_s7 + $0x1e8] sm:$0xff] %vm2005_vm1, %v2976_v56 }
 0x2f5   :  { %v2978_v18 = vpop.eup %2977 }
 0x2f6   :  { %2066 = vst.msk [vmem:[%s3903_s7 + $0x1e0] sm:$0xff] %vm2005_vm1, %v2978_v18 }
 0x2f7   :  { %v2980_v24 = vpop.eup %2979 }
 0x2f8   :  { %2069 = vst.msk [vmem:[%s3903_s7 + $0x1f8] sm:$0xff] %vm2005_vm1, %v2980_v24 }
 0x2f9   :  { %v2982_v57 = vpop.eup %2981 }
 0x2fa   :  { %2068 = vst.msk [vmem:[%s3903_s7 + $0x1f0] sm:$0xff] %vm2005_vm1, %v2982_v57 }

// kernel: tpu_custom_call.1
= control target key start
LH: loop header
LB: loop body
LE: loop exit
PB: predicated region body
PF: predicated region fallthrough
CT: control target
= control target key end

     0   :  { %vm99_vm0 = vcmask 130048   ;;  %vm2005_vm1 = vcmask 64512   ;;  %s3896_s1 = inlined_call_operand.vmem [shape: f32[16,128], index: 1, kind: input, shape index: {}]   ;;  %s3897_s0 = inlined_call_operand.vmem [shape: f32[512,16], index: 0, kind: input, shape index: {}]   ;;  %s3898_s3 = inlined_call_operand.vmem [shape: f32[128,128], index: 3, kind: input, shape index: {}]   ;;  %s3899_s2 = inlined_call_operand.vmem [shape: f32[1,128], index: 2, kind: input, shape index: {}]   ;;  %s3900_s5 = inlined_call_operand.vmem [shape: f32[128,8], index: 5, kind: input, shape index: {}]   ;;  %s3901_s4 = inlined_call_operand.vmem [shape: f32[1,128], index: 4, kind: input, shape index: {}]   ;;  %s3902_s6 = inlined_call_operand.vmem [shape: f32[1,8], index: 6, kind: input, shape index: {}]   ;;  %s3903_s7 = inlined_call_operand.vmem [shape: f32[512,8], index: 7, kind: output, shape index: {}]  }
   0x1   :  { %v91_v0 = vld [vmem:[%s3896_s1 + $0x8] sm:$0xff]  ;;  %v90_v1 = vld [vmem:[%s3896_s1] sm:$0xff]  ;;  %v28_v4 = vld [vmem:[%s3897_s0 + $0x10] sm:$0xff] }
   0x2   :  { %v26_v2 = vld [vmem:[%s3897_s0] sm:$0xff]  ;;  %2367 = vmatprep.subr.mxu0 %v91_v0  ;;  %v27_v3 = vld [vmem:[%s3897_s0 + $0x8] sm:$0xff]  ;;  %2723 = vmatprep.subr.mxu1 %v91_v0  ;;  %v29_v5 = vld [vmem:[%s3897_s0 + $0x18] sm:$0xff] }
   0x3   :  { %2371 = vmatprep.mubr.msk.f32.mxu0 %vm99_vm0, %v26_v2  ;;  %2368 = vmatpush3.msra.mxu0 %v91_v0  ;;  %v30_v6 = vld [vmem:[%s3897_s0 + $0x20] sm:$0xff]  ;;  %v31_v7 = vld [vmem:[%s3897_s0 + $0x28] sm:$0xff]  ;;  %v32_v8 = vld [vmem:[%s3897_s0 + $0x30] sm:$0xff] }
   0x4   :  { %2369 = vmatprep.subr.mxu0 %v90_v1  ;;  %2725 = vmatpush3.msra.mxu1 %v91_v0  ;;  %v58_v9 = vld [vmem:[%s3897_s0 + $0x100] sm:$0xff]  ;;  %v59_v10 = vld [vmem:[%s3897_s0 + $0x108] sm:$0xff]  ;;  %v60_v11 = vld [vmem:[%s3897_s0 + $0x110] sm:$0xff] }
   0x5   :  { %2370 = vmatpush3.msra.mxu0 %v90_v1  ;;  %2724 = vmatprep.subr.mxu1 %v90_v1  ;;  %v33_v12 = vld [vmem:[%s3897_s0 + $0x38] sm:$0xff]  ;;  %v34_v14 = vld [vmem:[%s3897_s0 + $0x40] sm:$0xff]  ;;  %v35_v16 = vld [vmem:[%s3897_s0 + $0x48] sm:$0xff] }
   0x6   :  { %2372 = vmatmul.mubr.msk.f32.vlgmr.msra.gmra.mxu0 %vm99_vm0, %v27_v3  ;;  %2726 = vmatpush3.msra.mxu1 %v90_v1  ;;  %v61_v13 = vld [vmem:[%s3897_s0 + $0x118] sm:$0xff]  ;;  %v62_v15 = vld [vmem:[%s3897_s0 + $0x120] sm:$0xff]  ;;  %v63_v17 = vld [vmem:[%s3897_s0 + $0x128] sm:$0xff] }
   0x7   :  { %2374 = vmatprep.mubr.msk.f32.mxu0 %vm99_vm0, %v28_v4  ;;  %2419 = vmatprep.mubr.msk.f32.mxu1 %vm99_vm0, %v58_v9  ;;  %v36_v18 = vld [vmem:[%s3897_s0 + $0x50] sm:$0xff]  ;;  %v37_v20 = vld [vmem:[%s3897_s0 + $0x58] sm:$0xff]  ;;  %v38_v23 = vld [vmem:[%s3897_s0 + $0x60] sm:$0xff] }
   0x8   :  { %2420 = vmatmul.mubr.msk.f32.vlgmr.msra.gmra.mxu1 %vm99_vm0, %v59_v10  ;;  %v64_v19 = vld [vmem:[%s3897_s0 + $0x130] sm:$0xff]  ;;  %v65_v21 = vld [vmem:[%s3897_s0 + $0x138] sm:$0xff]  ;;  %v66_v24 = vld [vmem:[%s3897_s0 + $0x140] sm:$0xff] }
   0x9   :  { %2422 = vmatprep.mubr.msk.f32.mxu1 %vm99_vm0, %v60_v11  ;;  %v756_v22 = vld [vmem:[%s3898_s3 + $0x78] sm:$0xff]  ;;  %v755_v25 = vld [vmem:[%s3898_s3 + $0x70] sm:$0xff]  ;;  %v39_v26 = vld [vmem:[%s3897_s0 + $0x68] sm:$0xff] }
   0xa   :  { %2375 = vmatmul.mubr.msk.f32.gmra.mxu0 %vm99_vm0, %v29_v5  ;;  %2467 = vmatprep.subr.mxu1 %v756_v22  ;;  %v67_v27 = vld [vmem:[%s3897_s0 + $0x148] sm:$0xff]  ;;  %v40_v28 = vld [vmem:[%s3897_s0 + $0x70] sm:$0xff]  ;;  %v41_v31 = vld [vmem:[%s3897_s0 + $0x78] sm:$0xff] }
   0xb   :  { %2377 = vmatprep.mubr.msk.f32.mxu0 %vm99_vm0, %v30_v6  ;;  %2468 = vmatpush3.msra.mxu1 %v756_v22  ;;  %v68_v29 = vld [vmem:[%s3897_s0 + $0x150] sm:$0xff]  ;;  %v754_v30 = vld [vmem:[%s3898_s3 + $0x68] sm:$0xff]  ;;  %v69_v32 = vld [vmem:[%s3897_s0 + $0x158] sm:$0xff] }
   0xc   :  { %2423 = vmatmul.mubr.msk.f32.gmra.mxu1 %vm99_vm0, %v61_v13  ;;  %2469 = vmatprep.subr.mxu1 %v755_v25  ;;  %v42_v33 = vld [vmem:[%s3897_s0 + $0x80] sm:$0xff]  ;;  %v43_v36 = vld [vmem:[%s3897_s0 + $0x88] sm:$0xff]  ;;  %v44_v38 = vld [vmem:[%s3897_s0 + $0x90] sm:$0xff] }
   0xd   :  { %2425 = vmatprep.mubr.msk.f32.mxu1 %vm99_vm0, %v62_v15  ;;  %2470 = vmatpush3.msra.mxu1 %v755_v25  ;;  %v70_v34 = vld [vmem:[%s3897_s0 + $0x160] sm:$0xff]  ;;  %v71_v37 = vld [vmem:[%s3897_s0 + $0x168] sm:$0xff]  ;;  %v72_v39 = vld [vmem:[%s3897_s0 + $0x170] sm:$0xff] }
   0xe   :  { %2378 = vmatmul.mubr.msk.f32.gmra.mxu0 %vm99_vm0, %v31_v7  ;;  %2471 = vmatprep.subr.mxu1 %v754_v30  ;;  %v753_v35 = vld [vmem:[%s3898_s3 + $0x60] sm:$0xff]  ;;  %v752_v40 = vld [vmem:[%s3898_s3 + $0x58] sm:$0xff]  ;;  %v751_v45 = vld [vmem:[%s3898_s3 + $0x50] sm:$0xff] }
   0xf   :  { %2380 = vmatprep.mubr.msk.f32.mxu0 %vm99_vm0, %v32_v8  ;;  %2472 = vmatpush3.msra.mxu1 %v754_v30  ;;  %v45_v41 = vld [vmem:[%s3897_s0 + $0x98] sm:$0xff]  ;;  %v46_v43 = vld [vmem:[%s3897_s0 + $0xa0] sm:$0xff]  ;;  %v47_v46 = vld [vmem:[%s3897_s0 + $0xa8] sm:$0xff] }
  0x10   :  { %2426 = vmatmul.mubr.msk.f32.gmra.mxu1 %vm99_vm0, %v63_v17  ;;  %2473 = vmatprep.subr.mxu1 %v753_v35  ;;  %v73_v42 = vld [vmem:[%s3897_s0 + $0x178] sm:$0xff]  ;;  %v74_v44 = vld [vmem:[%s3897_s0 + $0x180] sm:$0xff]  ;;  %v75_v47 = vld [vmem:[%s3897_s0 + $0x188] sm:$0xff] }
  0x11   :  { %2428 = vmatprep.mubr.msk.f32.mxu1 %vm99_vm0, %v64_v19  ;;  %2474 = vmatpush3.msra.mxu1 %v753_v35  ;;  %v48_v48 = vld [vmem:[%s3897_s0 + $0xb0] sm:$0xff]  ;;  %v750_v50 = vld [vmem:[%s3898_s3 + $0x48] sm:$0xff]  ;;  %v49_v51 = vld [vmem:[%s3897_s0 + $0xb8] sm:$0xff] }
  0x12   :  { %2381 = vmatmul.mubr.msk.f32.gmra.mxu0 %vm99_vm0, %v33_v12  ;;  %2475 = vmatprep.subr.mxu1 %v752_v40  ;;  %v76_v49 = vld [vmem:[%s3897_s0 + $0x190] sm:$0xff]  ;;  %v77_v52 = vld [vmem:[%s3897_s0 + $0x198] sm:$0xff]  ;;  %v50_v53 = vld [vmem:[%s3897_s0 + $0xc0] sm:$0xff] }
  0x13   :  { %2383 = vmatprep.mubr.msk.f32.mxu0 %vm99_vm0, %v34_v14  ;;  %2476 = vmatpush3.msra.mxu1 %v752_v40  ;;  %v78_v54 = vld [vmem:[%s3897_s0 + $0x1a0] sm:$0xff]  ;;  %v51_v56 = vld [vmem:[%s3897_s0 + $0xc8] sm:$0xff]  ;;  %v52_v58 = vld [vmem:[%s3897_s0 + $0xd0] sm:$0xff] }
  0x14   :  { %2429 = vmatmul.mubr.msk.f32.gmra.mxu1 %vm99_vm0, %v65_v21  ;;  %2477 = vmatprep.subr.mxu1 %v751_v45  ;;  %v749_v55 = vld [vmem:[%s3898_s3 + $0x40] sm:$0xff]  ;;  %v79_v57 = vld [vmem:[%s3897_s0 + $0x1a8] sm:$0xff]  ;;  %v80_v59 = vld [vmem:[%s3897_s0 + $0x1b0] sm:$0xff] }
  0x15   :  { %2431 = vmatprep.mubr.msk.f32.mxu1 %vm99_vm0, %v66_v24  ;;  %2478 = vmatpush3.msra.mxu1 %v751_v45  ;;  %v748_v60 = vld [vmem:[%s3898_s3 + $0x38] sm:$0xff]  ;;  %v54_v63 = vld [vmem:[%s3897_s0 + $0xe0] sm:$0xff]  ;;  %v747_v1 = vld [vmem:[%s3898_s3 + $0x30] sm:$0xff] }
  0x16   :  { %2384 = vmatmul.mubr.msk.f32.gmra.mxu0 %vm99_vm0, %v35_v16  ;;  %2479 = vmatprep.subr.mxu1 %v750_v50  ;;  %v53_v61 = vld [vmem:[%s3897_s0 + $0xd8] sm:$0xff]  ;;  %v82_v0 = vld [vmem:[%s3897_s0 + $0x1c0] sm:$0xff]  ;;  %v55_v2 = vld [vmem:[%s3897_s0 + $0xe8] sm:$0xff] }
  0x17   :  { %2386 = vmatprep.mubr.msk.f32.mxu0 %vm99_vm0, %v36_v18  ;;  %2480 = vmatpush3.msra.mxu1 %v750_v50  ;;  %v81_v62 = vld [vmem:[%s3897_s0 + $0x1b8] sm:$0xff]  ;;  %v83_v3 = vld [vmem:[%s3897_s0 + $0x1c8] sm:$0xff]  ;;  %v56_v4 = vld [vmem:[%s3897_s0 + $0xf0] sm:$0xff] }
  0x18   :  { %2432 = vmatmul.mubr.msk.f32.gmra.mxu1 %vm99_vm0, %v67_v27  ;;  %2481 = vmatprep.subr.mxu1 %v749_v55  ;;  %v84_v5 = vld [vmem:[%s3897_s0 + $0x1d0] sm:$0xff]  ;;  %v746_v6 = vld [vmem:[%s3898_s3 + $0x28] sm:$0xff]  ;;  %v57_v7 = vld [vmem:[%s3897_s0 + $0xf8] sm:$0xff] }
  0x19   :  { %2434 = vmatprep.mubr.msk.f32.mxu1 %vm99_vm0, %v68_v29  ;;  %2482 = vmatpush3.msra.mxu1 %v749_v55  ;;  %v85_v8 = vld [vmem:[%s3897_s0 + $0x1d8] sm:$0xff]  ;;  %v86_v9 = vld [vmem:[%s3897_s0 + $0x1e0] sm:$0xff]  ;;  %v87_v12 = vld [vmem:[%s3897_s0 + $0x1e8] sm:$0xff] }
  0x1a   :  { %2387 = vmatmul.mubr.msk.f32.gmra.mxu0 %vm99_vm0, %v37_v20  ;;  %2483 = vmatprep.subr.mxu1 %v748_v60  ;;  %v745_v10 = vld [vmem:[%s3898_s3 + $0x20] sm:$0xff]  ;;  %v744_v11 = vld [vmem:[%s3898_s3 + $0x18] sm:$0xff]  ;;  %v88_v13 = vld [vmem:[%s3897_s0 + $0x1f0] sm:$0xff] }
  0x1b   :  { %2389 = vmatprep.mubr.msk.f32.mxu0 %vm99_vm0, %v38_v23  ;;  %2484 = vmatpush3.msra.mxu1 %v748_v60  ;;  %v743_v14 = vld [vmem:[%s3898_s3 + $0x10] sm:$0xff]  ;;  %v89_v15 = vld [vmem:[%s3897_s0 + $0x1f8] sm:$0xff]  ;;  %v742_v16 = vld [vmem:[%s3898_s3 + $0x8] sm:$0xff] }
  0x1c   :  { %2435 = vmatmul.mubr.msk.f32.gmra.mxu1 %vm99_vm0, %v69_v32  ;;  %2485 = vmatprep.subr.mxu1 %v747_v1  ;;  %v741_v17 = vld [vmem:[%s3898_s3] sm:$0xff]  ;;  %v1228_v25 = vld [vmem:[%s3900_s5 + $0x78] sm:$0xff]  ;;  %v1223_v45 = vld [vmem:[%s3900_s5 + $0x50] sm:$0xff] }
  0x1d   :  { %2437 = vmatprep.mubr.msk.f32.mxu1 %vm99_vm0, %v70_v34  ;;  %2486 = vmatpush3.msra.mxu1 %v747_v1  ;;  %v3337_v18 = vld [vmem:[%s3899_s2] ss:$0 sm:$0xff]  ;;  %v1219_v1 = vld [vmem:[%s3900_s5 + $0x30] sm:$0xff] }
  0x1e   :  { %2390 = vmatmul.mubr.msk.f32.gmra.mxu0 %vm99_vm0, %v39_v26  ;;  %2487 = vmatprep.subr.mxu1 %v746_v6  ;;  %v1227_v26 = vld [vmem:[%s3900_s5 + $0x70] sm:$0xff]  ;;  %v1225_v35 = vld [vmem:[%s3900_s5 + $0x60] sm:$0xff] }
  0x1f   :  { %2392 = vmatprep.mubr.msk.f32.mxu0 %vm99_vm0, %v40_v28  ;;  %2488 = vmatpush3.msra.mxu1 %v746_v6  ;;  %v1221_v55 = vld [vmem:[%s3900_s5 + $0x40] sm:$0xff] }
  0x20   :  { %2438 = vmatmul.mubr.msk.f32.gmra.mxu1 %vm99_vm0, %v71_v37  ;;  %2489 = vmatprep.subr.mxu1 %v745_v10 }
  0x21   :  { %2440 = vmatprep.mubr.msk.f32.mxu1 %vm99_vm0, %v72_v39  ;;  %2490 = vmatpush3.msra.mxu1 %v745_v10  ;;  %v1217_v10 = vld [vmem:[%s3900_s5 + $0x20] sm:$0xff] }
  0x22   :  { %2393 = vmatmul.mubr.msk.f32.gmra.mxu0 %vm99_vm0, %v41_v31  ;;  %2491 = vmatprep.subr.mxu1 %v744_v11  ;;  %v1226_v31 = vld [vmem:[%s3900_s5 + $0x68] sm:$0xff] }
  0x23   :  { %2395 = vmatprep.mubr.msk.f32.mxu0 %vm99_vm0, %v42_v33  ;;  %2492 = vmatpush3.msra.mxu1 %v744_v11 }
  0x24   :  { %2441 = vmatmul.mubr.msk.f32.gmra.mxu1 %vm99_vm0, %v73_v42  ;;  %2493 = vmatprep.subr.mxu1 %v743_v14 }
  0x25   :  { %2443 = vmatprep.mubr.msk.f32.mxu1 %vm99_vm0, %v74_v44  ;;  %2494 = vmatpush3.msra.mxu1 %v743_v14 }
  0x26   :  { %2396 = vmatmul.mubr.msk.f32.gmra.mxu0 %vm99_vm0, %v43_v36  ;;  %2495 = vmatprep.subr.mxu1 %v742_v16 }
  0x27   :  { %2398 = vmatprep.mubr.msk.f32.mxu0 %vm99_vm0, %v44_v38  ;;  %2496 = vmatpush3.msra.mxu1 %v742_v16  ;;  %v1216_v16 = vld [vmem:[%s3900_s5 + $0x18] sm:$0xff] }
  0x28   :  { %2444 = vmatmul.mubr.msk.f32.gmra.mxu1 %vm99_vm0, %v75_v47  ;;  %2497 = vmatprep.subr.mxu1 %v741_v17 }
  0x29   :  { %2446 = vmatprep.mubr.msk.f32.mxu1 %vm99_vm0, %v76_v49  ;;  %2498 = vmatpush3.msra.mxu1 %v741_v17 }
  0x2a   :  { %2399 = vmatmul.mubr.msk.f32.gmra.mxu0 %vm99_vm0, %v45_v41  ;;  %2595 = vmatprep.subr.mxu0 %v1228_v25  ;;  %v1224_v41 = vld [vmem:[%s3900_s5 + $0x58] sm:$0xff] }
  0x2b   :  { %2401 = vmatprep.mubr.msk.f32.mxu0 %vm99_vm0, %v46_v43  ;;  %2596 = vmatpush3.msra.mxu0 %v1228_v25 }
  0x2c   :  { %2447 = vmatmul.mubr.msk.f32.gmra.mxu1 %vm99_vm0, %v77_v52  ;;  %2597 = vmatprep.subr.mxu0 %v1227_v26 }
  0x2d   :  { %2449 = vmatprep.mubr.msk.f32.mxu1 %vm99_vm0, %v78_v54  ;;  %2598 = vmatpush3.msra.mxu0 %v1227_v26  ;;  %v1214_v26 = vld [vmem:[%s3900_s5 + $0x8] sm:$0xff] }
  0x2e   :  { %2402 = vmatmul.mubr.msk.f32.gmra.mxu0 %vm99_vm0, %v47_v46  ;;  %2599 = vmatprep.subr.mxu0 %v1226_v31 }
  0x2f   :  { %2404 = vmatprep.mubr.msk.f32.mxu0 %vm99_vm0, %v48_v48  ;;  %2600 = vmatpush3.msra.mxu0 %v1226_v31 }
  0x30   :  { %2450 = vmatmul.mubr.msk.f32.gmra.mxu1 %vm99_vm0, %v79_v57  ;;  %2601 = vmatprep.subr.mxu0 %v1225_v35 }
  0x31   :  { %2452 = vmatprep.mubr.msk.f32.mxu1 %vm99_vm0, %v80_v59  ;;  %2602 = vmatpush3.msra.mxu0 %v1225_v35 }
  0x32   :  { %2405 = vmatmul.mubr.msk.f32.gmra.mxu0 %vm99_vm0, %v49_v51  ;;  %2603 = vmatprep.subr.mxu0 %v1224_v41  ;;  %v1222_v51 = vld [vmem:[%s3900_s5 + $0x48] sm:$0xff] }
  0x33   :  { %2407 = vmatprep.mubr.msk.f32.mxu0 %vm99_vm0, %v50_v53  ;;  %2604 = vmatpush3.msra.mxu0 %v1224_v41 }
  0x34   :  { %2453 = vmatmul.mubr.msk.f32.gmra.mxu1 %vm99_vm0, %v81_v62  ;;  %2605 = vmatprep.subr.mxu0 %v1223_v45 }
  0x35   :  { %2455 = vmatprep.mubr.msk.f32.mxu1 %vm99_vm0, %v82_v0  ;;  %2606 = vmatpush3.msra.mxu0 %v1223_v45 }
  0x36   :  { %2408 = vmatmul.mubr.msk.f32.gmra.mxu0 %vm99_vm0, %v51_v56  ;;  %2607 = vmatprep.subr.mxu0 %v1222_v51 }
  0x37   :  { %2410 = vmatprep.mubr.msk.f32.mxu0 %vm99_vm0, %v52_v58  ;;  %2608 = vmatpush3.msra.mxu0 %v1222_v51 }
  0x38   :  { %2456 = vmatmul.mubr.msk.f32.gmra.mxu1 %vm99_vm0, %v83_v3  ;;  %2609 = vmatprep.subr.mxu0 %v1221_v55 }
  0x39   :  { %2458 = vmatprep.mubr.msk.f32.mxu1 %vm99_vm0, %v84_v5  ;;  %2610 = vmatpush3.msra.mxu0 %v1221_v55 }
  0x3a   :  { %2411 = vmatmul.mubr.msk.f32.gmra.mxu0 %vm99_vm0, %v53_v61  ;;  %v1220_v61 = vld [vmem:[%s3900_s5 + $0x38] sm:$0xff] }
  0x3b   :  { %2413 = vmatprep.mubr.msk.f32.mxu0 %vm99_vm0, %v54_v63  ;;  %2611 = vmatprep.subr.mxu0 %v1220_v61 }
  0x3c   :  { %2459 = vmatmul.mubr.msk.f32.gmra.mxu1 %vm99_vm0, %v85_v8  ;;  %2612 = vmatpush3.msra.mxu0 %v1220_v61 }
  0x3d   :  { %2461 = vmatprep.mubr.msk.f32.mxu1 %vm99_vm0, %v86_v9  ;;  %2613 = vmatprep.subr.mxu0 %v1219_v1 }
  0x3e   :  { %2414 = vmatmul.mubr.msk.f32.gmra.mxu0 %vm99_vm0, %v55_v2 }
  0x3f   :  { %2416 = vmatprep.mubr.msk.f32.mxu0 %vm99_vm0, %v56_v4  ;;  %2614 = vmatpush3.msra.mxu0 %v1219_v1 }
  0x40   :  { %2462 = vmatmul.mubr.msk.f32.gmra.mxu1 %vm99_vm0, %v87_v12 }
  0x41   :  { %2464 = vmatprep.mubr.msk.f32.mxu1 %vm99_vm0, %v88_v13 }
  0x42   :  { %2417 = vmatmul.mubr.msk.f32.gmra.mxu0 %vm99_vm0, %v57_v7  ;;  %v1218_v7 = vld [vmem:[%s3900_s5 + $0x28] sm:$0xff] }
  0x43   :  { %2615 = vmatprep.subr.mxu0 %v1218_v7 }
  0x44   :  { %2465 = vmatmul.mubr.msk.f32.gmra.mxu1 %vm99_vm0, %v89_v15  ;;  %2616 = vmatpush3.msra.mxu0 %v1218_v7 }
  0x45   :  { %2617 = vmatprep.subr.mxu0 %v1217_v10 }
  0x46   :  { %2618 = vmatpush3.msra.mxu0 %v1217_v10 }
  0x47   :  { %2619 = vmatprep.subr.mxu0 %v1216_v16 }
  0x48   :  { %2620 = vmatpush3.msra.mxu0 %v1216_v16 }
  0xc6   :  { %v2373_v19 = vpop.f32.mrf.mxu0 }
  0xc7   :  { %v364_v20 = vadd.f32 %v2373_v19, %v3337_v18 }
  0xc8   :  { %v358_v21 = vpop.f32.mrf.mxu0  ;;  %v3352_v33 = vpop.f32.mrf.mxu1 }
  0xc9   :  { %v359_v22 = vadd.f32 %v3337_v18, %v358_v21  ;;  %v678_v27 = vmax.f32 %v364_v20, 0.0  ;;  %v1215_v20 = vld [vmem:[%s3900_s5 + $0x10] sm:$0xff] }
  0xca   :  { %v2376_v23 = vpop.f32.mrf.mxu0  ;;  %v3358_v39 = vpop.f32.mrf.mxu1  ;;  %2621 = vmatprep.subr.mxu0 %v1215_v20 }
  0xcb   :  { %v677_v24 = vmax.f32 %v359_v22, 0.0  ;;  %v374_v28 = vadd.f32 %v2376_v23, %v3337_v18  ;;  %2622 = vmatpush3.msra.mxu0 %v1215_v20 }
  0xcc   :  { %v368_v29 = vpop.f32.mrf.mxu0  ;;  %v3364_v43 = vpop.f32.mrf.mxu1  ;;  %2623 = vmatprep.subr.mxu0 %v1214_v26 }
  0xcd   :  { %v369_v30 = vadd.f32 %v3337_v18, %v368_v29  ;;  %2499 = vmatprep.mubr.f32.mxu1 %v677_v24  ;;  %v680_v36 = vmax.f32 %v374_v28, 0.0  ;;  %2624 = vmatpush3.msra.mxu0 %v1214_v26 }
  0xce   :  { %v2379_v32 = vpop.f32.mrf.mxu0  ;;  %2500 = vmatmul.mubr.f32.vlgmr.msra.gmra.mxu1 %v678_v27  ;;  %v3370_v49 = vpop.f32.mrf.mxu1 }
  0xcf   :  { %v679_v34 = vmax.f32 %v369_v30, 0.0  ;;  %v384_v37 = vadd.f32 %v2379_v32, %v3337_v18 }
  0xd0   :  { %v378_v38 = vpop.f32.mrf.mxu0  ;;  %v3376_v53 = vpop.f32.mrf.mxu1 }
  0xd1   :  { %v379_v40 = vadd.f32 %v3337_v18, %v378_v38  ;;  %2502 = vmatprep.mubr.f32.mxu1 %v679_v34  ;;  %v682_v46 = vmax.f32 %v384_v37, 0.0 }
  0xd2   :  { %v2382_v42 = vpop.f32.mrf.mxu0  ;;  %2503 = vmatmul.mubr.f32.gmra.mxu1 %v680_v36  ;;  %v3382_v59 = vpop.f32.mrf.mxu1 }
  0xd3   :  { %v681_v44 = vmax.f32 %v379_v40, 0.0  ;;  %v394_v47 = vadd.f32 %v2382_v42, %v3337_v18 }
  0xd4   :  { %v388_v48 = vpop.f32.mrf.mxu0  ;;  %v3388_v63 = vpop.f32.mrf.mxu1 }
  0xd5   :  { %v389_v50 = vadd.f32 %v3337_v18, %v388_v48  ;;  %2505 = vmatprep.mubr.f32.mxu1 %v681_v44  ;;  %v684_v56 = vmax.f32 %v394_v47, 0.0 }
  0xd6   :  { %v2385_v52 = vpop.f32.mrf.mxu0  ;;  %2506 = vmatmul.mubr.f32.gmra.mxu1 %v682_v46  ;;  %v3394_v5 = vpop.f32.mrf.mxu1 }
  0xd7   :  { %v683_v54 = vmax.f32 %v389_v50, 0.0  ;;  %v404_v57 = vadd.f32 %v2385_v52, %v3337_v18 }
  0xd8   :  { %v398_v58 = vpop.f32.mrf.mxu0  ;;  %v3404_v14 = vpop.f32.mrf.mxu1 }
  0xd9   :  { %v399_v60 = vadd.f32 %v3337_v18, %v398_v58  ;;  %2508 = vmatprep.mubr.f32.mxu1 %v683_v54  ;;  %v686_v2 = vmax.f32 %v404_v57, 0.0 }
  0xda   :  { %v2388_v62 = vpop.f32.mrf.mxu0  ;;  %2509 = vmatmul.mubr.f32.gmra.mxu1 %v684_v56  ;;  %v3414_v24 = vpop.f32.mrf.mxu1 }
  0xdb   :  { %v685_v0 = vmax.f32 %v399_v60, 0.0  ;;  %v414_v3 = vadd.f32 %v2388_v62, %v3337_v18 }
  0xdc   :  { %v408_v4 = vpop.f32.mrf.mxu0  ;;  %v3421_v32 = vpop.f32.mrf.mxu1 }
  0xdd   :  { %v409_v6 = vadd.f32 %v3337_v18, %v408_v4  ;;  %2511 = vmatprep.mubr.f32.mxu1 %v685_v0  ;;  %v688_v11 = vmax.f32 %v414_v3, 0.0 }
  0xde   :  { %v2391_v8 = vpop.f32.mrf.mxu0  ;;  %2512 = vmatmul.mubr.f32.gmra.mxu1 %v686_v2  ;;  %v3425_v41 = vpop.f32.mrf.mxu1 }
  0xdf   :  { %v687_v9 = vmax.f32 %v409_v6, 0.0  ;;  %v424_v12 = vadd.f32 %v2391_v8, %v3337_v18 }
  0xe0   :  { %v418_v13 = vpop.f32.mrf.mxu0  ;;  %v3429_v50 = vpop.f32.mrf.mxu1 }
  0xe1   :  { %v419_v15 = vadd.f32 %v3337_v18, %v418_v13  ;;  %2514 = vmatprep.mubr.f32.mxu1 %v687_v9  ;;  %v690_v21 = vmax.f32 %v424_v12, 0.0 }
  0xe2   :  { %v2394_v17 = vpop.f32.mrf.mxu0  ;;  %2515 = vmatmul.mubr.f32.gmra.mxu1 %v688_v11  ;;  %v3433_v58 = vpop.f32.mrf.mxu1 }
  0xe3   :  { %v689_v19 = vmax.f32 %v419_v15, 0.0  ;;  %v434_v22 = vadd.f32 %v2394_v17, %v3337_v18 }
  0xe4   :  { %v428_v23 = vpop.f32.mrf.mxu0  ;;  %v3437_v3 = vpop.f32.mrf.mxu1 }
  0xe5   :  { %v429_v25 = vadd.f32 %v3337_v18, %v428_v23  ;;  %2517 = vmatprep.mubr.f32.mxu1 %v689_v19  ;;  %v692_v29 = vmax.f32 %v434_v22, 0.0 }
  0xe6   :  { %v2397_v27 = vpop.f32.mrf.mxu0  ;;  %2518 = vmatmul.mubr.f32.gmra.mxu1 %v690_v21  ;;  %v3441_v11 = vpop.f32.mrf.mxu1 }
  0xe7   :  { %v691_v28 = vmax.f32 %v429_v25, 0.0  ;;  %v444_v30 = vadd.f32 %v2397_v27, %v3337_v18  ;;  %v519_v25 = vadd.f32 %v3337_v18, %v3358_v39 }
  0xe8   :  { %v438_v31 = vpop.f32.mrf.mxu0  ;;  %v3445_v20 = vpop.f32.mrf.mxu1 }
  0xe9   :  { %v439_v34 = vadd.f32 %v3337_v18, %v438_v31  ;;  %2520 = vmatprep.mubr.f32.mxu1 %v691_v28  ;;  %v694_v37 = vmax.f32 %v444_v30, 0.0 }
  0xea   :  { %v2400_v35 = vpop.f32.mrf.mxu0  ;;  %2521 = vmatmul.mubr.f32.gmra.mxu1 %v692_v29  ;;  %v598_v29 = vpop.f32.mrf.mxu1 }
  0xeb   :  { %v693_v36 = vmax.f32 %v439_v34, 0.0  ;;  %v454_v38 = vadd.f32 %v2400_v35, %v3337_v18  ;;  %v709_v34 = vmax.f32 %v519_v25, 0.0  ;;  %v529_v35 = vadd.f32 %v3337_v18, %v3370_v49 }
  0xec   :  { %v448_v40 = vpop.f32.mrf.mxu0 }
  0xed   :  { %v449_v42 = vadd.f32 %v3337_v18, %v448_v40  ;;  %2523 = vmatprep.mubr.f32.mxu1 %v693_v36  ;;  %v696_v46 = vmax.f32 %v454_v38, 0.0  ;;  %v3456_v38 = vpop.f32.mrf.mxu1  ;;  %v711_v39 = vmax.f32 %v529_v35, 0.0  ;;  %v539_v40 = vadd.f32 %v3337_v18, %v3382_v59 }
  0xee   :  { %v2403_v44 = vpop.f32.mrf.mxu0  ;;  %2524 = vmatmul.mubr.f32.gmra.mxu1 %v694_v37  ;;  %v524_v37 = vadd.f32 %v3352_v33, %v3337_v18  ;;  %v549_v33 = vadd.f32 %v3337_v18, %v3394_v5  ;;  %v559_v59 = vadd.f32 %v3337_v18, %v3414_v24  ;;  %v564_v24 = vadd.f32 %v3404_v14, %v3337_v18 }
  0xef   :  { %v695_v45 = vmax.f32 %v449_v42, 0.0  ;;  %v464_v47 = vadd.f32 %v2403_v44, %v3337_v18  ;;  %v534_v44 = vadd.f32 %v3364_v43, %v3337_v18  ;;  %v713_v49 = vmax.f32 %v539_v40, 0.0  ;;  %v1213_v43 = vld [vmem:[%s3900_s5] sm:$0xff] }
  0xf0   :  { %v458_v48 = vpop.f32.mrf.mxu0  ;;  %v710_v42 = vmax.f32 %v524_v37, 0.0  ;;  %2625 = vmatprep.subr.mxu0 %v1213_v43  ;;  %v584_v14 = vadd.f32 %v3429_v50, %v3337_v18  ;;  %v604_v50 = vadd.f32 %v3445_v20, %v3337_v18 }
  0xf1   :  { %v459_v51 = vadd.f32 %v3337_v18, %v458_v48  ;;  %2526 = vmatprep.mubr.f32.mxu1 %v695_v45  ;;  %v698_v55 = vmax.f32 %v464_v47, 0.0  ;;  %v608_v45 = vpop.f32.mrf.mxu1  ;;  %v544_v47 = vadd.f32 %v3376_v53, %v3337_v18  ;;  %2626 = vmatpush3.msra.mxu0 %v1213_v43  ;;  %v717_v53 = vmax.f32 %v559_v59, 0.0  ;;  %v3508_v59 = vld [vmem:[%s3901_s4] ss:$0 sm:$0xff] }
  0xf2   :  { %v2406_v52 = vpop.f32.mrf.mxu0  ;;  %2527 = vmatmul.mubr.f32.gmra.mxu1 %v696_v46  ;;  %v712_v46 = vmax.f32 %v534_v44, 0.0 }
  0xf3   :  { %v697_v54 = vmax.f32 %v459_v51, 0.0  ;;  %v474_v56 = vadd.f32 %v2406_v52, %v3337_v18  ;;  %v2451_v48 = vpop.f32.mrf.mxu1  ;;  %v715_v51 = vmax.f32 %v549_v33, 0.0  ;;  %v714_v52 = vmax.f32 %v544_v47, 0.0 }
  0xf4   :  { %v468_v57 = vpop.f32.mrf.mxu0 }
  0xf5   :  { %v469_v60 = vadd.f32 %v3337_v18, %v468_v57  ;;  %2529 = vmatprep.mubr.f32.mxu1 %v697_v54  ;;  %v700_v0 = vmax.f32 %v474_v56, 0.0  ;;  %v554_v54 = vadd.f32 %v3388_v63, %v3337_v18  ;;  %v618_v5 = vpop.f32.mrf.mxu1  ;;  %v579_v63 = vadd.f32 %v3337_v18, %v3433_v58 }
  0xf6   :  { %v2409_v61 = vpop.f32.mrf.mxu0  ;;  %2530 = vmatmul.mubr.f32.gmra.mxu1 %v698_v55  ;;  %v569_v55 = vadd.f32 %v3337_v18, %v3425_v41  ;;  %v589_v41 = vadd.f32 %v3337_v18, %v3441_v11  ;;  %v599_v58 = vadd.f32 %v3337_v18, %v598_v29 }
  0xf7   :  { %v699_v62 = vmax.f32 %v469_v60, 0.0  ;;  %v484_v1 = vadd.f32 %v2409_v61, %v3337_v18  ;;  %v716_v56 = vmax.f32 %v554_v54, 0.0  ;;  %v2454_v57 = vpop.f32.mrf.mxu1  ;;  %v718_v61 = vmax.f32 %v564_v24, 0.0 }
  0xf8   :  { %v478_v2 = vpop.f32.mrf.mxu0  ;;  %v719_v60 = vmax.f32 %v569_v55, 0.0 }
  0xf9   :  { %v479_v4 = vadd.f32 %v3337_v18, %v478_v2  ;;  %2532 = vmatprep.mubr.f32.mxu1 %v699_v62  ;;  %v702_v8 = vmax.f32 %v484_v1, 0.0  ;;  %v574_v62 = vadd.f32 %v3421_v32, %v3337_v18  ;;  %v721_v1 = vmax.f32 %v579_v63, 0.0 }
  0xfa   :  { %v2412_v6 = vpop.f32.mrf.mxu0  ;;  %2533 = vmatmul.mubr.f32.gmra.mxu1 %v700_v0  ;;  %v628_v0 = vpop.f32.mrf.mxu1  ;;  %v594_v32 = vadd.f32 %v3437_v3, %v3337_v18  ;;  %v614_v3 = vadd.f32 %v3456_v38, %v3337_v18 }
  0xfb   :  { %v701_v7 = vmax.f32 %v479_v4, 0.0  ;;  %v494_v9 = vadd.f32 %v2412_v6, %v3337_v18  ;;  %v720_v2 = vmax.f32 %v574_v62, 0.0  ;;  %v723_v6 = vmax.f32 %v589_v41, 0.0 }
  0xfc   :  { %v488_v10 = vpop.f32.mrf.mxu0  ;;  %v2457_v4 = vpop.f32.mrf.mxu1  ;;  %v724_v11 = vmax.f32 %v594_v32, 0.0 }
  0xfd   :  { %v489_v12 = vadd.f32 %v3337_v18, %v488_v10  ;;  %2535 = vmatprep.mubr.f32.mxu1 %v701_v7  ;;  %v704_v16 = vmax.f32 %v494_v9, 0.0  ;;  %v722_v7 = vmax.f32 %v584_v14, 0.0  ;;  %v725_v9 = vmax.f32 %v599_v58, 0.0 }
  0xfe   :  { %v2415_v13 = vpop.f32.mrf.mxu0  ;;  %2536 = vmatmul.mubr.f32.gmra.mxu1 %v702_v8  ;;  %v638_v8 = vpop.f32.mrf.mxu1  ;;  %v609_v10 = vadd.f32 %v3337_v18, %v608_v45  ;;  %v644_v35 = vadd.f32 %v2457_v4, %v3337_v18 }
  0xff   :  { %v703_v15 = vmax.f32 %v489_v12, 0.0  ;;  %v504_v17 = vadd.f32 %v2415_v13, %v3337_v18 }
 0x100   :  { %v498_v19 = vpop.f32.mrf.mxu0  ;;  %v2460_v12 = vpop.f32.mrf.mxu1  ;;  %v727_v13 = vmax.f32 %v609_v10, 0.0 }
 0x101   :  { %v499_v21 = vadd.f32 %v3337_v18, %v498_v19  ;;  %2538 = vmatprep.mubr.f32.mxu1 %v703_v15  ;;  %v706_v26 = vmax.f32 %v504_v17, 0.0  ;;  %v619_v15 = vadd.f32 %v3337_v18, %v618_v5  ;;  %v654_v40 = vadd.f32 %v2460_v12, %v3337_v18 }
 0x102   :  { %v2418_v22 = vpop.f32.mrf.mxu0  ;;  %2539 = vmatmul.mubr.f32.gmra.mxu1 %v704_v16  ;;  %v726_v16 = vmax.f32 %v604_v50, 0.0  ;;  %v648_v17 = vpop.f32.mrf.mxu1 }
 0x103   :  { %v705_v23 = vmax.f32 %v499_v21, 0.0  ;;  %v514_v27 = vadd.f32 %v2418_v22, %v3337_v18  ;;  %v729_v19 = vmax.f32 %v619_v15, 0.0  ;;  %v629_v21 = vadd.f32 %v3337_v18, %v628_v0 }
 0x104   :  { %v508_v28 = vpop.f32.mrf.mxu0  ;;  %v728_v22 = vmax.f32 %v614_v3, 0.0  ;;  %v2463_v20 = vpop.f32.mrf.mxu1 }
 0x105   :  { %v509_v30 = vadd.f32 %v3337_v18, %v508_v28  ;;  %2541 = vmatprep.mubr.f32.mxu1 %v705_v23  ;;  %v708_v36 = vmax.f32 %v514_v27, 0.0  ;;  %v624_v23 = vadd.f32 %v2451_v48, %v3337_v18  ;;  %v731_v25 = vmax.f32 %v629_v21, 0.0 }
 0x106   :  { %2542 = vmatmul.mubr.f32.gmra.mxu1 %v706_v26  ;;  %v639_v26 = vadd.f32 %v3337_v18, %v638_v8  ;;  %v634_v28 = vadd.f32 %v2454_v57, %v3337_v18  ;;  %v658_v29 = vpop.f32.mrf.mxu1  ;;  %v664_v33 = vadd.f32 %v2463_v20, %v3337_v18 }
 0x107   :  { %v707_v31 = vmax.f32 %v509_v30, 0.0  ;;  %v730_v27 = vmax.f32 %v624_v23, 0.0  ;;  %v659_v38 = vadd.f32 %v3337_v18, %v658_v29 }
 0x108   :  { %v733_v30 = vmax.f32 %v639_v26, 0.0  ;;  %v738_v47 = vmax.f32 %v664_v33, 0.0 }
 0x109   :  { %2544 = vmatprep.mubr.f32.mxu1 %v707_v31  ;;  %v649_v31 = vadd.f32 %v3337_v18, %v648_v17  ;;  %v737_v44 = vmax.f32 %v659_v38, 0.0 }
 0x10a   :  { %2545 = vmatmul.mubr.f32.gmra.mxu1 %v708_v36  ;;  %v2466_v36 = vpop.f32.mrf.mxu1 }
 0x10b   :  { %2547 = vmatprep.mubr.f32.mxu1 %v709_v34  ;;  %v732_v34 = vmax.f32 %v634_v28, 0.0  ;;  %v735_v37 = vmax.f32 %v649_v31, 0.0  ;;  %v674_v48 = vadd.f32 %v2466_v36, %v3337_v18 }
 0x10e   :  { %2548 = vmatmul.mubr.f32.gmra.mxu1 %v710_v42  ;;  %v668_v42 = vpop.f32.mrf.mxu1 }
 0x10f   :  { %2550 = vmatprep.mubr.f32.mxu1 %v711_v39  ;;  %v734_v39 = vmax.f32 %v644_v35, 0.0  ;;  %v669_v45 = vadd.f32 %v3337_v18, %v668_v42 }
 0x112   :  { %2551 = vmatmul.mubr.f32.gmra.mxu1 %v712_v46  ;;  %v739_v46 = vmax.f32 %v669_v45, 0.0 }
 0x113   :  { %2553 = vmatprep.mubr.f32.mxu1 %v713_v49  ;;  %v736_v49 = vmax.f32 %v654_v40, 0.0 }
 0x116   :  { %2554 = vmatmul.mubr.f32.gmra.mxu1 %v714_v52 }
 0x117   :  { %2556 = vmatprep.mubr.f32.mxu1 %v715_v51  ;;  %v740_v51 = vmax.f32 %v674_v48, 0.0 }
 0x11a   :  { %2557 = vmatmul.mubr.f32.gmra.mxu1 %v716_v56 }
 0x11b   :  { %2559 = vmatprep.mubr.f32.mxu1 %v717_v53 }
 0x11e   :  { %2560 = vmatmul.mubr.f32.gmra.mxu1 %v718_v61 }
 0x11f   :  { %2562 = vmatprep.mubr.f32.mxu1 %v719_v60 }
 0x122   :  { %2563 = vmatmul.mubr.f32.gmra.mxu1 %v720_v2 }
 0x123   :  { %2565 = vmatprep.mubr.f32.mxu1 %v721_v1 }
 0x126   :  { %2566 = vmatmul.mubr.f32.gmra.mxu1 %v722_v7 }
 0x127   :  { %2568 = vmatprep.mubr.f32.mxu1 %v723_v6 }
 0x12a   :  { %2569 = vmatmul.mubr.f32.gmra.mxu1 %v724_v11 }
 0x12b   :  { %2571 = vmatprep.mubr.f32.mxu1 %v725_v9 }
 0x12e   :  { %2572 = vmatmul.mubr.f32.gmra.mxu1 %v726_v16 }
 0x12f   :  { %2574 = vmatprep.mubr.f32.mxu1 %v727_v13 }
 0x132   :  { %2575 = vmatmul.mubr.f32.gmra.mxu1 %v728_v22 }
 0x133   :  { %2577 = vmatprep.mubr.f32.mxu1 %v729_v19 }
 0x136   :  { %2578 = vmatmul.mubr.f32.gmra.mxu1 %v730_v27 }
 0x137   :  { %2580 = vmatprep.mubr.f32.mxu1 %v731_v25 }
 0x13a   :  { %2581 = vmatmul.mubr.f32.gmra.mxu1 %v732_v34 }
 0x13b   :  { %2583 = vmatprep.mubr.f32.mxu1 %v733_v30 }
 0x13e   :  { %2584 = vmatmul.mubr.f32.gmra.mxu1 %v734_v39 }
 0x13f   :  { %2586 = vmatprep.mubr.f32.mxu1 %v735_v37 }
 0x142   :  { %2587 = vmatmul.mubr.f32.gmra.mxu1 %v736_v49 }
 0x143   :  { %2589 = vmatprep.mubr.f32.mxu1 %v737_v44 }
 0x146   :  { %2590 = vmatmul.mubr.f32.gmra.mxu1 %v738_v47 }
 0x147   :  { %2592 = vmatprep.mubr.f32.mxu1 %v739_v46 }
 0x14a   :  { %2593 = vmatmul.mubr.f32.gmra.mxu1 %v740_v51 }
 0x18e   :  { %v2501_v43 = vpop.f32.mrf.mxu1 }
 0x18f   :  { %v836_v52 = vadd.f32 %v2501_v43, %v3508_v59 }
 0x190   :  { %v830_v54 = vpop.f32.mrf.mxu1 }
 0x191   :  { %v831_v5 = vadd.f32 %v3508_v59, %v830_v54  ;;  %v1150_v56 = vmax.f32 %v836_v52, 0.0 }
 0x192   :  { %v2504_v53 = vpop.f32.mrf.mxu1 }
 0x193   :  { %v1149_v55 = vmax.f32 %v831_v5, 0.0  ;;  %v846_v18 = vadd.f32 %v2504_v53, %v3508_v59 }
 0x194   :  { %v840_v24 = vpop.f32.mrf.mxu1 }
 0x195   :  { %v841_v57 = vadd.f32 %v3508_v59, %v840_v24  ;;  %2627 = vmatprep.mubr.f32.mxu0 %v1149_v55  ;;  %v1152_v61 = vmax.f32 %v846_v18, 0.0 }
 0x196   :  { %v2507_v60 = vpop.f32.mrf.mxu1  ;;  %2628 = vmatmul.mubr.f32.vlgmr.msra.gmra.mxu0 %v1150_v56 }
 0x197   :  { %v1151_v63 = vmax.f32 %v841_v57, 0.0  ;;  %v856_v62 = vadd.f32 %v2507_v60, %v3508_v59 }
 0x198   :  { %v850_v0 = vpop.f32.mrf.mxu1 }
 0x199   :  { %v851_v1 = vadd.f32 %v3508_v59, %v850_v0  ;;  %2630 = vmatprep.mubr.f32.mxu0 %v1151_v63  ;;  %v1154_v14 = vmax.f32 %v856_v62, 0.0 }
 0x19a   :  { %v2510_v41 = vpop.f32.mrf.mxu1  ;;  %2631 = vmatmul.mubr.f32.gmra.mxu0 %v1152_v61 }
 0x19b   :  { %v1153_v2 = vmax.f32 %v851_v1, 0.0  ;;  %v866_v4 = vadd.f32 %v2510_v41, %v3508_v59 }
 0x19c   :  { %v860_v6 = vpop.f32.mrf.mxu1 }
 0x19d   :  { %v861_v58 = vadd.f32 %v3508_v59, %v860_v6  ;;  %2633 = vmatprep.mubr.f32.mxu0 %v1153_v2  ;;  %v1156_v8 = vmax.f32 %v866_v4, 0.0 }
 0x19e   :  { %v2513_v7 = vpop.f32.mrf.mxu1  ;;  %2634 = vmatmul.mubr.f32.gmra.mxu0 %v1154_v14 }
 0x19f   :  { %v1155_v32 = vmax.f32 %v861_v58, 0.0  ;;  %v876_v9 = vadd.f32 %v2513_v7, %v3508_v59 }
 0x1a0   :  { %v870_v10 = vpop.f32.mrf.mxu1 }
 0x1a1   :  { %v871_v11 = vadd.f32 %v3508_v59, %v870_v10  ;;  %2636 = vmatprep.mubr.f32.mxu0 %v1155_v32  ;;  %v1158_v13 = vmax.f32 %v876_v9, 0.0 }
 0x1a2   :  { %v2516_v50 = vpop.f32.mrf.mxu1  ;;  %2637 = vmatmul.mubr.f32.gmra.mxu0 %v1156_v8 }
 0x1a3   :  { %v1157_v12 = vmax.f32 %v871_v11, 0.0  ;;  %v886_v15 = vadd.f32 %v2516_v50, %v3508_v59 }
 0x1a4   :  { %v880_v16 = vpop.f32.mrf.mxu1 }
 0x1a5   :  { %v881_v3 = vadd.f32 %v3508_v59, %v880_v16  ;;  %2639 = vmatprep.mubr.f32.mxu0 %v1157_v12  ;;  %v1160_v21 = vmax.f32 %v886_v15, 0.0 }
 0x1a6   :  { %v2519_v17 = vpop.f32.mrf.mxu1  ;;  %2640 = vmatmul.mubr.f32.gmra.mxu0 %v1158_v13 }
 0x1a7   :  { %v1159_v19 = vmax.f32 %v881_v3, 0.0  ;;  %v896_v22 = vadd.f32 %v2519_v17, %v3508_v59 }
 0x1a8   :  { %v890_v23 = vpop.f32.mrf.mxu1 }
 0x1a9   :  { %v891_v20 = vadd.f32 %v3508_v59, %v890_v23  ;;  %2642 = vmatprep.mubr.f32.mxu0 %v1159_v19  ;;  %v1162_v27 = vmax.f32 %v896_v22, 0.0 }
 0x1aa   :  { %v2522_v25 = vpop.f32.mrf.mxu1  ;;  %2643 = vmatmul.mubr.f32.gmra.mxu0 %v1160_v21 }
 0x1ab   :  { %v1161_v26 = vmax.f32 %v891_v20, 0.0  ;;  %v906_v28 = vadd.f32 %v2522_v25, %v3508_v59 }
 0x1ac   :  { %v900_v29 = vpop.f32.mrf.mxu1 }
 0x1ad   :  { %v901_v30 = vadd.f32 %v3508_v59, %v900_v29  ;;  %2645 = vmatprep.mubr.f32.mxu0 %v1161_v26  ;;  %v1164_v35 = vmax.f32 %v906_v28, 0.0 }
 0x1ae   :  { %v2525_v31 = vpop.f32.mrf.mxu1  ;;  %2646 = vmatmul.mubr.f32.gmra.mxu0 %v1162_v27 }
 0x1af   :  { %v1163_v34 = vmax.f32 %v901_v30, 0.0  ;;  %v916_v36 = vadd.f32 %v2525_v31, %v3508_v59 }
 0x1b0   :  { %v910_v37 = vpop.f32.mrf.mxu1 }
 0x1b1   :  { %v911_v38 = vadd.f32 %v3508_v59, %v910_v37  ;;  %2648 = vmatprep.mubr.f32.mxu0 %v1163_v34  ;;  %v1166_v42 = vmax.f32 %v916_v36, 0.0 }
 0x1b2   :  { %v2528_v39 = vpop.f32.mrf.mxu1  ;;  %2649 = vmatmul.mubr.f32.gmra.mxu0 %v1164_v35 }
 0x1b3   :  { %v1165_v40 = vmax.f32 %v911_v38, 0.0  ;;  %v926_v44 = vadd.f32 %v2528_v39, %v3508_v59 }
 0x1b4   :  { %v920_v45 = vpop.f32.mrf.mxu1 }
 0x1b5   :  { %v921_v49 = vadd.f32 %v3508_v59, %v920_v45  ;;  %2651 = vmatprep.mubr.f32.mxu0 %v1165_v40  ;;  %v1168_v47 = vmax.f32 %v926_v44, 0.0 }
 0x1b6   :  { %v2531_v33 = vpop.f32.mrf.mxu1  ;;  %2652 = vmatmul.mubr.f32.gmra.mxu0 %v1166_v42 }
 0x1b7   :  { %v1167_v46 = vmax.f32 %v921_v49, 0.0  ;;  %v936_v48 = vadd.f32 %v2531_v33, %v3508_v59 }
 0x1b8   :  { %v930_v51 = vpop.f32.mrf.mxu1 }
 0x1b9   :  { %v931_v43 = vadd.f32 %v3508_v59, %v930_v51  ;;  %2654 = vmatprep.mubr.f32.mxu0 %v1167_v46  ;;  %v1170_v5 = vmax.f32 %v936_v48, 0.0 }
 0x1ba   :  { %v2534_v52 = vpop.f32.mrf.mxu1  ;;  %2655 = vmatmul.mubr.f32.gmra.mxu0 %v1168_v47 }
 0x1bb   :  { %v1169_v54 = vmax.f32 %v931_v43, 0.0  ;;  %v946_v53 = vadd.f32 %v2534_v52, %v3508_v59 }
 0x1bc   :  { %v940_v55 = vpop.f32.mrf.mxu1 }
 0x1bd   :  { %v941_v56 = vadd.f32 %v3508_v59, %v940_v55  ;;  %2657 = vmatprep.mubr.f32.mxu0 %v1169_v54  ;;  %v1172_v57 = vmax.f32 %v946_v53, 0.0 }
 0x1be   :  { %v2537_v18 = vpop.f32.mrf.mxu1  ;;  %2658 = vmatmul.mubr.f32.gmra.mxu0 %v1170_v5 }
 0x1bf   :  { %v1171_v24 = vmax.f32 %v941_v56, 0.0  ;;  %v956_v60 = vadd.f32 %v2537_v18, %v3508_v59 }
 0x1c0   :  { %v950_v63 = vpop.f32.mrf.mxu1 }
 0x1c1   :  { %v951_v61 = vadd.f32 %v3508_v59, %v950_v63  ;;  %2660 = vmatprep.mubr.f32.mxu0 %v1171_v24  ;;  %v1174_v1 = vmax.f32 %v956_v60, 0.0 }
 0x1c2   :  { %v2540_v62 = vpop.f32.mrf.mxu1  ;;  %2661 = vmatmul.mubr.f32.gmra.mxu0 %v1172_v57 }
 0x1c3   :  { %v1173_v0 = vmax.f32 %v951_v61, 0.0  ;;  %v966_v41 = vadd.f32 %v2540_v62, %v3508_v59 }
 0x1c4   :  { %v960_v2 = vpop.f32.mrf.mxu1 }
 0x1c5   :  { %v961_v14 = vadd.f32 %v3508_v59, %v960_v2  ;;  %2663 = vmatprep.mubr.f32.mxu0 %v1173_v0  ;;  %v1176_v58 = vmax.f32 %v966_v41, 0.0 }
 0x1c6   :  { %v2543_v4 = vpop.f32.mrf.mxu1  ;;  %2664 = vmatmul.mubr.f32.gmra.mxu0 %v1174_v1 }
 0x1c7   :  { %v1175_v6 = vmax.f32 %v961_v14, 0.0  ;;  %v976_v7 = vadd.f32 %v2543_v4, %v3508_v59 }
 0x1c8   :  { %v970_v32 = vpop.f32.mrf.mxu1 }
 0x1c9   :  { %v971_v8 = vadd.f32 %v3508_v59, %v970_v32  ;;  %2666 = vmatprep.mubr.f32.mxu0 %v1175_v6  ;;  %v1178_v11 = vmax.f32 %v976_v7, 0.0 }
 0x1ca   :  { %v2546_v9 = vpop.f32.mrf.mxu1  ;;  %2667 = vmatmul.mubr.f32.gmra.mxu0 %v1176_v58 }
 0x1cb   :  { %v1177_v10 = vmax.f32 %v971_v8, 0.0  ;;  %v986_v50 = vadd.f32 %v2546_v9, %v3508_v59 }
 0x1cc   :  { %v980_v12 = vpop.f32.mrf.mxu1 }
 0x1cd   :  { %v981_v13 = vadd.f32 %v3508_v59, %v980_v12  ;;  %2669 = vmatprep.mubr.f32.mxu0 %v1177_v10  ;;  %v1180_v3 = vmax.f32 %v986_v50, 0.0 }
 0x1ce   :  { %v2549_v15 = vpop.f32.mrf.mxu1  ;;  %2670 = vmatmul.mubr.f32.gmra.mxu0 %v1178_v11 }
 0x1cf   :  { %v1179_v16 = vmax.f32 %v981_v13, 0.0  ;;  %v996_v17 = vadd.f32 %v2549_v15, %v3508_v59 }
 0x1d0   :  { %v990_v19 = vpop.f32.mrf.mxu1 }
 0x1d1   :  { %v991_v21 = vadd.f32 %v3508_v59, %v990_v19  ;;  %2672 = vmatprep.mubr.f32.mxu0 %v1179_v16  ;;  %v1182_v20 = vmax.f32 %v996_v17, 0.0 }
 0x1d2   :  { %v2552_v22 = vpop.f32.mrf.mxu1  ;;  %2673 = vmatmul.mubr.f32.gmra.mxu0 %v1180_v3 }
 0x1d3   :  { %v1181_v23 = vmax.f32 %v991_v21, 0.0  ;;  %v1006_v25 = vadd.f32 %v2552_v22, %v3508_v59 }
 0x1d4   :  { %v1000_v26 = vpop.f32.mrf.mxu1 }
 0x1d5   :  { %v1001_v27 = vadd.f32 %v3508_v59, %v1000_v26  ;;  %2675 = vmatprep.mubr.f32.mxu0 %v1181_v23  ;;  %v1184_v30 = vmax.f32 %v1006_v25, 0.0 }
 0x1d6   :  { %v2555_v28 = vpop.f32.mrf.mxu1  ;;  %2676 = vmatmul.mubr.f32.gmra.mxu0 %v1182_v20 }
 0x1d7   :  { %v1183_v29 = vmax.f32 %v1001_v27, 0.0  ;;  %v1016_v31 = vadd.f32 %v2555_v28, %v3508_v59 }
 0x1d8   :  { %v1010_v34 = vpop.f32.mrf.mxu1 }
 0x1d9   :  { %v1011_v35 = vadd.f32 %v3508_v59, %v1010_v34  ;;  %2678 = vmatprep.mubr.f32.mxu0 %v1183_v29  ;;  %v1186_v38 = vmax.f32 %v1016_v31, 0.0 }
 0x1da   :  { %v2558_v36 = vpop.f32.mrf.mxu1  ;;  %2679 = vmatmul.mubr.f32.gmra.mxu0 %v1184_v30 }
 0x1db   :  { %v1185_v37 = vmax.f32 %v1011_v35, 0.0  ;;  %v1026_v39 = vadd.f32 %v2558_v36, %v3508_v59 }
 0x1dc   :  { %v1020_v40 = vpop.f32.mrf.mxu1 }
 0x1dd   :  { %v1021_v42 = vadd.f32 %v3508_v59, %v1020_v40  ;;  %2681 = vmatprep.mubr.f32.mxu0 %v1185_v37  ;;  %v1188_v49 = vmax.f32 %v1026_v39, 0.0 }
 0x1de   :  { %v2561_v44 = vpop.f32.mrf.mxu1  ;;  %2682 = vmatmul.mubr.f32.gmra.mxu0 %v1186_v38 }
 0x1df   :  { %v1187_v45 = vmax.f32 %v1021_v42, 0.0  ;;  %v1036_v33 = vadd.f32 %v2561_v44, %v3508_v59 }
 0x1e0   :  { %v1030_v46 = vpop.f32.mrf.mxu1 }
 0x1e1   :  { %v1031_v47 = vadd.f32 %v3508_v59, %v1030_v46  ;;  %2684 = vmatprep.mubr.f32.mxu0 %v1187_v45  ;;  %v1190_v43 = vmax.f32 %v1036_v33, 0.0 }
 0x1e2   :  { %v2564_v48 = vpop.f32.mrf.mxu1  ;;  %2685 = vmatmul.mubr.f32.gmra.mxu0 %v1188_v49 }
 0x1e3   :  { %v1189_v51 = vmax.f32 %v1031_v47, 0.0  ;;  %v1046_v52 = vadd.f32 %v2564_v48, %v3508_v59 }
 0x1e4   :  { %v1040_v54 = vpop.f32.mrf.mxu1 }
 0x1e5   :  { %v1041_v5 = vadd.f32 %v3508_v59, %v1040_v54  ;;  %2687 = vmatprep.mubr.f32.mxu0 %v1189_v51  ;;  %v1192_v56 = vmax.f32 %v1046_v52, 0.0 }
 0x1e6   :  { %v2567_v53 = vpop.f32.mrf.mxu1  ;;  %2688 = vmatmul.mubr.f32.gmra.mxu0 %v1190_v43 }
 0x1e7   :  { %v1191_v55 = vmax.f32 %v1041_v5, 0.0  ;;  %v1056_v18 = vadd.f32 %v2567_v53, %v3508_v59  ;;  %v3577_v5 = vld [vmem:[%s3902_s6] ss:$0 sm:$0xff] }
 0x1e8   :  { %v1050_v24 = vpop.f32.mrf.mxu1 }
 0x1e9   :  { %v1051_v57 = vadd.f32 %v3508_v59, %v1050_v24  ;;  %2690 = vmatprep.mubr.f32.mxu0 %v1191_v55  ;;  %v1194_v61 = vmax.f32 %v1056_v18, 0.0 }
 0x1ea   :  { %v2570_v60 = vpop.f32.mrf.mxu1  ;;  %2691 = vmatmul.mubr.f32.gmra.mxu0 %v1192_v56 }
 0x1eb   :  { %v1193_v63 = vmax.f32 %v1051_v57, 0.0  ;;  %v1066_v62 = vadd.f32 %v2570_v60, %v3508_v59 }
 0x1ec   :  { %v1060_v0 = vpop.f32.mrf.mxu1 }
 0x1ed   :  { %v1061_v1 = vadd.f32 %v3508_v59, %v1060_v0  ;;  %2693 = vmatprep.mubr.f32.mxu0 %v1193_v63  ;;  %v1196_v14 = vmax.f32 %v1066_v62, 0.0 }
 0x1ee   :  { %v2573_v41 = vpop.f32.mrf.mxu1  ;;  %2694 = vmatmul.mubr.f32.gmra.mxu0 %v1194_v61 }
 0x1ef   :  { %v1195_v2 = vmax.f32 %v1061_v1, 0.0  ;;  %v1076_v4 = vadd.f32 %v2573_v41, %v3508_v59 }
 0x1f0   :  { %v1070_v6 = vpop.f32.mrf.mxu1 }
 0x1f1   :  { %v1071_v58 = vadd.f32 %v3508_v59, %v1070_v6  ;;  %2696 = vmatprep.mubr.f32.mxu0 %v1195_v2  ;;  %v1198_v8 = vmax.f32 %v1076_v4, 0.0 }
 0x1f2   :  { %v2576_v7 = vpop.f32.mrf.mxu1  ;;  %2697 = vmatmul.mubr.f32.gmra.mxu0 %v1196_v14 }
 0x1f3   :  { %v1197_v32 = vmax.f32 %v1071_v58, 0.0  ;;  %v1086_v9 = vadd.f32 %v2576_v7, %v3508_v59 }
 0x1f4   :  { %v1080_v10 = vpop.f32.mrf.mxu1 }
 0x1f5   :  { %v1081_v11 = vadd.f32 %v3508_v59, %v1080_v10  ;;  %2699 = vmatprep.mubr.f32.mxu0 %v1197_v32  ;;  %v1200_v13 = vmax.f32 %v1086_v9, 0.0 }
 0x1f6   :  { %v2579_v50 = vpop.f32.mrf.mxu1  ;;  %2700 = vmatmul.mubr.f32.gmra.mxu0 %v1198_v8 }
 0x1f7   :  { %v1199_v12 = vmax.f32 %v1081_v11, 0.0  ;;  %v1096_v15 = vadd.f32 %v2579_v50, %v3508_v59 }
 0x1f8   :  { %v1090_v16 = vpop.f32.mrf.mxu1 }
 0x1f9   :  { %v1091_v3 = vadd.f32 %v3508_v59, %v1090_v16  ;;  %2702 = vmatprep.mubr.f32.mxu0 %v1199_v12  ;;  %v1202_v21 = vmax.f32 %v1096_v15, 0.0 }
 0x1fa   :  { %v2582_v17 = vpop.f32.mrf.mxu1  ;;  %2703 = vmatmul.mubr.f32.gmra.mxu0 %v1200_v13 }
 0x1fb   :  { %v1201_v19 = vmax.f32 %v1091_v3, 0.0  ;;  %v1106_v22 = vadd.f32 %v2582_v17, %v3508_v59 }
 0x1fc   :  { %v1100_v23 = vpop.f32.mrf.mxu1 }
 0x1fd   :  { %v1101_v20 = vadd.f32 %v3508_v59, %v1100_v23  ;;  %2705 = vmatprep.mubr.f32.mxu0 %v1201_v19  ;;  %v1204_v27 = vmax.f32 %v1106_v22, 0.0 }
 0x1fe   :  { %v2585_v25 = vpop.f32.mrf.mxu1  ;;  %2706 = vmatmul.mubr.f32.gmra.mxu0 %v1202_v21 }
 0x1ff   :  { %v1203_v26 = vmax.f32 %v1101_v20, 0.0  ;;  %v1116_v28 = vadd.f32 %v2585_v25, %v3508_v59 }
 0x200   :  { %v1110_v29 = vpop.f32.mrf.mxu1 }
 0x201   :  { %v1111_v30 = vadd.f32 %v3508_v59, %v1110_v29  ;;  %2708 = vmatprep.mubr.f32.mxu0 %v1203_v26  ;;  %v1206_v35 = vmax.f32 %v1116_v28, 0.0 }
 0x202   :  { %v2588_v31 = vpop.f32.mrf.mxu1  ;;  %2709 = vmatmul.mubr.f32.gmra.mxu0 %v1204_v27 }
 0x203   :  { %v1205_v34 = vmax.f32 %v1111_v30, 0.0  ;;  %v1126_v36 = vadd.f32 %v2588_v31, %v3508_v59 }
 0x204   :  { %v1120_v37 = vpop.f32.mrf.mxu1 }
 0x205   :  { %v1121_v38 = vadd.f32 %v3508_v59, %v1120_v37  ;;  %2711 = vmatprep.mubr.f32.mxu0 %v1205_v34  ;;  %v1208_v42 = vmax.f32 %v1126_v36, 0.0 }
 0x206   :  { %v2591_v39 = vpop.f32.mrf.mxu1  ;;  %2712 = vmatmul.mubr.f32.gmra.mxu0 %v1206_v35 }
 0x207   :  { %v1207_v40 = vmax.f32 %v1121_v38, 0.0  ;;  %v1136_v44 = vadd.f32 %v2591_v39, %v3508_v59 }
 0x208   :  { %v1130_v45 = vpop.f32.mrf.mxu1 }
 0x209   :  { %v1131_v49 = vadd.f32 %v3508_v59, %v1130_v45  ;;  %2714 = vmatprep.mubr.f32.mxu0 %v1207_v40  ;;  %v1210_v47 = vmax.f32 %v1136_v44, 0.0 }
 0x20a   :  { %v2594_v33 = vpop.f32.mrf.mxu1  ;;  %2715 = vmatmul.mubr.f32.gmra.mxu0 %v1208_v42 }
 0x20b   :  { %v1209_v46 = vmax.f32 %v1131_v49, 0.0  ;;  %v1146_v48 = vadd.f32 %v2594_v33, %v3508_v59 }
 0x20c   :  { %v1140_v51 = vpop.f32.mrf.mxu1 }
 0x20d   :  { %v1141_v43 = vadd.f32 %v3508_v59, %v1140_v51  ;;  %2717 = vmatprep.mubr.f32.mxu0 %v1209_v46  ;;  %v1212_v54 = vmax.f32 %v1146_v48, 0.0 }
 0x20e   :  { %2718 = vmatmul.mubr.f32.gmra.mxu0 %v1210_v47 }
 0x20f   :  { %v1211_v52 = vmax.f32 %v1141_v43, 0.0 }
 0x211   :  { %2720 = vmatprep.mubr.f32.mxu0 %v1211_v52 }
 0x212   :  { %2721 = vmatmul.mubr.f32.gmra.mxu0 %v1212_v54 }
 0x256   :  { %v2629_v53 = vpop.f32.mrf.mxu0 }
 0x257   :  { %v1308_v55 = vadd.f32 %v2629_v53, %v3577_v5 }
 0x258   :  { %v1302_v56 = vpop.f32.mrf.mxu0 }
 0x259   :  { %v1622_v18 = vsub.f32 0.0, %v1308_v55  ;;  %v1303_v24 = vadd.f32 %v3577_v5, %v1302_v56 }
 0x25a   :  { %v2632_v57 = vpop.f32.mrf.mxu0 }
 0x25b   :  { %v1687_v59 = vmul.f32 1.442695, %v1622_v18  ;;  %v1621_v60 = vsub.f32 0.0, %v1303_v24  ;;  %v1318_v63 = vadd.f32 %v2632_v57, %v3577_v5 }
 0x25c   :  { %v1312_v61 = vpop.f32.mrf.mxu0 }
 0x25d   :  { %2727 = vpow2.f32 %v1687_v59  ;;  %v1685_v62 = vmul.f32 1.442695, %v1621_v60  ;;  %v1624_v0 = vsub.f32 0.0, %v1318_v63  ;;  %v1313_v1 = vadd.f32 %v3577_v5, %v1312_v61 }
 0x25e   :  { %v2635_v41 = vpop.f32.mrf.mxu0 }
 0x25f   :  { %2729 = vpow2.f32 %v1685_v62  ;;  %v1691_v2 = vmul.f32 1.442695, %v1624_v0  ;;  %v1623_v14 = vsub.f32 0.0, %v1313_v1  ;;  %v1328_v4 = vadd.f32 %v2635_v41, %v3577_v5 }
 0x260   :  { %v1322_v6 = vpop.f32.mrf.mxu0 }
 0x261   :  { %2731 = vpow2.f32 %v1691_v2  ;;  %v1689_v58 = vmul.f32 1.442695, %v1623_v14  ;;  %v1626_v7 = vsub.f32 0.0, %v1328_v4  ;;  %v1323_v32 = vadd.f32 %v3577_v5, %v1322_v6 }
 0x262   :  { %v2638_v8 = vpop.f32.mrf.mxu0 }
 0x263   :  { %2733 = vpow2.f32 %v1689_v58  ;;  %v1695_v9 = vmul.f32 1.442695, %v1626_v7  ;;  %v1625_v10 = vsub.f32 0.0, %v1323_v32  ;;  %v1338_v11 = vadd.f32 %v2638_v8, %v3577_v5 }
 0x264   :  { %v1332_v50 = vpop.f32.mrf.mxu0 }
 0x265   :  { %2735 = vpow2.f32 %v1695_v9  ;;  %v1693_v12 = vmul.f32 1.442695, %v1625_v10  ;;  %v1628_v13 = vsub.f32 0.0, %v1338_v11  ;;  %v1333_v15 = vadd.f32 %v3577_v5, %v1332_v50 }
 0x266   :  { %v2641_v16 = vpop.f32.mrf.mxu0 }
 0x267   :  { %2737 = vpow2.f32 %v1693_v12  ;;  %v1699_v3 = vmul.f32 1.442695, %v1628_v13  ;;  %v1627_v17 = vsub.f32 0.0, %v1333_v15  ;;  %v1348_v19 = vadd.f32 %v2641_v16, %v3577_v5 }
 0x268   :  { %v1342_v21 = vpop.f32.mrf.mxu0 }
 0x269   :  { %2739 = vpow2.f32 %v1699_v3  ;;  %v1697_v22 = vmul.f32 1.442695, %v1627_v17  ;;  %v1630_v23 = vsub.f32 0.0, %v1348_v19  ;;  %v1343_v20 = vadd.f32 %v3577_v5, %v1342_v21 }
 0x26a   :  { %v2728_v25 = vpop.eup %2727  ;;  %v2644_v26 = vpop.f32.mrf.mxu0 }
 0x26b   :  { %v1814_v27 = vadd.f32 1.0, %v2728_v25  ;;  %2741 = vpow2.f32 %v1697_v22  ;;  %v1703_v28 = vmul.f32 1.442695, %v1630_v23  ;;  %v1629_v29 = vsub.f32 0.0, %v1343_v20 }
 0x26c   :  { %v2730_v30 = vpop.eup %2729  ;;  %v1358_v31 = vadd.f32 %v2644_v26, %v3577_v5  ;;  %v1352_v34 = vpop.f32.mrf.mxu0 }
 0x26d   :  { %2743 = vrcp.f32 %v1814_v27  ;;  %v1813_v35 = vadd.f32 1.0, %v2730_v30  ;;  %v1701_v36 = vmul.f32 1.442695, %v1629_v29  ;;  %v1353_v37 = vadd.f32 %v3577_v5, %v1352_v34 }
 0x26e   :  { %v2732_v38 = vpop.eup %2731  ;;  %2745 = vpow2.f32 %v1703_v28  ;;  %v1632_v39 = vsub.f32 0.0, %v1358_v31  ;;  %v2647_v40 = vpop.f32.mrf.mxu0 }
 0x26f   :  { %2747 = vrcp.f32 %v1813_v35  ;;  %v1816_v42 = vadd.f32 1.0, %v2732_v38  ;;  %v1631_v44 = vsub.f32 0.0, %v1353_v37  ;;  %v1368_v45 = vadd.f32 %v2647_v40, %v3577_v5 }
 0x270   :  { %v2734_v49 = vpop.eup %2733  ;;  %2749 = vpow2.f32 %v1701_v36  ;;  %v1707_v33 = vmul.f32 1.442695, %v1632_v39  ;;  %v1362_v46 = vpop.f32.mrf.mxu0 }
 0x271   :  { %2751 = vrcp.f32 %v1816_v42  ;;  %v1815_v47 = vadd.f32 1.0, %v2734_v49  ;;  %v1705_v48 = vmul.f32 1.442695, %v1631_v44  ;;  %v1634_v51 = vsub.f32 0.0, %v1368_v45 }
 0x272   :  { %v2736_v43 = vpop.eup %2735  ;;  %2753 = vpow2.f32 %v1707_v33  ;;  %v1363_v52 = vadd.f32 %v3577_v5, %v1362_v46  ;;  %v2650_v54 = vpop.f32.mrf.mxu0 }
 0x273   :  { %2755 = vrcp.f32 %v1815_v47  ;;  %v1818_v53 = vadd.f32 1.0, %v2736_v43  ;;  %v1711_v55 = vmul.f32 1.442695, %v1634_v51  ;;  %v1378_v56 = vadd.f32 %v2650_v54, %v3577_v5 }
 0x274   :  { %v2738_v18 = vpop.eup %2737  ;;  %2757 = vpow2.f32 %v1705_v48  ;;  %v1633_v24 = vsub.f32 0.0, %v1363_v52  ;;  %v1372_v57 = vpop.f32.mrf.mxu0 }
 0x275   :  { %2759 = vrcp.f32 %v1818_v53  ;;  %v1817_v59 = vadd.f32 1.0, %v2738_v18  ;;  %v1636_v60 = vsub.f32 0.0, %v1378_v56  ;;  %v1373_v63 = vadd.f32 %v3577_v5, %v1372_v57 }
 0x276   :  { %v2740_v61 = vpop.eup %2739  ;;  %2761 = vpow2.f32 %v1711_v55  ;;  %v1709_v62 = vmul.f32 1.442695, %v1633_v24  ;;  %v2653_v0 = vpop.f32.mrf.mxu0 }
 0x277   :  { %2763 = vrcp.f32 %v1817_v59  ;;  %v1820_v1 = vadd.f32 1.0, %v2740_v61  ;;  %v1715_v41 = vmul.f32 1.442695, %v1636_v60  ;;  %v1635_v2 = vsub.f32 0.0, %v1373_v63 }
 0x278   :  { %v2742_v14 = vpop.eup %2741  ;;  %2765 = vpow2.f32 %v1709_v62  ;;  %v1388_v4 = vadd.f32 %v2653_v0, %v3577_v5  ;;  %v1382_v6 = vpop.f32.mrf.mxu0 }
 0x279   :  { %2767 = vrcp.f32 %v1820_v1  ;;  %v1819_v58 = vadd.f32 1.0, %v2742_v14  ;;  %v1713_v7 = vmul.f32 1.442695, %v1635_v2  ;;  %v1383_v32 = vadd.f32 %v3577_v5, %v1382_v6 }
 0x27a   :  { %v2744_v8 = vpop.eup %2743  ;;  %2769 = vpow2.f32 %v1715_v41  ;;  %v1638_v9 = vsub.f32 0.0, %v1388_v4  ;;  %v2656_v10 = vpop.f32.mrf.mxu0 }
 0x27b   :  { %v2746_v11 = vpop.eup %2745  ;;  %2007 = vst.msk [vmem:[%s3903_s7 + $0x8] sm:$0xff] %vm2005_vm1, %v2744_v8  ;;  %2771 = vrcp.f32 %v1819_v58  ;;  %v1637_v50 = vsub.f32 0.0, %v1383_v32  ;;  %v1398_v12 = vadd.f32 %v2656_v10, %v3577_v5 }
 0x27c   :  { %v2748_v13 = vpop.eup %2747  ;;  %v1822_v15 = vadd.f32 1.0, %v2746_v11  ;;  %2773 = vpow2.f32 %v1713_v7  ;;  %v1719_v16 = vmul.f32 1.442695, %v1638_v9  ;;  %v1392_v3 = vpop.f32.mrf.mxu0 }
 0x27d   :  { %v2750_v17 = vpop.eup %2749  ;;  %2006 = vst.msk [vmem:[%s3903_s7] sm:$0xff] %vm2005_vm1, %v2748_v13  ;;  %v1717_v19 = vmul.f32 1.442695, %v1637_v50  ;;  %v1640_v21 = vsub.f32 0.0, %v1398_v12  ;;  %v1393_v22 = vadd.f32 %v3577_v5, %v1392_v3 }
 0x27e   :  { %v2752_v23 = vpop.eup %2751  ;;  %2775 = vrcp.f32 %v1822_v15  ;;  %v1821_v20 = vadd.f32 1.0, %v2750_v17  ;;  %v2659_v25 = vpop.f32.mrf.mxu0 }
 0x27f   :  { %v2754_v26 = vpop.eup %2753  ;;  %2009 = vst.msk [vmem:[%s3903_s7 + $0x18] sm:$0xff] %vm2005_vm1, %v2752_v23  ;;  %2777 = vpow2.f32 %v1719_v16  ;;  %v1723_v27 = vmul.f32 1.442695, %v1640_v21  ;;  %v1639_v28 = vsub.f32 0.0, %v1393_v22  ;;  %v1408_v29 = vadd.f32 %v2659_v25, %v3577_v5 }
 0x280   :  { %v2756_v30 = vpop.eup %2755  ;;  %2779 = vrcp.f32 %v1821_v20  ;;  %v1824_v31 = vadd.f32 1.0, %v2754_v26  ;;  %v1402_v34 = vpop.f32.mrf.mxu0 }
 0x281   :  { %v2758_v35 = vpop.eup %2757  ;;  %2008 = vst.msk [vmem:[%s3903_s7 + $0x10] sm:$0xff] %vm2005_vm1, %v2756_v30  ;;  %2781 = vpow2.f32 %v1717_v19  ;;  %v1721_v36 = vmul.f32 1.442695, %v1639_v28  ;;  %v1642_v37 = vsub.f32 0.0, %v1408_v29  ;;  %v1403_v38 = vadd.f32 %v3577_v5, %v1402_v34 }
 0x282   :  { %v2760_v39 = vpop.eup %2759  ;;  %2783 = vrcp.f32 %v1824_v31  ;;  %v1823_v40 = vadd.f32 1.0, %v2758_v35  ;;  %v2662_v42 = vpop.f32.mrf.mxu0 }
 0x283   :  { %v2762_v44 = vpop.eup %2761  ;;  %2011 = vst.msk [vmem:[%s3903_s7 + $0x28] sm:$0xff] %vm2005_vm1, %v2760_v39  ;;  %2785 = vpow2.f32 %v1723_v27  ;;  %v1727_v45 = vmul.f32 1.442695, %v1642_v37  ;;  %v1641_v49 = vsub.f32 0.0, %v1403_v38  ;;  %v1418_v33 = vadd.f32 %v2662_v42, %v3577_v5 }
 0x284   :  { %v2764_v46 = vpop.eup %2763  ;;  %2787 = vrcp.f32 %v1823_v40  ;;  %v1826_v47 = vadd.f32 1.0, %v2762_v44  ;;  %v1412_v48 = vpop.f32.mrf.mxu0 }
 0x285   :  { %v2766_v51 = vpop.eup %2765  ;;  %2010 = vst.msk [vmem:[%s3903_s7 + $0x20] sm:$0xff] %vm2005_vm1, %v2764_v46  ;;  %2789 = vpow2.f32 %v1721_v36  ;;  %v1725_v43 = vmul.f32 1.442695, %v1641_v49  ;;  %v1644_v52 = vsub.f32 0.0, %v1418_v33  ;;  %v1413_v54 = vadd.f32 %v3577_v5, %v1412_v48 }
 0x286   :  { %v2768_v53 = vpop.eup %2767  ;;  %2791 = vrcp.f32 %v1826_v47  ;;  %v1825_v55 = vadd.f32 1.0, %v2766_v51  ;;  %v2665_v56 = vpop.f32.mrf.mxu0 }
 0x287   :  { %v2770_v18 = vpop.eup %2769  ;;  %2013 = vst.msk [vmem:[%s3903_s7 + $0x38] sm:$0xff] %vm2005_vm1, %v2768_v53  ;;  %2793 = vpow2.f32 %v1727_v45  ;;  %v1731_v24 = vmul.f32 1.442695, %v1644_v52  ;;  %v1643_v57 = vsub.f32 0.0, %v1413_v54  ;;  %v1428_v59 = vadd.f32 %v2665_v56, %v3577_v5 }
 0x288   :  { %v2772_v60 = vpop.eup %2771  ;;  %2795 = vrcp.f32 %v1825_v55  ;;  %v1828_v63 = vadd.f32 1.0, %v2770_v18  ;;  %v1422_v61 = vpop.f32.mrf.mxu0 }
 0x289   :  { %v2774_v62 = vpop.eup %2773  ;;  %2012 = vst.msk [vmem:[%s3903_s7 + $0x30] sm:$0xff] %vm2005_vm1, %v2772_v60  ;;  %2797 = vpow2.f32 %v1725_v43  ;;  %v1729_v0 = vmul.f32 1.442695, %v1643_v57  ;;  %v1646_v1 = vsub.f32 0.0, %v1428_v59  ;;  %v1423_v41 = vadd.f32 %v3577_v5, %v1422_v61 }
 0x28a   :  { %2799 = vrcp.f32 %v1828_v63  ;;  %v1827_v2 = vadd.f32 1.0, %v2774_v62  ;;  %v2668_v14 = vpop.f32.mrf.mxu0 }
 0x28b   :  { %v2776_v4 = vpop.eup %2775  ;;  %2801 = vpow2.f32 %v1731_v24  ;;  %v1735_v6 = vmul.f32 1.442695, %v1646_v1  ;;  %v1645_v58 = vsub.f32 0.0, %v1423_v41  ;;  %v1438_v7 = vadd.f32 %v2668_v14, %v3577_v5 }
 0x28c   :  { %v2778_v32 = vpop.eup %2777  ;;  %2015 = vst.msk [vmem:[%s3903_s7 + $0x48] sm:$0xff] %vm2005_vm1, %v2776_v4  ;;  %2803 = vrcp.f32 %v1827_v2  ;;  %v1432_v8 = vpop.f32.mrf.mxu0 }
 0x28d   :  { %v2780_v9 = vpop.eup %2779  ;;  %v1830_v10 = vadd.f32 1.0, %v2778_v32  ;;  %2805 = vpow2.f32 %v1729_v0  ;;  %v1733_v11 = vmul.f32 1.442695, %v1645_v58  ;;  %v1648_v50 = vsub.f32 0.0, %v1438_v7 }
 0x28e   :  { %v2782_v12 = vpop.eup %2781  ;;  %2014 = vst.msk [vmem:[%s3903_s7 + $0x40] sm:$0xff] %vm2005_vm1, %v2780_v9  ;;  %2807 = vpow2.f32 %v1735_v6  ;;  %v1433_v13 = vadd.f32 %v3577_v5, %v1432_v8  ;;  %v2671_v15 = vpop.f32.mrf.mxu0 }
 0x28f   :  { %v2784_v16 = vpop.eup %2783  ;;  %2809 = vrcp.f32 %v1830_v10  ;;  %v1829_v3 = vadd.f32 1.0, %v2782_v12  ;;  %v1739_v17 = vmul.f32 1.442695, %v1648_v50  ;;  %v1448_v19 = vadd.f32 %v2671_v15, %v3577_v5 }
 0x290   :  { %v2786_v21 = vpop.eup %2785  ;;  %2017 = vst.msk [vmem:[%s3903_s7 + $0x58] sm:$0xff] %vm2005_vm1, %v2784_v16  ;;  %2811 = vpow2.f32 %v1733_v11  ;;  %v1647_v22 = vsub.f32 0.0, %v1433_v13  ;;  %v1442_v23 = vpop.f32.mrf.mxu0 }
 0x291   :  { %v2788_v20 = vpop.eup %2787  ;;  %2813 = vrcp.f32 %v1829_v3  ;;  %v1832_v25 = vadd.f32 1.0, %v2786_v21  ;;  %v1650_v26 = vsub.f32 0.0, %v1448_v19  ;;  %v1443_v27 = vadd.f32 %v3577_v5, %v1442_v23 }
 0x292   :  { %v2790_v28 = vpop.eup %2789  ;;  %2016 = vst.msk [vmem:[%s3903_s7 + $0x50] sm:$0xff] %vm2005_vm1, %v2788_v20  ;;  %2815 = vpow2.f32 %v1739_v17  ;;  %v1737_v29 = vmul.f32 1.442695, %v1647_v22  ;;  %v2674_v30 = vpop.f32.mrf.mxu0 }
 0x293   :  { %v2792_v31 = vpop.eup %2791  ;;  %2817 = vrcp.f32 %v1832_v25  ;;  %v1831_v34 = vadd.f32 1.0, %v2790_v28  ;;  %v1743_v35 = vmul.f32 1.442695, %v1650_v26  ;;  %v1649_v36 = vsub.f32 0.0, %v1443_v27 }
 0x294   :  { %v2794_v37 = vpop.eup %2793  ;;  %2019 = vst.msk [vmem:[%s3903_s7 + $0x68] sm:$0xff] %vm2005_vm1, %v2792_v31  ;;  %2819 = vpow2.f32 %v1737_v29  ;;  %v1458_v38 = vadd.f32 %v2674_v30, %v3577_v5  ;;  %v1452_v39 = vpop.f32.mrf.mxu0 }
 0x295   :  { %v2796_v40 = vpop.eup %2795  ;;  %2821 = vrcp.f32 %v1831_v34  ;;  %v1834_v42 = vadd.f32 1.0, %v2794_v37  ;;  %v1741_v44 = vmul.f32 1.442695, %v1649_v36  ;;  %v1453_v45 = vadd.f32 %v3577_v5, %v1452_v39 }
 0x296   :  { %v2798_v49 = vpop.eup %2797  ;;  %2018 = vst.msk [vmem:[%s3903_s7 + $0x60] sm:$0xff] %vm2005_vm1, %v2796_v40  ;;  %2823 = vpow2.f32 %v1743_v35  ;;  %v1652_v33 = vsub.f32 0.0, %v1458_v38  ;;  %v2677_v46 = vpop.f32.mrf.mxu0 }
 0x297   :  { %v2800_v47 = vpop.eup %2799  ;;  %2825 = vrcp.f32 %v1834_v42  ;;  %v1833_v48 = vadd.f32 1.0, %v2798_v49  ;;  %v1651_v51 = vsub.f32 0.0, %v1453_v45  ;;  %v1468_v43 = vadd.f32 %v2677_v46, %v3577_v5 }
 0x298   :  { %v2802_v52 = vpop.eup %2801  ;;  %2021 = vst.msk [vmem:[%s3903_s7 + $0x78] sm:$0xff] %vm2005_vm1, %v2800_v47  ;;  %2827 = vpow2.f32 %v1741_v44  ;;  %v1747_v54 = vmul.f32 1.442695, %v1652_v33  ;;  %v1462_v53 = vpop.f32.mrf.mxu0 }
 0x299   :  { %v2804_v55 = vpop.eup %2803  ;;  %2829 = vrcp.f32 %v1833_v48  ;;  %v1836_v56 = vadd.f32 1.0, %v2802_v52  ;;  %v1745_v18 = vmul.f32 1.442695, %v1651_v51  ;;  %v1654_v24 = vsub.f32 0.0, %v1468_v43 }
 0x29a   :  { %v2806_v57 = vpop.eup %2805  ;;  %2020 = vst.msk [vmem:[%s3903_s7 + $0x70] sm:$0xff] %vm2005_vm1, %v2804_v55  ;;  %2831 = vpow2.f32 %v1747_v54  ;;  %v1463_v59 = vadd.f32 %v3577_v5, %v1462_v53  ;;  %v2680_v60 = vpop.f32.mrf.mxu0 }
 0x29b   :  { %v2808_v63 = vpop.eup %2807  ;;  %2833 = vrcp.f32 %v1836_v56  ;;  %v1835_v61 = vadd.f32 1.0, %v2806_v57  ;;  %v1751_v62 = vmul.f32 1.442695, %v1654_v24  ;;  %v1478_v0 = vadd.f32 %v2680_v60, %v3577_v5 }
 0x29c   :  { %v2810_v1 = vpop.eup %2809  ;;  %v1838_v41 = vadd.f32 1.0, %v2808_v63  ;;  %2835 = vpow2.f32 %v1745_v18  ;;  %v1653_v2 = vsub.f32 0.0, %v1463_v59  ;;  %v1472_v14 = vpop.f32.mrf.mxu0 }
 0x29d   :  { %v2812_v4 = vpop.eup %2811  ;;  %2023 = vst.msk [vmem:[%s3903_s7 + $0x88] sm:$0xff] %vm2005_vm1, %v2810_v1  ;;  %2837 = vrcp.f32 %v1835_v61  ;;  %v1656_v6 = vsub.f32 0.0, %v1478_v0  ;;  %v1473_v58 = vadd.f32 %v3577_v5, %v1472_v14 }
 0x29e   :  { %v2814_v7 = vpop.eup %2813  ;;  %2839 = vrcp.f32 %v1838_v41  ;;  %v1837_v32 = vadd.f32 1.0, %v2812_v4  ;;  %v1749_v8 = vmul.f32 1.442695, %v1653_v2  ;;  %v2683_v9 = vpop.f32.mrf.mxu0 }
 0x29f   :  { %v2816_v10 = vpop.eup %2815  ;;  %2022 = vst.msk [vmem:[%s3903_s7 + $0x80] sm:$0xff] %vm2005_vm1, %v2814_v7  ;;  %2841 = vpow2.f32 %v1751_v62  ;;  %v1755_v11 = vmul.f32 1.442695, %v1656_v6  ;;  %v1655_v50 = vsub.f32 0.0, %v1473_v58  ;;  %v1488_v12 = vadd.f32 %v2683_v9, %v3577_v5 }
 0x2a0   :  { %v2818_v13 = vpop.eup %2817  ;;  %2843 = vrcp.f32 %v1837_v32  ;;  %v1840_v15 = vadd.f32 1.0, %v2816_v10  ;;  %v1482_v16 = vpop.f32.mrf.mxu0 }
 0x2a1   :  { %v2820_v3 = vpop.eup %2819  ;;  %2025 = vst.msk [vmem:[%s3903_s7 + $0x98] sm:$0xff] %vm2005_vm1, %v2818_v13  ;;  %2845 = vpow2.f32 %v1749_v8  ;;  %v1753_v17 = vmul.f32 1.442695, %v1655_v50  ;;  %v1658_v19 = vsub.f32 0.0, %v1488_v12  ;;  %v1483_v21 = vadd.f32 %v3577_v5, %v1482_v16 }
 0x2a2   :  { %v2822_v22 = vpop.eup %2821  ;;  %2847 = vrcp.f32 %v1840_v15  ;;  %v1839_v23 = vadd.f32 1.0, %v2820_v3  ;;  %v2686_v20 = vpop.f32.mrf.mxu0 }
 0x2a3   :  { %v2824_v25 = vpop.eup %2823  ;;  %2024 = vst.msk [vmem:[%s3903_s7 + $0x90] sm:$0xff] %vm2005_vm1, %v2822_v22  ;;  %2849 = vpow2.f32 %v1755_v11  ;;  %v1759_v26 = vmul.f32 1.442695, %v1658_v19  ;;  %v1657_v27 = vsub.f32 0.0, %v1483_v21  ;;  %v1498_v28 = vadd.f32 %v2686_v20, %v3577_v5 }
 0x2a4   :  { %v2826_v29 = vpop.eup %2825  ;;  %2851 = vrcp.f32 %v1839_v23  ;;  %v1842_v30 = vadd.f32 1.0, %v2824_v25  ;;  %v1492_v31 = vpop.f32.mrf.mxu0 }
 0x2a5   :  { %v2828_v34 = vpop.eup %2827  ;;  %2027 = vst.msk [vmem:[%s3903_s7 + $0xa8] sm:$0xff] %vm2005_vm1, %v2826_v29  ;;  %2853 = vpow2.f32 %v1753_v17  ;;  %v1757_v35 = vmul.f32 1.442695, %v1657_v27  ;;  %v1660_v36 = vsub.f32 0.0, %v1498_v28  ;;  %v1493_v37 = vadd.f32 %v3577_v5, %v1492_v31 }
 0x2a6   :  { %v2830_v38 = vpop.eup %2829  ;;  %2855 = vrcp.f32 %v1842_v30  ;;  %v1841_v39 = vadd.f32 1.0, %v2828_v34  ;;  %v2689_v40 = vpop.f32.mrf.mxu0 }
 0x2a7   :  { %v2832_v42 = vpop.eup %2831  ;;  %2026 = vst.msk [vmem:[%s3903_s7 + $0xa0] sm:$0xff] %vm2005_vm1, %v2830_v38  ;;  %2857 = vpow2.f32 %v1759_v26  ;;  %v1763_v44 = vmul.f32 1.442695, %v1660_v36  ;;  %v1659_v45 = vsub.f32 0.0, %v1493_v37  ;;  %v1508_v49 = vadd.f32 %v2689_v40, %v3577_v5 }
 0x2a8   :  { %v2834_v33 = vpop.eup %2833  ;;  %2859 = vrcp.f32 %v1841_v39  ;;  %v1844_v46 = vadd.f32 1.0, %v2832_v42  ;;  %v1502_v47 = vpop.f32.mrf.mxu0 }
 0x2a9   :  { %v2836_v48 = vpop.eup %2835  ;;  %2029 = vst.msk [vmem:[%s3903_s7 + $0xb8] sm:$0xff] %vm2005_vm1, %v2834_v33  ;;  %2861 = vpow2.f32 %v1757_v35  ;;  %v1761_v51 = vmul.f32 1.442695, %v1659_v45  ;;  %v1662_v43 = vsub.f32 0.0, %v1508_v49  ;;  %v1503_v52 = vadd.f32 %v3577_v5, %v1502_v47 }
 0x2aa   :  { %v2838_v54 = vpop.eup %2837  ;;  %2863 = vrcp.f32 %v1844_v46  ;;  %v1843_v53 = vadd.f32 1.0, %v2836_v48  ;;  %v2692_v55 = vpop.f32.mrf.mxu0 }
 0x2ab   :  { %v2840_v56 = vpop.eup %2839  ;;  %2028 = vst.msk [vmem:[%s3903_s7 + $0xb0] sm:$0xff] %vm2005_vm1, %v2838_v54  ;;  %2865 = vpow2.f32 %v1763_v44  ;;  %v1767_v18 = vmul.f32 1.442695, %v1662_v43  ;;  %v1661_v24 = vsub.f32 0.0, %v1503_v52  ;;  %v1518_v57 = vadd.f32 %v2692_v55, %v3577_v5 }
 0x2ac   :  { %v2842_v59 = vpop.eup %2841  ;;  %2031 = vst.msk [vmem:[%s3903_s7 + $0xc8] sm:$0xff] %vm2005_vm1, %v2840_v56  ;;  %2867 = vrcp.f32 %v1843_v53  ;;  %v1512_v60 = vpop.f32.mrf.mxu0 }
 0x2ad   :  { %v2844_v63 = vpop.eup %2843  ;;  %v1846_v61 = vadd.f32 1.0, %v2842_v59  ;;  %2869 = vpow2.f32 %v1761_v51  ;;  %v1765_v62 = vmul.f32 1.442695, %v1661_v24  ;;  %v1664_v0 = vsub.f32 0.0, %v1518_v57 }
 0x2ae   :  { %v2846_v1 = vpop.eup %2845  ;;  %2030 = vst.msk [vmem:[%s3903_s7 + $0xc0] sm:$0xff] %vm2005_vm1, %v2844_v63  ;;  %2871 = vpow2.f32 %v1767_v18  ;;  %v1513_v41 = vadd.f32 %v3577_v5, %v1512_v60  ;;  %v2695_v2 = vpop.f32.mrf.mxu0 }
 0x2af   :  { %v2848_v14 = vpop.eup %2847  ;;  %2873 = vrcp.f32 %v1846_v61  ;;  %v1845_v4 = vadd.f32 1.0, %v2846_v1  ;;  %v1771_v6 = vmul.f32 1.442695, %v1664_v0  ;;  %v1528_v58 = vadd.f32 %v2695_v2, %v3577_v5 }
 0x2b0   :  { %v2850_v7 = vpop.eup %2849  ;;  %2033 = vst.msk [vmem:[%s3903_s7 + $0xd8] sm:$0xff] %vm2005_vm1, %v2848_v14  ;;  %2875 = vpow2.f32 %v1765_v62  ;;  %v1663_v32 = vsub.f32 0.0, %v1513_v41  ;;  %v1522_v8 = vpop.f32.mrf.mxu0 }
 0x2b1   :  { %v2852_v9 = vpop.eup %2851  ;;  %2877 = vrcp.f32 %v1845_v4  ;;  %v1848_v10 = vadd.f32 1.0, %v2850_v7  ;;  %v1666_v11 = vsub.f32 0.0, %v1528_v58  ;;  %v1523_v50 = vadd.f32 %v3577_v5, %v1522_v8 }
 0x2b2   :  { %v2854_v12 = vpop.eup %2853  ;;  %2032 = vst.msk [vmem:[%s3903_s7 + $0xd0] sm:$0xff] %vm2005_vm1, %v2852_v9  ;;  %2879 = vpow2.f32 %v1771_v6  ;;  %v1769_v13 = vmul.f32 1.442695, %v1663_v32  ;;  %v2698_v15 = vpop.f32.mrf.mxu0 }
 0x2b3   :  { %v2856_v16 = vpop.eup %2855  ;;  %2881 = vrcp.f32 %v1848_v10  ;;  %v1847_v3 = vadd.f32 1.0, %v2854_v12  ;;  %v1775_v17 = vmul.f32 1.442695, %v1666_v11  ;;  %v1665_v19 = vsub.f32 0.0, %v1523_v50 }
 0x2b4   :  { %v2858_v21 = vpop.eup %2857  ;;  %2035 = vst.msk [vmem:[%s3903_s7 + $0xe8] sm:$0xff] %vm2005_vm1, %v2856_v16  ;;  %2883 = vpow2.f32 %v1769_v13  ;;  %v1538_v22 = vadd.f32 %v2698_v15, %v3577_v5  ;;  %v1532_v23 = vpop.f32.mrf.mxu0 }
 0x2b5   :  { %v2860_v20 = vpop.eup %2859  ;;  %2885 = vrcp.f32 %v1847_v3  ;;  %v1850_v25 = vadd.f32 1.0, %v2858_v21  ;;  %v1773_v26 = vmul.f32 1.442695, %v1665_v19  ;;  %v1533_v27 = vadd.f32 %v3577_v5, %v1532_v23 }
 0x2b6   :  { %v2862_v28 = vpop.eup %2861  ;;  %2034 = vst.msk [vmem:[%s3903_s7 + $0xe0] sm:$0xff] %vm2005_vm1, %v2860_v20  ;;  %2887 = vpow2.f32 %v1775_v17  ;;  %v1668_v29 = vsub.f32 0.0, %v1538_v22  ;;  %v2701_v30 = vpop.f32.mrf.mxu0 }
 0x2b7   :  { %v2864_v31 = vpop.eup %2863  ;;  %2889 = vrcp.f32 %v1850_v25  ;;  %v1849_v34 = vadd.f32 1.0, %v2862_v28  ;;  %v1667_v35 = vsub.f32 0.0, %v1533_v27  ;;  %v1548_v36 = vadd.f32 %v2701_v30, %v3577_v5 }
 0x2b8   :  { %v2866_v37 = vpop.eup %2865  ;;  %2037 = vst.msk [vmem:[%s3903_s7 + $0xf8] sm:$0xff] %vm2005_vm1, %v2864_v31  ;;  %2891 = vpow2.f32 %v1773_v26  ;;  %v1779_v38 = vmul.f32 1.442695, %v1668_v29  ;;  %v1542_v39 = vpop.f32.mrf.mxu0 }
 0x2b9   :  { %v2868_v40 = vpop.eup %2867  ;;  %2893 = vrcp.f32 %v1849_v34  ;;  %v1852_v42 = vadd.f32 1.0, %v2866_v37  ;;  %v1777_v44 = vmul.f32 1.442695, %v1667_v35  ;;  %v1670_v45 = vsub.f32 0.0, %v1548_v36 }
 0x2ba   :  { %v2870_v49 = vpop.eup %2869  ;;  %2036 = vst.msk [vmem:[%s3903_s7 + $0xf0] sm:$0xff] %vm2005_vm1, %v2868_v40  ;;  %2895 = vpow2.f32 %v1779_v38  ;;  %v1543_v33 = vadd.f32 %v3577_v5, %v1542_v39  ;;  %v2704_v46 = vpop.f32.mrf.mxu0 }
 0x2bb   :  { %v2872_v47 = vpop.eup %2871  ;;  %2897 = vrcp.f32 %v1852_v42  ;;  %v1851_v48 = vadd.f32 1.0, %v2870_v49  ;;  %v1783_v51 = vmul.f32 1.442695, %v1670_v45  ;;  %v1558_v43 = vadd.f32 %v2704_v46, %v3577_v5  ;;  %v2983_v49 = vld [vmem:[%s3902_s6] ss:$0 sm:$0xff] }
 0x2bc   :  { %v2874_v52 = vpop.eup %2873  ;;  %v1854_v54 = vadd.f32 1.0, %v2872_v47  ;;  %2899 = vpow2.f32 %v1777_v44  ;;  %v1669_v53 = vsub.f32 0.0, %v1543_v33  ;;  %v1552_v55 = vpop.f32.mrf.mxu0 }
 0x2bd   :  { %v2876_v56 = vpop.eup %2875  ;;  %2039 = vst.msk [vmem:[%s3903_s7 + $0x108] sm:$0xff] %vm2005_vm1, %v2874_v52  ;;  %2901 = vrcp.f32 %v1851_v48  ;;  %v1672_v18 = vsub.f32 0.0, %v1558_v43  ;;  %v1553_v24 = vadd.f32 %v3577_v5, %v1552_v55 }
 0x2be   :  { %v2878_v57 = vpop.eup %2877  ;;  %2903 = vrcp.f32 %v1854_v54  ;;  %v1853_v59 = vadd.f32 1.0, %v2876_v56  ;;  %v1781_v60 = vmul.f32 1.442695, %v1669_v53  ;;  %v2707_v63 = vpop.f32.mrf.mxu0 }
 0x2bf   :  { %v2880_v61 = vpop.eup %2879  ;;  %2038 = vst.msk [vmem:[%s3903_s7 + $0x100] sm:$0xff] %vm2005_vm1, %v2878_v57  ;;  %2905 = vpow2.f32 %v1783_v51  ;;  %v1787_v62 = vmul.f32 1.442695, %v1672_v18  ;;  %v1671_v0 = vsub.f32 0.0, %v1553_v24  ;;  %v1568_v1 = vadd.f32 %v2707_v63, %v3577_v5 }
 0x2c0   :  { %v2882_v41 = vpop.eup %2881  ;;  %2907 = vrcp.f32 %v1853_v59  ;;  %v1856_v2 = vadd.f32 1.0, %v2880_v61  ;;  %v1562_v14 = vpop.f32.mrf.mxu0 }
 0x2c1   :  { %v2884_v4 = vpop.eup %2883  ;;  %2041 = vst.msk [vmem:[%s3903_s7 + $0x118] sm:$0xff] %vm2005_vm1, %v2882_v41  ;;  %2909 = vpow2.f32 %v1781_v60  ;;  %v1785_v6 = vmul.f32 1.442695, %v1671_v0  ;;  %v1674_v58 = vsub.f32 0.0, %v1568_v1  ;;  %v1563_v7 = vadd.f32 %v3577_v5, %v1562_v14 }
 0x2c2   :  { %v2886_v32 = vpop.eup %2885  ;;  %2911 = vrcp.f32 %v1856_v2  ;;  %v1855_v8 = vadd.f32 1.0, %v2884_v4  ;;  %v2710_v9 = vpop.f32.mrf.mxu0 }
 0x2c3   :  { %v2888_v10 = vpop.eup %2887  ;;  %2040 = vst.msk [vmem:[%s3903_s7 + $0x110] sm:$0xff] %vm2005_vm1, %v2886_v32  ;;  %2913 = vpow2.f32 %v1787_v62  ;;  %v1791_v11 = vmul.f32 1.442695, %v1674_v58  ;;  %v1673_v50 = vsub.f32 0.0, %v1563_v7  ;;  %v1578_v12 = vadd.f32 %v2710_v9, %v3577_v5 }
 0x2c4   :  { %v2890_v13 = vpop.eup %2889  ;;  %2915 = vrcp.f32 %v1855_v8  ;;  %v1858_v15 = vadd.f32 1.0, %v2888_v10  ;;  %v1572_v16 = vpop.f32.mrf.mxu0 }
 0x2c5   :  { %v2892_v3 = vpop.eup %2891  ;;  %2043 = vst.msk [vmem:[%s3903_s7 + $0x128] sm:$0xff] %vm2005_vm1, %v2890_v13  ;;  %2917 = vpow2.f32 %v1785_v6  ;;  %v1789_v17 = vmul.f32 1.442695, %v1673_v50  ;;  %v1676_v19 = vsub.f32 0.0, %v1578_v12  ;;  %v1573_v21 = vadd.f32 %v3577_v5, %v1572_v16 }
 0x2c6   :  { %v2894_v22 = vpop.eup %2893  ;;  %2919 = vrcp.f32 %v1858_v15  ;;  %v1857_v23 = vadd.f32 1.0, %v2892_v3  ;;  %v2713_v20 = vpop.f32.mrf.mxu0 }
 0x2c7   :  { %v2896_v25 = vpop.eup %2895  ;;  %2042 = vst.msk [vmem:[%s3903_s7 + $0x120] sm:$0xff] %vm2005_vm1, %v2894_v22  ;;  %2921 = vpow2.f32 %v1791_v11  ;;  %v1795_v26 = vmul.f32 1.442695, %v1676_v19  ;;  %v1675_v27 = vsub.f32 0.0, %v1573_v21  ;;  %v1588_v28 = vadd.f32 %v2713_v20, %v3577_v5 }
 0x2c8   :  { %v2898_v29 = vpop.eup %2897  ;;  %2923 = vrcp.f32 %v1857_v23  ;;  %v1860_v30 = vadd.f32 1.0, %v2896_v25  ;;  %v1582_v31 = vpop.f32.mrf.mxu0 }
 0x2c9   :  { %v2900_v34 = vpop.eup %2899  ;;  %2045 = vst.msk [vmem:[%s3903_s7 + $0x138] sm:$0xff] %vm2005_vm1, %v2898_v29  ;;  %2925 = vpow2.f32 %v1789_v17  ;;  %v1793_v35 = vmul.f32 1.442695, %v1675_v27  ;;  %v1678_v36 = vsub.f32 0.0, %v1588_v28  ;;  %v1583_v37 = vadd.f32 %v3577_v5, %v1582_v31 }
 0x2ca   :  { %v2902_v38 = vpop.eup %2901  ;;  %2927 = vrcp.f32 %v1860_v30  ;;  %v1859_v39 = vadd.f32 1.0, %v2900_v34  ;;  %v2716_v40 = vpop.f32.mrf.mxu0 }
 0x2cb   :  { %v2904_v42 = vpop.eup %2903  ;;  %2044 = vst.msk [vmem:[%s3903_s7 + $0x130] sm:$0xff] %vm2005_vm1, %v2902_v38  ;;  %2929 = vpow2.f32 %v1795_v26  ;;  %v1799_v44 = vmul.f32 1.442695, %v1678_v36  ;;  %v1677_v45 = vsub.f32 0.0, %v1583_v37  ;;  %v1598_v33 = vadd.f32 %v2983_v49, %v2716_v40 }
 0x2cc   :  { %v2906_v46 = vpop.eup %2905  ;;  %2047 = vst.msk [vmem:[%s3903_s7 + $0x148] sm:$0xff] %vm2005_vm1, %v2904_v42  ;;  %2931 = vrcp.f32 %v1859_v39  ;;  %v1592_v5 = vpop.f32.mrf.mxu0 }
 0x2cd   :  { %v2908_v47 = vpop.eup %2907  ;;  %v1862_v48 = vadd.f32 1.0, %v2906_v46  ;;  %2933 = vpow2.f32 %v1793_v35  ;;  %v1797_v51 = vmul.f32 1.442695, %v1677_v45  ;;  %v1680_v43 = vsub.f32 0.0, %v1598_v33 }
 0x2ce   :  { %v2910_v52 = vpop.eup %2909  ;;  %2046 = vst.msk [vmem:[%s3903_s7 + $0x140] sm:$0xff] %vm2005_vm1, %v2908_v47  ;;  %2935 = vpow2.f32 %v1799_v44  ;;  %v1593_v54 = vadd.f32 %v2983_v49, %v1592_v5  ;;  %v2719_v53 = vpop.f32.mrf.mxu0 }
 0x2cf   :  { %v2912_v55 = vpop.eup %2911  ;;  %2937 = vrcp.f32 %v1862_v48  ;;  %v1861_v56 = vadd.f32 1.0, %v2910_v52  ;;  %v1803_v18 = vmul.f32 1.442695, %v1680_v43  ;;  %v1608_v24 = vadd.f32 %v2983_v49, %v2719_v53 }
 0x2d0   :  { %v2914_v57 = vpop.eup %2913  ;;  %2049 = vst.msk [vmem:[%s3903_s7 + $0x158] sm:$0xff] %vm2005_vm1, %v2912_v55  ;;  %2939 = vpow2.f32 %v1797_v51  ;;  %v1679_v59 = vsub.f32 0.0, %v1593_v54  ;;  %v1602_v60 = vpop.f32.mrf.mxu0 }
 0x2d1   :  { %v2916_v63 = vpop.eup %2915  ;;  %2941 = vrcp.f32 %v1861_v56  ;;  %v1864_v61 = vadd.f32 1.0, %v2914_v57  ;;  %v1682_v62 = vsub.f32 0.0, %v1608_v24  ;;  %v1603_v0 = vadd.f32 %v2983_v49, %v1602_v60 }
 0x2d2   :  { %v2918_v1 = vpop.eup %2917  ;;  %2048 = vst.msk [vmem:[%s3903_s7 + $0x150] sm:$0xff] %vm2005_vm1, %v2916_v63  ;;  %2943 = vpow2.f32 %v1803_v18  ;;  %v1801_v41 = vmul.f32 1.442695, %v1679_v59  ;;  %v2722_v2 = vpop.f32.mrf.mxu0 }
 0x2d3   :  { %v2920_v14 = vpop.eup %2919  ;;  %2945 = vrcp.f32 %v1864_v61  ;;  %v1863_v4 = vadd.f32 1.0, %v2918_v1  ;;  %v1807_v6 = vmul.f32 1.442695, %v1682_v62  ;;  %v1681_v58 = vsub.f32 0.0, %v1603_v0 }
 0x2d4   :  { %v2922_v7 = vpop.eup %2921  ;;  %2051 = vst.msk [vmem:[%s3903_s7 + $0x168] sm:$0xff] %vm2005_vm1, %v2920_v14  ;;  %2947 = vpow2.f32 %v1801_v41  ;;  %v1618_v32 = vadd.f32 %v2983_v49, %v2722_v2  ;;  %v1612_v8 = vpop.f32.mrf.mxu0 }
 0x2d5   :  { %v2924_v9 = vpop.eup %2923  ;;  %2949 = vrcp.f32 %v1863_v4  ;;  %v1866_v10 = vadd.f32 1.0, %v2922_v7  ;;  %v1805_v11 = vmul.f32 1.442695, %v1681_v58  ;;  %v1613_v50 = vadd.f32 %v2983_v49, %v1612_v8 }
 0x2d6   :  { %v2926_v12 = vpop.eup %2925  ;;  %2050 = vst.msk [vmem:[%s3903_s7 + $0x160] sm:$0xff] %vm2005_vm1, %v2924_v9  ;;  %2951 = vpow2.f32 %v1807_v6  ;;  %v1684_v13 = vsub.f32 0.0, %v1618_v32 }
 0x2d7   :  { %v2928_v15 = vpop.eup %2927  ;;  %2953 = vrcp.f32 %v1866_v10  ;;  %v1865_v16 = vadd.f32 1.0, %v2926_v12  ;;  %v1683_v3 = vsub.f32 0.0, %v1613_v50 }
 0x2d8   :  { %v2930_v17 = vpop.eup %2929  ;;  %2053 = vst.msk [vmem:[%s3903_s7 + $0x178] sm:$0xff] %vm2005_vm1, %v2928_v15  ;;  %2955 = vpow2.f32 %v1805_v11  ;;  %v1811_v19 = vmul.f32 1.442695, %v1684_v13 }
 0x2d9   :  { %v2932_v21 = vpop.eup %2931  ;;  %2957 = vrcp.f32 %v1865_v16  ;;  %v1868_v22 = vadd.f32 1.0, %v2930_v17  ;;  %v1809_v23 = vmul.f32 1.442695, %v1683_v3 }
 0x2da   :  { %v2934_v20 = vpop.eup %2933  ;;  %2052 = vst.msk [vmem:[%s3903_s7 + $0x170] sm:$0xff] %vm2005_vm1, %v2932_v21  ;;  %2959 = vpow2.f32 %v1811_v19 }
 0x2db   :  { %v2936_v25 = vpop.eup %2935  ;;  %2961 = vrcp.f32 %v1868_v22  ;;  %v1867_v26 = vadd.f32 1.0, %v2934_v20 }
 0x2dc   :  { %v2938_v27 = vpop.eup %2937  ;;  %v1870_v28 = vadd.f32 1.0, %v2936_v25  ;;  %2963 = vpow2.f32 %v1809_v23 }
 0x2dd   :  { %v2940_v29 = vpop.eup %2939  ;;  %2055 = vst.msk [vmem:[%s3903_s7 + $0x188] sm:$0xff] %vm2005_vm1, %v2938_v27  ;;  %2965 = vrcp.f32 %v1867_v26 }
 0x2de   :  { %v2942_v30 = vpop.eup %2941  ;;  %2967 = vrcp.f32 %v1870_v28  ;;  %v1869_v31 = vadd.f32 1.0, %v2940_v29 }
 0x2df   :  { %v2944_v34 = vpop.eup %2943  ;;  %2054 = vst.msk [vmem:[%s3903_s7 + $0x180] sm:$0xff] %vm2005_vm1, %v2942_v30 }
 0x2e0   :  { %v2946_v35 = vpop.eup %2945  ;;  %2969 = vrcp.f32 %v1869_v31  ;;  %v1872_v36 = vadd.f32 1.0, %v2944_v34 }
 0x2e1   :  { %v2948_v37 = vpop.eup %2947  ;;  %2057 = vst.msk [vmem:[%s3903_s7 + $0x198] sm:$0xff] %vm2005_vm1, %v2946_v35 }
 0x2e2   :  { %v2950_v38 = vpop.eup %2949  ;;  %2971 = vrcp.f32 %v1872_v36  ;;  %v1871_v39 = vadd.f32 1.0, %v2948_v37 }
 0x2e3   :  { %v2952_v40 = vpop.eup %2951  ;;  %2056 = vst.msk [vmem:[%s3903_s7 + $0x190] sm:$0xff] %vm2005_vm1, %v2950_v38 }
 0x2e4   :  { %v2954_v42 = vpop.eup %2953  ;;  %2973 = vrcp.f32 %v1871_v39  ;;  %v1874_v44 = vadd.f32 1.0, %v2952_v40 }
 0x2e5   :  { %v2956_v45 = vpop.eup %2955  ;;  %2059 = vst.msk [vmem:[%s3903_s7 + $0x1a8] sm:$0xff] %vm2005_vm1, %v2954_v42 }
 0x2e6   :  { %v2958_v49 = vpop.eup %2957  ;;  %2975 = vrcp.f32 %v1874_v44  ;;  %v1873_v33 = vadd.f32 1.0, %v2956_v45 }
 0x2e7   :  { %v2960_v46 = vpop.eup %2959  ;;  %2058 = vst.msk [vmem:[%s3903_s7 + $0x1a0] sm:$0xff] %vm2005_vm1, %v2958_v49 }
 0x2e8   :  { %v2962_v5 = vpop.eup %2961  ;;  %2977 = vrcp.f32 %v1873_v33  ;;  %v1876_v47 = vadd.f32 1.0, %v2960_v46 }
 0x2e9   :  { %v2964_v48 = vpop.eup %2963  ;;  %2061 = vst.msk [vmem:[%s3903_s7 + $0x1b8] sm:$0xff] %vm2005_vm1, %v2962_v5 }
 0x2ea   :  { %v2966_v51 = vpop.eup %2965  ;;  %2979 = vrcp.f32 %v1876_v47  ;;  %v1875_v43 = vadd.f32 1.0, %v2964_v48 }
 0x2eb   :  { %v2968_v52 = vpop.eup %2967  ;;  %2060 = vst.msk [vmem:[%s3903_s7 + $0x1b0] sm:$0xff] %vm2005_vm1, %v2966_v51 }
 0x2ec   :  { %2063 = vst.msk [vmem:[%s3903_s7 + $0x1c8] sm:$0xff] %vm2005_vm1, %v2968_v52  ;;  %2981 = vrcp.f32 %v1875_v43 }
 0x2ed   :  { %v2970_v54 = vpop.eup %2969 }
 0x2ee   :  { %2062 = vst.msk [vmem:[%s3903_s7 + $0x1c0] sm:$0xff] %vm2005_vm1, %v2970_v54 }
 0x2ef   :  { %v2972_v53 = vpop.eup %2971 }
 0x2f0   :  { %2065 = vst.msk [vmem:[%s3903_s7 + $0x1d8] sm:$0xff] %vm2005_vm1, %v2972_v53 }
 0x2f1   :  { %v2974_v55 = vpop.eup %2973 }
 0x2f2   :  { %2064 = vst.msk [vmem:[%s3903_s7 + $0x1d0] sm:$0xff] %vm2005_vm1, %v2974_v55 }
 0x2f3   :  { %v2976_v56 = vpop.eup %2975 }
 0x2f4   :  { %2067 = vst.msk [vmem:[%s3903_s7 + $0x1e8] sm:$0xff] %vm2005_vm1, %v2976_v56 }
 0x2f5   :  { %v2978_v18 = vpop.eup %2977 }
 0x2f6   :  { %2066 = vst.msk [vmem:[%s3903_s7 + $0x1e0] sm:$0xff] %vm2005_vm1, %v2978_v18 }
 0x2f7   :  { %v2980_v24 = vpop.eup %2979 }
 0x2f8   :  { %2069 = vst.msk [vmem:[%s3903_s7 + $0x1f8] sm:$0xff] %vm2005_vm1, %v2980_v24 }
 0x2f9   :  { %v2982_v57 = vpop.eup %2981 }
 0x2fa   :  { %2068 = vst.msk [vmem:[%s3903_s7 + $0x1f0] sm:$0xff] %vm2005_vm1, %v2982_v57 }

</bundles_post_ra>
